<compile_context>
chip_gen: v6e
topology: v6e:2x2x1
jax: 0.10.0
libtpu: 0.0.40
codegen_flags: <defaults>
</compile_context>

<pallas_src>
import functools
import math

import jax
import jax.numpy as jnp
from jax import lax
from jax.experimental import pallas as pl
from jax.experimental.pallas import tpu as pltpu

HEAD_SIZE = 64     # hard-coded 64 in RUN_CUDA_RWKV7g's .view(B, T, HC // 64, 64)
CHUNK_LEN = 24     # reference CUDA kernel constraint (T % 24 == 0)


# ---------------------------------------------------------------------------
# small helpers
# ---------------------------------------------------------------------------

def _sigmoid(x):
    return 1.0 / (1.0 + jnp.exp(-x))


def _softplus(x):
    # numerically stable softplus built only from exp/log/max (Mosaic-safe)
    return jnp.maximum(x, 0.0) + jnp.log(1.0 + jnp.exp(-jnp.abs(x)))


def _row_tile(M, target=512):
    """Largest multiple-of-8 row tile <= target that divides M (full M if small)."""
    if M <= target:
        return M
    t = min(target, M)
    t -= t % 8
    for tm in range(t, 7, -8):
        if M % tm == 0:
            return tm
    for tm in range(min(target, M), 0, -1):
        if M % tm == 0:
            return tm
    return M


def _pick_chunk(T):
    # Prefer larger chunks (better MXU utilization); 64 is the safe upper bound for
    # the exp(+-cum) scalings when operands are bf16.
    for c in (64, 48, 32, 24, 16, 8):
        if T % c == 0:
            return c
    raise ValueError(f"T={T} must be a multiple of 8")


def _dense_params():
    return pltpu.CompilerParams(
        dimension_semantics=("parallel",),
        vmem_limit_bytes=64 * 1024 * 1024,
    )


def _group_matrices(C, H):
    """(C,H) one-hot head-membership matrix and its transpose (per-head reductions /
    broadcasts as lane-dense MXU matmuls instead of in-kernel reshapes)."""
    n = C // H
    gmat = (jnp.arange(C, dtype=jnp.int32)[:, None] // n
            == jnp.arange(H, dtype=jnp.int32)[None, :]).astype(jnp.float32)
    return gmat, gmat.T


def time_shift(x):
    """nn.ZeroPad2d((0, 0, 1, -1)) on (B, T, C): shift by one step, zero at t=0."""
    B, T, C = x.shape
    return jnp.concatenate([jnp.zeros((B, 1, C), x.dtype), x[:, :-1, :]], axis=1)


# ---------------------------------------------------------------------------
# LayerNorm kernel
# ---------------------------------------------------------------------------

def _layernorm_kernel(x_ref, g_ref, b_ref, o_ref, *, eps):
    x = x_ref[...]
    mu = jnp.mean(x, axis=-1, keepdims=True)
    xc = x - mu
    var = jnp.mean(xc * xc, axis=-1, keepdims=True)
    o_ref[...] = xc * lax.rsqrt(var + eps) * g_ref[...] + b_ref[...]


def pallas_layernorm(x2d, gamma, beta, eps=1e-5):
    M, C = x2d.shape
    TM = _row_tile(M)
    row = pl.BlockSpec((TM, C), lambda i: (i, 0))
    vec = pl.BlockSpec((1, C), lambda i: (0, 0))
    return pl.pallas_call(
        functools.partial(_layernorm_kernel, eps=float(eps)),
        out_shape=jax.ShapeDtypeStruct((M, C), jnp.float32),
        grid=(M // TM,),
        in_specs=[row, vec, vec],
        out_specs=row,
        compiler_params=_dense_params(),
    )(x2d, gamma.reshape(1, C), beta.reshape(1, C))


# ---------------------------------------------------------------------------
# Fused Tmix projection kernel (mixes + r/k/v + all LoRAs + normalize(kk) + k_a/v mix)
# ---------------------------------------------------------------------------

def _make_tmix_proj_kernel(*, C, D_w, D_a, D_g, D_v, has_v):
    def kernel(*refs):
        if has_v:
            (x_ref, dx_ref, vf_ref, wt_ref, wb_ref, w2_ref, a2_ref, g2_ref, v2_ref,
             w0_ref, a0_ref, v0_ref, kkc_ref, kac_ref, gmat_ref, gmt_ref,
             r_o, w_o, k_o, v_o, aa_o, bb_o, g_o) = refs
        else:
            (x_ref, dx_ref, wt_ref, wb_ref, w2_ref, a2_ref, g2_ref,
             w0_ref, a0_ref, kkc_ref, kac_ref, gmat_ref, gmt_ref,
             r_o, w_o, k_o, v_o, aa_o, bb_o, g_o) = refs
            vf_ref = v2_ref = v0_ref = None

        mm = wt_ref.dtype                     # bf16 in production, f32 in check mode
        f32 = jnp.float32
        dot_ = functools.partial(jnp.dot, preferred_element_type=f32)

        # x @ W_top + (time_shift(x)-x) @ W_bot  (mix coefficients folded into W_bot):
        # two K=C dots accumulated in f32, no (TM, 2C) concat copy.
        proj = (dot_(x_ref[...].astype(mm), wt_ref[...])
                + dot_(dx_ref[...].astype(mm), wb_ref[...]))

        r = proj[:, 0:C]
        k_raw = proj[:, C:2 * C]
        v_raw = proj[:, 2 * C:3 * C]
        off = 3 * C
        h_w = proj[:, off:off + D_w]; off += D_w
        h_a = proj[:, off:off + D_a]; off += D_a
        h_g = proj[:, off:off + D_g]; off += D_g

        # LoRA up-projections (fused epilogue)
        w_pre = dot_(jnp.tanh(h_w).astype(mm), w2_ref[...])
        a_pre = dot_(h_a.astype(mm), a2_ref[...])
        g = dot_(_sigmoid(h_g).astype(mm), g2_ref[...])

        w_raw = -_softplus(-(w0_ref[...] + w_pre)) - 0.5
        a = _sigmoid(a0_ref[...] + a_pre)

        if has_v:
            h_v = proj[:, off:off + D_v]
            v_pre = dot_(h_v.astype(mm), v2_ref[...])
            v_gate = _sigmoid(v0_ref[...] + v_pre)
            v = v_raw + (vf_ref[...].astype(f32) - v_raw) * v_gate
        else:
            v = v_raw

        # kk = F.normalize(k * k_k, per-head); per-head sum via group matmul (f32, tiny)
        kk = k_raw * kkc_ref[...]
        ss = dot_(kk * kk, gmat_ref[...])                     # (TM, H)
        inv_norm = 1.0 / jnp.maximum(jnp.sqrt(ss), 1e-12)
        inv_c = dot_(inv_norm, gmt_ref[...])
        kkn = kk * inv_c
        k = k_raw * (1.0 + (a - 1.0) * kac_ref[...])

        r_o[...] = r.astype(r_o.dtype)
        w_o[...] = w_raw.astype(w_o.dtype)
        k_o[...] = k.astype(k_o.dtype)
        v_o[...] = v.astype(v_o.dtype)
        aa_o[...] = (-kkn).astype(aa_o.dtype)
        bb_o[...] = (kkn * a).astype(bb_o.dtype)
        g_o[...] = g.astype(g_o.dtype)
    return kernel


def pallas_tmix_proj(x2, dx2, vf2, prep, meta):
    M, C = x2.shape
    has_v = meta["has_v"]
    H = meta["H"]
    D_w, D_a, D_g, D_v = meta["D_w"], meta["D_a"], meta["D_g"], meta["D_v"]
    w_top = prep["w_top"]
    w_bot = prep["w_bot"]
    P = w_top.shape[1]
    act_dtype = w_top.dtype

    TM = _row_tile(M)
    row = pl.BlockSpec((TM, C), lambda i: (i, 0))

    def full(shape):
        return pl.BlockSpec(shape, lambda i: (0, 0))

    inputs = [x2, dx2]
    specs = [row, row]
    if has_v:
        inputs.append(vf2); specs.append(row)
    inputs += [w_top, w_bot, prep["w2"], prep["a2"], prep["g2"]]
    specs += [full((C, P)), full((C, P)), full((D_w, C)), full((D_a, C)), full((D_g, C))]
    if has_v:
        inputs.append(prep["v2"]); specs.append(full((D_v, C)))
    inputs += [prep["w0"], prep["a0"]]
    specs += [full((1, C)), full((1, C))]
    if has_v:
        inputs.append(prep["v0"]); specs.append(full((1, C)))
    inputs += [prep["k_k"], prep["k_a"], prep["gmat"], prep["gmt"]]
    specs += [full((1, C)), full((1, C)), full((C, H)), full((H, C))]

    kernel = _make_tmix_proj_kernel(C=C, D_w=D_w, D_a=D_a, D_g=D_g, D_v=D_v, has_v=has_v)
    return pl.pallas_call(
        kernel,
        out_shape=tuple(jax.ShapeDtypeStruct((M, C), act_dtype) for _ in range(7)),
        grid=(M // TM,),
        in_specs=specs,
        out_specs=tuple(row for _ in range(7)),
        compiler_params=_dense_params(),
    )(*inputs)


# ---------------------------------------------------------------------------
# RWKV7 recurrence: chunked (WindBackstepping-equivalent) formulation.
# Direct (B*T, H*N) layout, 2 heads packed per program (lane-dense 128-wide tiles),
# whole sequence per program with an in-kernel chunk loop (state stays in registers).
# ---------------------------------------------------------------------------

def _rwkv7_kernel(r_ref, w_ref, k_ref, v_ref, a_ref, b_ref, y_ref, *, L, G, N):
    f32 = jnp.float32
    md = r_ref.dtype                 # MXU operand dtype: bf16 in production, f32 in check
    NC = r_ref.shape[0]
    n_double = max(int(math.ceil(math.log2(L))) - 1, 0)

    row = lax.broadcasted_iota(jnp.int32, (L, L), 0)
    col = lax.broadcasted_iota(jnp.int32, (L, L), 1)
    incl = (row >= col).astype(f32)
    strict = (row > col).astype(f32)
    eye = (row == col).astype(f32)

    def c_(z):
        return z.astype(md)

    def dot_nn(a, b):
        return jnp.dot(c_(a), c_(b), preferred_element_type=f32)

    def dot_nt(a, b):                # a @ b^T
        return lax.dot_general(c_(a), c_(b), (((1,), (1,)), ((), ())),
                               preferred_element_type=f32)

    def dot_tn(a, b):                # a^T @ b
        return lax.dot_general(c_(a), c_(b), (((0,), (0,)), ((), ())),
                               preferred_element_type=f32)

    def chunk_step(c, states):
        r_c = r_ref[c].astype(f32)
        w_c = w_ref[c].astype(f32)
        k_c = k_ref[c].astype(f32)
        v_c = v_ref[c].astype(f32)
        a_c = a_ref[c].astype(f32)
        b_c = b_ref[c].astype(f32)

        new_states = []
        y_parts = []
        for g in range(G):
            s0 = g * N
            S = states[g]                      # (N, N) f32, rows = value, cols = key
            rr = r_c[:, s0:s0 + N]
            ww = w_c[:, s0:s0 + N]
            kk = k_c[:, s0:s0 + N]
            vv = v_c[:, s0:s0 + N]
            aa = a_c[:, s0:s0 + N]
            bb = b_c[:, s0:s0 + N]

            # log-decay & cumulative scalings: kept in f32 (they span ~exp(+-0.6*L)).
            logw = -jnp.exp(ww)
            cum = jnp.dot(incl, logw, preferred_element_type=f32)   # inclusive cumsum
            w_cum = jnp.exp(cum)                                     # W_t
            w_prev = jnp.exp(cum - logw)                             # W_{t-1}
            w_inv = jnp.exp(-cum)                                    # 1 / W_t
            w_last = jnp.exp(jnp.sum(logw, axis=0, keepdims=True))   # W_L, (1, N)

            r_d = rr * w_cum
            a_d = aa * w_prev
            k_i = kk * w_inv
            b_i = bb * w_inv

            m_ab = dot_nt(a_d, b_i) * strict
            m_ak = dot_nt(a_d, k_i) * strict

            # (I - m_ab)^{-1} exactly via nilpotent doubling: (I+M)(I+M^2)(I+M^4)...
            inv = eye + m_ab
            pmat = m_ab
            for _ in range(n_double):
                pmat = dot_nn(pmat, pmat)
                inv = inv + dot_nn(inv, pmat)

            sa = dot_nn(inv, dot_nt(a_d, S) + dot_nn(m_ak, vv))

            y_g = (dot_nt(r_d, S)
                   + dot_nn(dot_nt(r_d, k_i) * incl, vv)
                   + dot_nn(dot_nt(r_d, b_i) * incl, sa))

            S_new = (S * w_last
                     + dot_tn(vv, k_i * w_last)
                     + dot_tn(sa, b_i * w_last))

            y_parts.append(y_g)
            new_states.append(S_new)

        y_full = y_parts[0] if G == 1 else jnp.concatenate(y_parts, axis=1)
        y_ref[c] = y_full.astype(y_ref.dtype)      # lane-dense (L, G*N) store
        return tuple(new_states)

    init = tuple(jnp.zeros((N, N), f32) for _ in range(G))
    lax.fori_loop(0, NC, chunk_step, init)


def pallas_rwkv7(r2, w2, k2, v2, a2, b2, *, B, T, H):
    """All inputs (B*T, H*N) in head-major column layout; returns y of the same shape."""
    M, C = r2.shape
    assert M == B * T
    N = C // H
    L = _pick_chunk(T)
    NC = T // L
    G = 2 if H % 2 == 0 else 1        # pack 2 heads per program -> 128-lane tiles
    HG = H // G

    def to4(z):
        return z.reshape(B, NC, L, C)     # free row-major reshape, no transpose

    blk = pl.BlockSpec((None, NC, L, G * N), lambda b, hg: (b, 0, 0, hg))
    kernel = functools.partial(_rwkv7_kernel, L=L, G=G, N=N)
    y4 = pl.pallas_call(
        kernel,
        out_shape=jax.ShapeDtypeStruct((B, NC, L, C), r2.dtype),
        grid=(B, HG),
        in_specs=[blk] * 6,
        out_specs=blk,
        compiler_params=pltpu.CompilerParams(
            dimension_semantics=("parallel", "parallel"),
            vmem_limit_bytes=64 * 1024 * 1024),
    )(to4(r2), to4(w2), to4(k2), to4(v2), to4(a2), to4(b2))
    return y4.reshape(M, C)


# ---------------------------------------------------------------------------
# Fused Tmix output kernel: GroupNorm (+affine) + r*k*r_k bonus + gate + output proj
# + residual add
# ---------------------------------------------------------------------------

def _tmix_out_kernel(y_ref, r_ref, k_ref, v_ref, g_ref, res_ref,
                     gnw_ref, gnb_ref, rk_ref, gmat_ref, gmt_ref, wo_ref, o_ref,
                     *, inv_n, eps):
    f32 = jnp.float32
    dot_ = functools.partial(jnp.dot, preferred_element_type=f32)
    y = y_ref[...].astype(f32)
    gmat = gmat_ref[...]
    gmt = gmt_ref[...]
    mean_c = dot_(dot_(y, gmat) * inv_n, gmt)
    yc = y - mean_c
    var_c = dot_(dot_(yc * yc, gmat) * inv_n, gmt)
    normed = yc * lax.rsqrt(var_c + eps) * gnw_ref[...] + gnb_ref[...]

    r = r_ref[...].astype(f32)
    k = k_ref[...].astype(f32)
    v = v_ref[...].astype(f32)
    bonus = dot_(dot_(r * k * rk_ref[...], gmat), gmt) * v

    xo = (normed + bonus) * g_ref[...].astype(f32)
    o_ref[...] = res_ref[...] + dot_(xo.astype(wo_ref.dtype), wo_ref[...])


def pallas_tmix_out(y2, r2, k2, v2, g2, res2, prep, meta):
    M, C = y2.shape
    H = meta["H"]
    N = C // H
    TM = _row_tile(M)
    row = pl.BlockSpec((TM, C), lambda i: (i, 0))

    def full(shape):
        return pl.BlockSpec(shape, lambda i: (0, 0))

    return pl.pallas_call(
        functools.partial(_tmix_out_kernel, inv_n=1.0 / N, eps=float(meta["eps_gn"])),
        out_shape=jax.ShapeDtypeStruct((M, C), jnp.float32),
        grid=(M // TM,),
        in_specs=[row] * 6
                 + [full((1, C)), full((1, C)), full((1, C)),
                    full((C, H)), full((H, C)), full((C, C))],
        out_specs=row,
        compiler_params=_dense_params(),
    )(y2, r2, k2, v2, g2, res2, prep["gn_w"], prep["gn_b"], prep["r_k"],
      prep["gmat"], prep["gmt"], prep["Wo"])


# ---------------------------------------------------------------------------
# Fused CMix kernel: token-shift mix + relu^2 MLP + residual add
# ---------------------------------------------------------------------------

def _cmix_kernel(x_ref, dx_ref, res_ref, coef_ref, wk_ref, wv_ref, o_ref):
    dot_ = functools.partial(jnp.dot, preferred_element_type=jnp.float32)
    kx = x_ref[...] + dx_ref[...] * coef_ref[...]
    h = dot_(kx.astype(wk_ref.dtype), wk_ref[...])
    h = jnp.maximum(h, 0.0)
    h = h * h
    o_ref[...] = res_ref[...] + dot_(h.astype(wv_ref.dtype), wv_ref[...])


def pallas_cmix(x2, dx2, res2, prep):
    M, C = x2.shape
    wk = prep["ffn_Wk"]
    wv = prep["ffn_Wv"]
    F4 = wk.shape[1]
    TM = _row_tile(M)
    row = pl.BlockSpec((TM, C), lambda i: (i, 0))

    def full(shape):
        return pl.BlockSpec(shape, lambda i: (0, 0))

    return pl.pallas_call(
        _cmix_kernel,
        out_shape=jax.ShapeDtypeStruct((M, C), jnp.float32),
        grid=(M // TM,),
        in_specs=[row, row, row, full((1, C)), full((C, F4)), full((F4, C))],
        out_specs=row,
        compiler_params=_dense_params(),
    )(x2, dx2, res2, prep["ffn_x_k"], wk, wv)


# ---------------------------------------------------------------------------
# One-time parameter preprocessing (fused weights, coefficient folding, bf16 casts)
# ---------------------------------------------------------------------------

def prepare_block_params(p, args, layer_id, mm_dtype):
    C = args["n_embd"]
    H = args["dim_att"] // HEAD_SIZE
    has_v = layer_id != 0

    mats = [p["Wr"], p["Wk"], p["Wv"], p["w1"], p["a1"], p["g1"]]
    coefs = [p["x_r"], p["x_k"], p["x_v"], p["x_w"], p["x_a"], p["x_g"]]
    if has_v:
        mats.append(p["v1"])
        coefs.append(p["x_v"])
    w_top = jnp.concatenate(mats, axis=1).astype(mm_dtype)
    w_bot = jnp.concatenate([m * c[:, None] for m, c in zip(mats, coefs)],
                            axis=1).astype(mm_dtype)
    gmat, gmt = _group_matrices(C, H)

    prep = dict(
        w_top=w_top, w_bot=w_bot,
        w2=p["w2"].astype(mm_dtype), a2=p["a2"].astype(mm_dtype),
        g2=p["g2"].astype(mm_dtype),
        w0=p["w0"].reshape(1, C), a0=p["a0"].reshape(1, C),
        k_k=p["k_k"].reshape(1, C), k_a=p["k_a"].reshape(1, C),
        r_k=p["r_k"].reshape(1, C),
        gmat=gmat, gmt=gmt,
        Wo=p["Wo"].astype(mm_dtype),
        gn_w=p["gn_w"].reshape(1, C), gn_b=p["gn_b"].reshape(1, C),
        ln1_w=p["ln1_w"], ln1_b=p["ln1_b"],
        ln2_w=p["ln2_w"], ln2_b=p["ln2_b"],
        ffn_x_k=p["ffn_x_k"].reshape(1, C),
        ffn_Wk=p["ffn_Wk"].astype(mm_dtype), ffn_Wv=p["ffn_Wv"].astype(mm_dtype),
    )
    if has_v:
        prep["v2"] = p["v2"].astype(mm_dtype)
        prep["v0"] = p["v0"].reshape(1, C)
    else:
        prep["ln0_w"] = p["ln0_w"]
        prep["ln0_b"] = p["ln0_b"]

    meta = dict(
        C=C, H=H, has_v=has_v, layer0=(layer_id == 0),
        D_w=p["w1"].shape[1], D_a=p["a1"].shape[1], D_g=p["g1"].shape[1],
        D_v=(p["v1"].shape[1] if has_v else 0),
        eps_gn=1e-5 * args["head_size_divisor"] ** 2,
    )
    return prep, meta


# ---------------------------------------------------------------------------
# Block forward (glue in plain JAX: time_shift + reshapes only)
# ---------------------------------------------------------------------------

def block_forward(prep, x, v_first, *, meta):
    B, T, C = x.shape
    M = B * T
    assert T % CHUNK_LEN == 0           # reference kernel constraint

    if meta["layer0"]:
        x = pallas_layernorm(x.reshape(M, C), prep["ln0_w"], prep["ln0_b"]).reshape(B, T, C)
    x_res = x.reshape(M, C)             # residual stream (f32)

    x1 = pallas_layernorm(x_res, prep["ln1_w"], prep["ln1_b"]).reshape(B, T, C)
    dx1 = (time_shift(x1) - x1).reshape(M, C)
    vf2 = v_first.reshape(M, C) if meta["has_v"] else None

    r, w, k, v, aa, bb, g = pallas_tmix_proj(x1.reshape(M, C), dx1, vf2, prep, meta)
    if not meta["has_v"]:
        v_first = v.reshape(B, T, C)

    y = pallas_rwkv7(r, w, k, v, aa, bb, B=B, T=T, H=meta["H"])
    x_res = pallas_tmix_out(y, r, k, v, g, x_res, prep, meta)        # includes +residual

    x2 = pallas_layernorm(x_res, prep["ln2_w"], prep["ln2_b"]).reshape(B, T, C)
    dx2 = (time_shift(x2) - x2).reshape(M, C)
    x_out = pallas_cmix(x2.reshape(M, C), dx2, x_res, prep)          # includes +residual
    return x_out.reshape(B, T, C), v_first


# ---------------------------------------------------------------------------
# Pure-JAX references (for correctness checks only)
# ---------------------------------------------------------------------------

def _rwkv7_ref(r, w, k, v, a, b):
    decay = jnp.exp(-jnp.exp(w))
    BH, T, N = r.shape

    def step(S, xs):
        r_t, d_t, k_t, v_t, a_t, b_t = xs
        sa = jnp.einsum('bij,bj->bi', S, a_t)
        S = S * d_t[:, None, :] + v_t[:, :, None] * k_t[:, None, :] + sa[:, :, None] * b_t[:, None, :]
        y = jnp.einsum('bij,bj->bi', S, r_t)
        return S, y

    xs = tuple(z.transpose(1, 0, 2) for z in (r, decay, k, v, a, b))
    _, ys = lax.scan(step, jnp.zeros((BH, N, N), jnp.float32), xs)
    return ys.transpose(1, 0, 2)


def _block_ref(p, x, v_first, args, layer_id):
    B, T, C = x.shape
    H = args["dim_att"] // HEAD_SIZE
    N = HEAD_SIZE

    def ln(z, wt, bs, eps=1e-5):
        m = jnp.mean(z, -1, keepdims=True)
        vv = jnp.mean((z - m) ** 2, -1, keepdims=True)
        return (z - m) / jnp.sqrt(vv + eps) * wt + bs

    if layer_id == 0:
        x = ln(x, p["ln0_w"], p["ln0_b"])
    xi = ln(x, p["ln1_w"], p["ln1_b"])
    xx = time_shift(xi) - xi
    xr = xi + xx * p["x_r"]; xw = xi + xx * p["x_w"]; xk = xi + xx * p["x_k"]
    xv = xi + xx * p["x_v"]; xa = xi + xx * p["x_a"]; xg = xi + xx * p["x_g"]
    r = xr @ p["Wr"]; k = xk @ p["Wk"]; v = xv @ p["Wv"]
    w = -jax.nn.softplus(-(p["w0"] + jnp.tanh(xw @ p["w1"]) @ p["w2"])) - 0.5
    if layer_id == 0:
        v_first = v
    else:
        v = v + (v_first - v) * jax.nn.sigmoid(p["v0"] + (xv @ p["v1"]) @ p["v2"])
    a = jax.nn.sigmoid(p["a0"] + (xa @ p["a1"]) @ p["a2"])
    g = jax.nn.sigmoid(xg @ p["g1"]) @ p["g2"]
    kk = k * p["k_k"]
    kkh = kk.reshape(B, T, H, N)
    kk = (kkh / jnp.maximum(jnp.linalg.norm(kkh, axis=-1, keepdims=True), 1e-12)).reshape(B, T, C)
    k = k * (1.0 + (a - 1.0) * p["k_a"])

    def bh(z):
        return z.reshape(B, T, H, N).transpose(0, 2, 1, 3).reshape(B * H, T, N)

    y = _rwkv7_ref(bh(r), bh(w), bh(k), bh(v), bh(-kk), bh(kk * a))
    xo = y.reshape(B, H, T, N).transpose(0, 2, 1, 3).reshape(B, T, C)

    xo_h = xo.reshape(B, T, H, N)
    mu = jnp.mean(xo_h, -1, keepdims=True)
    var = jnp.mean((xo_h - mu) ** 2, -1, keepdims=True)
    eps_gn = 1e-5 * args["head_size_divisor"] ** 2
    xo = ((xo_h - mu) / jnp.sqrt(var + eps_gn)).reshape(B, T, C) * p["gn_w"] + p["gn_b"]
    xo = xo + (jnp.sum(r.reshape(B, T, H, N) * k.reshape(B, T, H, N) * p["r_k"],
                       -1, keepdims=True) * v.reshape(B, T, H, N)).reshape(B, T, C)
    att = (xo * g) @ p["Wo"]
    x = x + att

    x2 = ln(x, p["ln2_w"], p["ln2_b"])
    xx2 = time_shift(x2) - x2
    kx = x2 + xx2 * p["ffn_x_k"]
    ffn = (jnp.maximum(kx @ p["ffn_Wk"], 0.0) ** 2) @ p["ffn_Wv"]
    return x + ffn, v_first


# ---------------------------------------------------------------------------
# Deterministic parameter init (shapes follow the torch __init__; random values
# where torch uses random / zero init so all paths are exercised)
# ---------------------------------------------------------------------------

def init_params(key, args, layer_id):
    C = args["n_embd"]
    H = args["dim_att"] // HEAD_SIZE
    N = HEAD_SIZE
    nl = args["n_layer"]
    r01 = layer_id / (nl - 1)
    r1a0 = 1.0 - layer_id / nl
    ddd = jnp.arange(C, dtype=jnp.float32) / C

    keys = iter(jax.random.split(key, 24))

    def rnd(shape, scale):
        return jax.random.normal(next(keys), shape, jnp.float32) * scale

    D_DECAY = max(32, int(round(1.8 * C ** 0.5 / 32) * 32))
    D_AAA = max(32, int(round(1.8 * C ** 0.5 / 32) * 32))
    D_MV = max(32, int(round(1.3 * C ** 0.5 / 32) * 32))
    D_GATE = max(32, int(round(0.6 * C ** 0.8 / 32) * 32))

    n = jnp.arange(C, dtype=jnp.float32)
    decay_speed = -7.0 + 5.0 * (n / (C - 1)) ** (0.85 + 1.0 * r01 ** 0.5)

    p = dict(
        ln1_w=jnp.ones(C), ln1_b=jnp.zeros(C),
        ln2_w=jnp.ones(C), ln2_b=jnp.zeros(C),
        x_r=1.0 - ddd ** (0.2 * r1a0),
        x_w=1.0 - ddd ** (0.9 * r1a0),
        x_k=1.0 - (ddd ** (0.9 * r1a0) + 0.4 * r01),
        x_v=1.0 - (ddd ** (0.4 * r1a0) + 0.6 * r01),
        x_a=1.0 - ddd ** (0.9 * r1a0),
        x_g=1.0 - ddd ** (0.2 * r1a0),
        w0=decay_speed + 0.5,
        w1=rnd((C, D_DECAY), 0.02), w2=rnd((D_DECAY, C), 0.1),
        a0=jnp.zeros(C), a1=rnd((C, D_AAA), 0.02), a2=rnd((D_AAA, C), 0.1),
        g1=rnd((C, D_GATE), 0.02), g2=rnd((D_GATE, C), 0.1),
        k_k=jnp.full((C,), 0.85, jnp.float32), k_a=jnp.ones(C),
        r_k=rnd((H, N), 0.05),
        # linear projections stored as (in, out) so y = x @ W
        Wr=rnd((C, C), C ** -0.5), Wk=rnd((C, C), C ** -0.5),
        Wv=rnd((C, C), C ** -0.5), Wo=rnd((C, C), C ** -0.5),
        gn_w=jnp.ones(C), gn_b=jnp.zeros(C),
        ffn_x_k=1.0 - ddd ** (r1a0 ** 4),
        ffn_Wk=rnd((C, 4 * C), C ** -0.5),
        ffn_Wv=rnd((4 * C, C), (4 * C) ** -0.5),
    )
    if layer_id == 0:
        p["ln0_w"] = jnp.ones(C)
        p["ln0_b"] = jnp.zeros(C)
    else:
        p["v0"] = jnp.ones(C)
        p["v1"] = rnd((C, D_MV), 0.02)
        p["v2"] = rnd((D_MV, C), 0.1)
    return p


# ---------------------------------------------------------------------------
# demo / checks
# ---------------------------------------------------------------------------

if __name__ == "__main__":
    args = dict(n_layer=4, n_embd=128, dim_att=128, head_size_divisor=8, dropout=0.0)
    B, T = 2, 48                         # T multiple of CHUNK_LEN=24
    C = args["n_embd"]
    H = args["dim_att"] // HEAD_SIZE
    N = HEAD_SIZE

    key = jax.random.PRNGKey(0)
    kp0, kp1, kx, kr = jax.random.split(key, 4)
    params0 = init_params(kp0, args, 0)
    params1 = init_params(kp1, args, 1)
    x = jax.random.normal(kx, (B, T, C), jnp.float32)
    v_first0 = jnp.zeros((B, T, C), jnp.float32)

    # ---- check 1: chunked Pallas recurrence (f32 operands) vs sequential reference ----
    ks = jax.random.split(kr, 6)
    rnd_b = lambda k: jax.random.normal(k, (B, T, H, N), jnp.float32)
    r_b = rnd_b(ks[0])
    w_b = -jax.nn.softplus(rnd_b(ks[1])) - 0.5
    k_b = rnd_b(ks[2])
    v_b = rnd_b(ks[3])
    kk_b = rnd_b(ks[4])
    kk_b = kk_b / jnp.maximum(jnp.linalg.norm(kk_b, axis=-1, keepdims=True), 1e-12)
    a_g = jax.nn.sigmoid(rnd_b(ks[5]))

    flat = lambda z: z.reshape(B * T, H * N)
    tobh = lambda z: z.transpose(0, 2, 1, 3).reshape(B * H, T, N)

    rec = jax.jit(functools.partial(pallas_rwkv7, B=B, T=T, H=H))
    y_pal = rec(flat(r_b), flat(w_b), flat(k_b), flat(v_b), flat(-kk_b), flat(kk_b * a_g))
    with jax.default_matmul_precision("highest"):
        y_ref = _rwkv7_ref(tobh(r_b), tobh(w_b), tobh(k_b), tobh(v_b),
                           tobh(-kk_b), tobh(kk_b * a_g))
    y_ref = y_ref.reshape(B, H, T, N).transpose(0, 2, 1, 3).reshape(B * T, H * N)
    rel = float(jnp.max(jnp.abs(y_pal - y_ref)) / (jnp.max(jnp.abs(y_ref)) + 1e-6))
    assert rel < 2e-2, f"recurrence mismatch: rel={rel}"

    # ---- check 2: full Block (f32 operands) vs pure-JAX reference ----
    prep0f, meta0 = prepare_block_params(params0, args, 0, jnp.float32)
    prep1f, meta1 = prepare_block_params(params1, args, 1, jnp.float32)
    fwd0f = jax.jit(functools.partial(block_forward, meta=meta0))
    fwd1f = jax.jit(functools.partial(block_forward, meta=meta1))
    y0, vf = fwd0f(prep0f, x, v_first0)
    y1, _ = fwd1f(prep1f, y0, vf)
    with jax.default_matmul_precision("highest"):
        y0r, vfr = _block_ref(params0, x, v_first0, args, 0)
        y1r, _ = _block_ref(params1, y0r, vfr, args, 1)
    for got, want in ((y0, y0r), (vf, vfr), (y1, y1r)):
        rel = float(jnp.max(jnp.abs(got - want)) / (jnp.max(jnp.abs(want)) + 1e-6))
        assert rel < 2e-2, f"block mismatch: rel={rel}"

    # ---- production path: bf16 MXU operands & bf16 handoffs, f32 state/accumulation ----
    prep0, meta0b = prepare_block_params(params0, args, 0, jnp.bfloat16)
    prep1, meta1b = prepare_block_params(params1, args, 1, jnp.bfloat16)
    fwd0 = jax.jit(functools.partial(block_forward, meta=meta0b))
    fwd1 = jax.jit(functools.partial(block_forward, meta=meta1b))
    z0, vfb = fwd0(prep0, x, v_first0)
    z1, vfb1 = fwd1(prep1, z0, vfb)
    jax.block_until_ready((z1, vfb1))

    assert z1.shape == (B, T, C) and vfb1.shape == (B, T, C)
    assert bool(jnp.all(jnp.isfinite(z1.astype(jnp.float32))))
    assert bool(jnp.all(jnp.isfinite(vfb1.astype(jnp.float32))))
    print("KERNEL_OK")
</pallas_src>

<mosaic_0001>
module attributes {stable_mosaic.version = 11 : i64} {
  func.func @_rwkv7_kernel(%arg0: i32, %arg1: i32, %arg2: memref<1x1x48x128xf32, #tpu.memory_space<vmem>>, %arg3: memref<1x1x48x128xf32, #tpu.memory_space<vmem>>, %arg4: memref<1x1x48x128xf32, #tpu.memory_space<vmem>>, %arg5: memref<1x1x48x128xf32, #tpu.memory_space<vmem>>, %arg6: memref<1x1x48x128xf32, #tpu.memory_space<vmem>>, %arg7: memref<1x1x48x128xf32, #tpu.memory_space<vmem>>, %arg8: memref<1x1x48x128xf32, #tpu.memory_space<vmem>>) attributes {dimension_semantics = [#tpu.dimension_semantics<parallel>, #tpu.dimension_semantics<parallel>], iteration_bounds = array<i64: 2, 1>, scalar_prefetch = 0 : i64, scratch_operands = 0 : i64, tpu.core_type = #tpu.core_type<tc>, window_params = [{transform_indices = @transform_0, window_bounds = array<i64: 1, 1, 48, 128>}, {transform_indices = @transform_1, window_bounds = array<i64: 1, 1, 48, 128>}, {transform_indices = @transform_2, window_bounds = array<i64: 1, 1, 48, 128>}, {transform_indices = @transform_3, window_bounds = array<i64: 1, 1, 48, 128>}, {transform_indices = @transform_4, window_bounds = array<i64: 1, 1, 48, 128>}, {transform_indices = @transform_5, window_bounds = array<i64: 1, 1, 48, 128>}, {transform_indices = @transform_6, window_bounds = array<i64: 1, 1, 48, 128>}]} {
    %0 = tpu.iota {dimensions = array<i32: 0>} : vector<48x48xi32>
    %1 = tpu.iota {dimensions = array<i32: 1>} : vector<48x48xi32>
    %2 = arith.cmpi sge, %0, %1 : vector<48x48xi32>
    %3 = arith.extui %2 : vector<48x48xi1> to vector<48x48xi32>
    %4 = arith.sitofp %3 : vector<48x48xi32> to vector<48x48xf32>
    %5 = arith.cmpi sgt, %0, %1 : vector<48x48xi32>
    %6 = arith.extui %5 : vector<48x48xi1> to vector<48x48xi32>
    %7 = arith.sitofp %6 : vector<48x48xi32> to vector<48x48xf32>
    %8 = arith.cmpi eq, %0, %1 : vector<48x48xi32>
    %9 = arith.extui %8 : vector<48x48xi1> to vector<48x48xi32>
    %10 = arith.sitofp %9 : vector<48x48xi32> to vector<48x48xf32>
    %cst = arith.constant 0.000000e+00 : f32
    %11 = vector.broadcast %cst : f32 to vector<64x64xf32>
    %cst_0 = arith.constant 0.000000e+00 : f32
    %12 = vector.broadcast %cst_0 : f32 to vector<64x64xf32>
    %c0_i32 = arith.constant 0 : i32
    %c0 = arith.constant 0 : index
    %13 = arith.index_cast %c0_i32 : i32 to index
    %c0_1 = arith.constant 0 : index
    %c0_2 = arith.constant 0 : index
    %14 = vector.load %arg2[%c0, %13, %c0_1, %c0_2] : memref<1x1x48x128xf32, #tpu.memory_space<vmem>>, vector<1x1x48x128xf32>
    %15 = vector.shape_cast %14 : vector<1x1x48x128xf32> to vector<48x128xf32>
    %c0_3 = arith.constant 0 : index
    %16 = arith.index_cast %c0_i32 : i32 to index
    %c0_4 = arith.constant 0 : index
    %c0_5 = arith.constant 0 : index
    %17 = vector.load %arg3[%c0_3, %16, %c0_4, %c0_5] : memref<1x1x48x128xf32, #tpu.memory_space<vmem>>, vector<1x1x48x128xf32>
    %18 = vector.shape_cast %17 : vector<1x1x48x128xf32> to vector<48x128xf32>
    %c0_6 = arith.constant 0 : index
    %19 = arith.index_cast %c0_i32 : i32 to index
    %c0_7 = arith.constant 0 : index
    %c0_8 = arith.constant 0 : index
    %20 = vector.load %arg4[%c0_6, %19, %c0_7, %c0_8] : memref<1x1x48x128xf32, #tpu.memory_space<vmem>>, vector<1x1x48x128xf32>
    %21 = vector.shape_cast %20 : vector<1x1x48x128xf32> to vector<48x128xf32>
    %c0_9 = arith.constant 0 : index
    %22 = arith.index_cast %c0_i32 : i32 to index
    %c0_10 = arith.constant 0 : index
    %c0_11 = arith.constant 0 : index
    %23 = vector.load %arg5[%c0_9, %22, %c0_10, %c0_11] : memref<1x1x48x128xf32, #tpu.memory_space<vmem>>, vector<1x1x48x128xf32>
    %24 = vector.shape_cast %23 : vector<1x1x48x128xf32> to vector<48x128xf32>
    %c0_12 = arith.constant 0 : index
    %25 = arith.index_cast %c0_i32 : i32 to index
    %c0_13 = arith.constant 0 : index
    %c0_14 = arith.constant 0 : index
    %26 = vector.load %arg6[%c0_12, %25, %c0_13, %c0_14] : memref<1x1x48x128xf32, #tpu.memory_space<vmem>>, vector<1x1x48x128xf32>
    %27 = vector.shape_cast %26 : vector<1x1x48x128xf32> to vector<48x128xf32>
    %c0_15 = arith.constant 0 : index
    %28 = arith.index_cast %c0_i32 : i32 to index
    %c0_16 = arith.constant 0 : index
    %c0_17 = arith.constant 0 : index
    %29 = vector.load %arg7[%c0_15, %28, %c0_16, %c0_17] : memref<1x1x48x128xf32, #tpu.memory_space<vmem>>, vector<1x1x48x128xf32>
    %30 = vector.shape_cast %29 : vector<1x1x48x128xf32> to vector<48x128xf32>
    %31 = vector.extract_strided_slice %15 {offsets = [0, 0], sizes = [48, 64], strides = [1, 1]} : vector<48x128xf32> to vector<48x64xf32>
    %32 = vector.extract_strided_slice %18 {offsets = [0, 0], sizes = [48, 64], strides = [1, 1]} : vector<48x128xf32> to vector<48x64xf32>
    %33 = vector.extract_strided_slice %21 {offsets = [0, 0], sizes = [48, 64], strides = [1, 1]} : vector<48x128xf32> to vector<48x64xf32>
    %34 = vector.extract_strided_slice %24 {offsets = [0, 0], sizes = [48, 64], strides = [1, 1]} : vector<48x128xf32> to vector<48x64xf32>
    %35 = vector.extract_strided_slice %27 {offsets = [0, 0], sizes = [48, 64], strides = [1, 1]} : vector<48x128xf32> to vector<48x64xf32>
    %36 = vector.extract_strided_slice %30 {offsets = [0, 0], sizes = [48, 64], strides = [1, 1]} : vector<48x128xf32> to vector<48x64xf32>
    %37 = math.exp %32 : vector<48x64xf32>
    %cst_18 = arith.constant 0.000000e+00 : f32
    %38 = vector.broadcast %cst_18 : f32 to vector<48x64xf32>
    %39 = arith.subf %38, %37 : vector<48x64xf32>
    %cst_19 = arith.constant dense<0.000000e+00> : vector<48x64xf32>
    %40 = tpu.matmul %4, %39, %cst_19 {dimension_numbers = #tpu.dot_dimension_numbers<[1], [0], [0], [1], [0, 0, 1, 1], [], []>} : vector<48x48xf32>, vector<48x64xf32>, vector<48x64xf32> -> vector<48x64xf32>
    %41 = math.exp %40 : vector<48x64xf32>
    %42 = arith.subf %40, %39 : vector<48x64xf32>
    %43 = math.exp %42 : vector<48x64xf32>
    %cst_20 = arith.constant 0.000000e+00 : f32
    %44 = vector.broadcast %cst_20 : f32 to vector<48x64xf32>
    %45 = arith.subf %44, %40 : vector<48x64xf32>
    %46 = math.exp %45 : vector<48x64xf32>
    %cst_21 = arith.constant dense<0.000000e+00> : vector<64xf32>
    %47 = vector.multi_reduction <add>, %39, %cst_21 [0] : vector<48x64xf32> to vector<64xf32>
    %48 = vector.shape_cast %47 : vector<64xf32> to vector<1x64xf32>
    %49 = math.exp %48 : vector<1x64xf32>
    %50 = arith.mulf %31, %41 : vector<48x64xf32>
    %51 = arith.mulf %35, %43 : vector<48x64xf32>
    %52 = arith.mulf %33, %46 : vector<48x64xf32>
    %53 = arith.mulf %36, %46 : vector<48x64xf32>
    %cst_22 = arith.constant dense<0.000000e+00> : vector<48x48xf32>
    %54 = tpu.matmul %51, %53, %cst_22 {dimension_numbers = #tpu.dot_dimension_numbers<[1], [1], [0], [0], [0, 0, 1, 0], [], []>} : vector<48x64xf32>, vector<48x64xf32>, vector<48x48xf32> -> vector<48x48xf32>
    %55 = arith.mulf %54, %7 : vector<48x48xf32>
    %cst_23 = arith.constant dense<0.000000e+00> : vector<48x48xf32>
    %56 = tpu.matmul %51, %52, %cst_23 {dimension_numbers = #tpu.dot_dimension_numbers<[1], [1], [0], [0], [0, 0, 1, 0], [], []>} : vector<48x64xf32>, vector<48x64xf32>, vector<48x48xf32> -> vector<48x48xf32>
    %57 = arith.mulf %56, %7 : vector<48x48xf32>
    %58 = arith.addf %10, %55 : vector<48x48xf32>
    %cst_24 = arith.constant dense<0.000000e+00> : vector<48x48xf32>
    %59 = tpu.matmul %55, %55, %cst_24 {dimension_numbers = #tpu.dot_dimension_numbers<[1], [0], [0], [1], [0, 0, 1, 1], [], []>} : vector<48x48xf32>, vector<48x48xf32>, vector<48x48xf32> -> vector<48x48xf32>
    %cst_25 = arith.constant dense<0.000000e+00> : vector<48x48xf32>
    %60 = tpu.matmul %58, %59, %cst_25 {dimension_numbers = #tpu.dot_dimension_numbers<[1], [0], [0], [1], [0, 0, 1, 1], [], []>} : vector<48x48xf32>, vector<48x48xf32>, vector<48x48xf32> -> vector<48x48xf32>
    %61 = arith.addf %58, %60 : vector<48x48xf32>
    %cst_26 = arith.constant dense<0.000000e+00> : vector<48x48xf32>
    %62 = tpu.matmul %59, %59, %cst_26 {dimension_numbers = #tpu.dot_dimension_numbers<[1], [0], [0], [1], [0, 0, 1, 1], [], []>} : vector<48x48xf32>, vector<48x48xf32>, vector<48x48xf32> -> vector<48x48xf32>
    %cst_27 = arith.constant dense<0.000000e+00> : vector<48x48xf32>
    %63 = tpu.matmul %61, %62, %cst_27 {dimension_numbers = #tpu.dot_dimension_numbers<[1], [0], [0], [1], [0, 0, 1, 1], [], []>} : vector<48x48xf32>, vector<48x48xf32>, vector<48x48xf32> -> vector<48x48xf32>
    %64 = arith.addf %61, %63 : vector<48x48xf32>
    %cst_28 = arith.constant dense<0.000000e+00> : vector<48x48xf32>
    %65 = tpu.matmul %62, %62, %cst_28 {dimension_numbers = #tpu.dot_dimension_numbers<[1], [0], [0], [1], [0, 0, 1, 1], [], []>} : vector<48x48xf32>, vector<48x48xf32>, vector<48x48xf32> -> vector<48x48xf32>
    %cst_29 = arith.constant dense<0.000000e+00> : vector<48x48xf32>
    %66 = tpu.matmul %64, %65, %cst_29 {dimension_numbers = #tpu.dot_dimension_numbers<[1], [0], [0], [1], [0, 0, 1, 1], [], []>} : vector<48x48xf32>, vector<48x48xf32>, vector<48x48xf32> -> vector<48x48xf32>
    %67 = arith.addf %64, %66 : vector<48x48xf32>
    %cst_30 = arith.constant dense<0.000000e+00> : vector<48x48xf32>
    %68 = tpu.matmul %65, %65, %cst_30 {dimension_numbers = #tpu.dot_dimension_numbers<[1], [0], [0], [1], [0, 0, 1, 1], [], []>} : vector<48x48xf32>, vector<48x48xf32>, vector<48x48xf32> -> vector<48x48xf32>
    %cst_31 = arith.constant dense<0.000000e+00> : vector<48x48xf32>
    %69 = tpu.matmul %67, %68, %cst_31 {dimension_numbers = #tpu.dot_dimension_numbers<[1], [0], [0], [1], [0, 0, 1, 1], [], []>} : vector<48x48xf32>, vector<48x48xf32>, vector<48x48xf32> -> vector<48x48xf32>
    %70 = arith.addf %67, %69 : vector<48x48xf32>
    %cst_32 = arith.constant dense<0.000000e+00> : vector<48x48xf32>
    %71 = tpu.matmul %68, %68, %cst_32 {dimension_numbers = #tpu.dot_dimension_numbers<[1], [0], [0], [1], [0, 0, 1, 1], [], []>} : vector<48x48xf32>, vector<48x48xf32>, vector<48x48xf32> -> vector<48x48xf32>
    %cst_33 = arith.constant dense<0.000000e+00> : vector<48x48xf32>
    %72 = tpu.matmul %70, %71, %cst_33 {dimension_numbers = #tpu.dot_dimension_numbers<[1], [0], [0], [1], [0, 0, 1, 1], [], []>} : vector<48x48xf32>, vector<48x48xf32>, vector<48x48xf32> -> vector<48x48xf32>
    %73 = arith.addf %70, %72 : vector<48x48xf32>
    %cst_34 = arith.constant dense<0.000000e+00> : vector<48x64xf32>
    %74 = tpu.matmul %51, %11, %cst_34 {dimension_numbers = #tpu.dot_dimension_numbers<[1], [1], [0], [0], [0, 0, 1, 0], [], []>} : vector<48x64xf32>, vector<64x64xf32>, vector<48x64xf32> -> vector<48x64xf32>
    %cst_35 = arith.constant dense<0.000000e+00> : vector<48x64xf32>
    %75 = tpu.matmul %57, %34, %cst_35 {dimension_numbers = #tpu.dot_dimension_numbers<[1], [0], [0], [1], [0, 0, 1, 1], [], []>} : vector<48x48xf32>, vector<48x64xf32>, vector<48x64xf32> -> vector<48x64xf32>
    %76 = arith.addf %74, %75 : vector<48x64xf32>
    %cst_36 = arith.constant dense<0.000000e+00> : vector<48x64xf32>
    %77 = tpu.matmul %73, %76, %cst_36 {dimension_numbers = #tpu.dot_dimension_numbers<[1], [0], [0], [1], [0, 0, 1, 1], [], []>} : vector<48x48xf32>, vector<48x64xf32>, vector<48x64xf32> -> vector<48x64xf32>
    %cst_37 = arith.constant dense<0.000000e+00> : vector<48x64xf32>
    %78 = tpu.matmul %50, %11, %cst_37 {dimension_numbers = #tpu.dot_dimension_numbers<[1], [1], [0], [0], [0, 0, 1, 0], [], []>} : vector<48x64xf32>, vector<64x64xf32>, vector<48x64xf32> -> vector<48x64xf32>
    %cst_38 = arith.constant dense<0.000000e+00> : vector<48x48xf32>
    %79 = tpu.matmul %50, %52, %cst_38 {dimension_numbers = #tpu.dot_dimension_numbers<[1], [1], [0], [0], [0, 0, 1, 0], [], []>} : vector<48x64xf32>, vector<48x64xf32>, vector<48x48xf32> -> vector<48x48xf32>
    %80 = arith.mulf %79, %4 : vector<48x48xf32>
    %cst_39 = arith.constant dense<0.000000e+00> : vector<48x64xf32>
    %81 = tpu.matmul %80, %34, %cst_39 {dimension_numbers = #tpu.dot_dimension_numbers<[1], [0], [0], [1], [0, 0, 1, 1], [], []>} : vector<48x48xf32>, vector<48x64xf32>, vector<48x64xf32> -> vector<48x64xf32>
    %82 = arith.addf %78, %81 : vector<48x64xf32>
    %cst_40 = arith.constant dense<0.000000e+00> : vector<48x48xf32>
    %83 = tpu.matmul %50, %53, %cst_40 {dimension_numbers = #tpu.dot_dimension_numbers<[1], [1], [0], [0], [0, 0, 1, 0], [], []>} : vector<48x64xf32>, vector<48x64xf32>, vector<48x48xf32> -> vector<48x48xf32>
    %84 = arith.mulf %83, %4 : vector<48x48xf32>
    %cst_41 = arith.constant dense<0.000000e+00> : vector<48x64xf32>
    %85 = tpu.matmul %84, %77, %cst_41 {dimension_numbers = #tpu.dot_dimension_numbers<[1], [0], [0], [1], [0, 0, 1, 1], [], []>} : vector<48x48xf32>, vector<48x64xf32>, vector<48x64xf32> -> vector<48x64xf32>
    %86 = arith.addf %82, %85 : vector<48x64xf32>
    %87 = vector.broadcast %49 : vector<1x64xf32> to vector<64x64xf32>
    %88 = arith.mulf %11, %87 : vector<64x64xf32>
    %89 = vector.broadcast %49 : vector<1x64xf32> to vector<48x64xf32>
    %90 = arith.mulf %52, %89 : vector<48x64xf32>
    %cst_42 = arith.constant dense<0.000000e+00> : vector<64x64xf32>
    %91 = tpu.matmul %34, %90, %cst_42 {dimension_numbers = #tpu.dot_dimension_numbers<[0], [0], [1], [1], [0, 1, 1, 1], [], []>} : vector<48x64xf32>, vector<48x64xf32>, vector<64x64xf32> -> vector<64x64xf32>
    %92 = arith.addf %88, %91 : vector<64x64xf32>
    %93 = vector.broadcast %49 : vector<1x64xf32> to vector<48x64xf32>
    %94 = arith.mulf %53, %93 : vector<48x64xf32>
    %cst_43 = arith.constant dense<0.000000e+00> : vector<64x64xf32>
    %95 = tpu.matmul %77, %94, %cst_43 {dimension_numbers = #tpu.dot_dimension_numbers<[0], [0], [1], [1], [0, 1, 1, 1], [], []>} : vector<48x64xf32>, vector<48x64xf32>, vector<64x64xf32> -> vector<64x64xf32>
    %96 = arith.addf %92, %95 : vector<64x64xf32>
    %97 = vector.extract_strided_slice %15 {offsets = [0, 64], sizes = [48, 64], strides = [1, 1]} : vector<48x128xf32> to vector<48x64xf32>
    %98 = vector.extract_strided_slice %18 {offsets = [0, 64], sizes = [48, 64], strides = [1, 1]} : vector<48x128xf32> to vector<48x64xf32>
    %99 = vector.extract_strided_slice %21 {offsets = [0, 64], sizes = [48, 64], strides = [1, 1]} : vector<48x128xf32> to vector<48x64xf32>
    %100 = vector.extract_strided_slice %24 {offsets = [0, 64], sizes = [48, 64], strides = [1, 1]} : vector<48x128xf32> to vector<48x64xf32>
    %101 = vector.extract_strided_slice %27 {offsets = [0, 64], sizes = [48, 64], strides = [1, 1]} : vector<48x128xf32> to vector<48x64xf32>
    %102 = vector.extract_strided_slice %30 {offsets = [0, 64], sizes = [48, 64], strides = [1, 1]} : vector<48x128xf32> to vector<48x64xf32>
    %103 = math.exp %98 : vector<48x64xf32>
    %cst_44 = arith.constant 0.000000e+00 : f32
    %104 = vector.broadcast %cst_44 : f32 to vector<48x64xf32>
    %105 = arith.subf %104, %103 : vector<48x64xf32>
    %cst_45 = arith.constant dense<0.000000e+00> : vector<48x64xf32>
    %106 = tpu.matmul %4, %105, %cst_45 {dimension_numbers = #tpu.dot_dimension_numbers<[1], [0], [0], [1], [0, 0, 1, 1], [], []>} : vector<48x48xf32>, vector<48x64xf32>, vector<48x64xf32> -> vector<48x64xf32>
    %107 = math.exp %106 : vector<48x64xf32>
    %108 = arith.subf %106, %105 : vector<48x64xf32>
    %109 = math.exp %108 : vector<48x64xf32>
    %cst_46 = arith.constant 0.000000e+00 : f32
    %110 = vector.broadcast %cst_46 : f32 to vector<48x64xf32>
    %111 = arith.subf %110, %106 : vector<48x64xf32>
    %112 = math.exp %111 : vector<48x64xf32>
    %cst_47 = arith.constant dense<0.000000e+00> : vector<64xf32>
    %113 = vector.multi_reduction <add>, %105, %cst_47 [0] : vector<48x64xf32> to vector<64xf32>
    %114 = vector.shape_cast %113 : vector<64xf32> to vector<1x64xf32>
    %115 = math.exp %114 : vector<1x64xf32>
    %116 = arith.mulf %97, %107 : vector<48x64xf32>
    %117 = arith.mulf %101, %109 : vector<48x64xf32>
    %118 = arith.mulf %99, %112 : vector<48x64xf32>
    %119 = arith.mulf %102, %112 : vector<48x64xf32>
    %cst_48 = arith.constant dense<0.000000e+00> : vector<48x48xf32>
    %120 = tpu.matmul %117, %119, %cst_48 {dimension_numbers = #tpu.dot_dimension_numbers<[1], [1], [0], [0], [0, 0, 1, 0], [], []>} : vector<48x64xf32>, vector<48x64xf32>, vector<48x48xf32> -> vector<48x48xf32>
    %121 = arith.mulf %120, %7 : vector<48x48xf32>
    %cst_49 = arith.constant dense<0.000000e+00> : vector<48x48xf32>
    %122 = tpu.matmul %117, %118, %cst_49 {dimension_numbers = #tpu.dot_dimension_numbers<[1], [1], [0], [0], [0, 0, 1, 0], [], []>} : vector<48x64xf32>, vector<48x64xf32>, vector<48x48xf32> -> vector<48x48xf32>
    %123 = arith.mulf %122, %7 : vector<48x48xf32>
    %124 = arith.addf %10, %121 : vector<48x48xf32>
    %cst_50 = arith.constant dense<0.000000e+00> : vector<48x48xf32>
    %125 = tpu.matmul %121, %121, %cst_50 {dimension_numbers = #tpu.dot_dimension_numbers<[1], [0], [0], [1], [0, 0, 1, 1], [], []>} : vector<48x48xf32>, vector<48x48xf32>, vector<48x48xf32> -> vector<48x48xf32>
    %cst_51 = arith.constant dense<0.000000e+00> : vector<48x48xf32>
    %126 = tpu.matmul %124, %125, %cst_51 {dimension_numbers = #tpu.dot_dimension_numbers<[1], [0], [0], [1], [0, 0, 1, 1], [], []>} : vector<48x48xf32>, vector<48x48xf32>, vector<48x48xf32> -> vector<48x48xf32>
    %127 = arith.addf %124, %126 : vector<48x48xf32>
    %cst_52 = arith.constant dense<0.000000e+00> : vector<48x48xf32>
    %128 = tpu.matmul %125, %125, %cst_52 {dimension_numbers = #tpu.dot_dimension_numbers<[1], [0], [0], [1], [0, 0, 1, 1], [], []>} : vector<48x48xf32>, vector<48x48xf32>, vector<48x48xf32> -> vector<48x48xf32>
    %cst_53 = arith.constant dense<0.000000e+00> : vector<48x48xf32>
    %129 = tpu.matmul %127, %128, %cst_53 {dimension_numbers = #tpu.dot_dimension_numbers<[1], [0], [0], [1], [0, 0, 1, 1], [], []>} : vector<48x48xf32>, vector<48x48xf32>, vector<48x48xf32> -> vector<48x48xf32>
    %130 = arith.addf %127, %129 : vector<48x48xf32>
    %cst_54 = arith.constant dense<0.000000e+00> : vector<48x48xf32>
    %131 = tpu.matmul %128, %128, %cst_54 {dimension_numbers = #tpu.dot_dimension_numbers<[1], [0], [0], [1], [0, 0, 1, 1], [], []>} : vector<48x48xf32>, vector<48x48xf32>, vector<48x48xf32> -> vector<48x48xf32>
    %cst_55 = arith.constant dense<0.000000e+00> : vector<48x48xf32>
    %132 = tpu.matmul %130, %131, %cst_55 {dimension_numbers = #tpu.dot_dimension_numbers<[1], [0], [0], [1], [0, 0, 1, 1], [], []>} : vector<48x48xf32>, vector<48x48xf32>, vector<48x48xf32> -> vector<48x48xf32>
    %133 = arith.addf %130, %132 : vector<48x48xf32>
    %cst_56 = arith.constant dense<0.000000e+00> : vector<48x48xf32>
    %134 = tpu.matmul %131, %131, %cst_56 {dimension_numbers = #tpu.dot_dimension_numbers<[1], [0], [0], [1], [0, 0, 1, 1], [], []>} : vector<48x48xf32>, vector<48x48xf32>, vector<48x48xf32> -> vector<48x48xf32>
    %cst_57 = arith.constant dense<0.000000e+00> : vector<48x48xf32>
    %135 = tpu.matmul %133, %134, %cst_57 {dimension_numbers = #tpu.dot_dimension_numbers<[1], [0], [0], [1], [0, 0, 1, 1], [], []>} : vector<48x48xf32>, vector<48x48xf32>, vector<48x48xf32> -> vector<48x48xf32>
    %136 = arith.addf %133, %135 : vector<48x48xf32>
    %cst_58 = arith.constant dense<0.000000e+00> : vector<48x48xf32>
    %137 = tpu.matmul %134, %134, %cst_58 {dimension_numbers = #tpu.dot_dimension_numbers<[1], [0], [0], [1], [0, 0, 1, 1], [], []>} : vector<48x48xf32>, vector<48x48xf32>, vector<48x48xf32> -> vector<48x48xf32>
    %cst_59 = arith.constant dense<0.000000e+00> : vector<48x48xf32>
    %138 = tpu.matmul %136, %137, %cst_59 {dimension_numbers = #tpu.dot_dimension_numbers<[1], [0], [0], [1], [0, 0, 1, 1], [], []>} : vector<48x48xf32>, vector<48x48xf32>, vector<48x48xf32> -> vector<48x48xf32>
    %139 = arith.addf %136, %138 : vector<48x48xf32>
    %cst_60 = arith.constant dense<0.000000e+00> : vector<48x64xf32>
    %140 = tpu.matmul %117, %12, %cst_60 {dimension_numbers = #tpu.dot_dimension_numbers<[1], [1], [0], [0], [0, 0, 1, 0], [], []>} : vector<48x64xf32>, vector<64x64xf32>, vector<48x64xf32> -> vector<48x64xf32>
    %cst_61 = arith.constant dense<0.000000e+00> : vector<48x64xf32>
    %141 = tpu.matmul %123, %100, %cst_61 {dimension_numbers = #tpu.dot_dimension_numbers<[1], [0], [0], [1], [0, 0, 1, 1], [], []>} : vector<48x48xf32>, vector<48x64xf32>, vector<48x64xf32> -> vector<48x64xf32>
    %142 = arith.addf %140, %141 : vector<48x64xf32>
    %cst_62 = arith.constant dense<0.000000e+00> : vector<48x64xf32>
    %143 = tpu.matmul %139, %142, %cst_62 {dimension_numbers = #tpu.dot_dimension_numbers<[1], [0], [0], [1], [0, 0, 1, 1], [], []>} : vector<48x48xf32>, vector<48x64xf32>, vector<48x64xf32> -> vector<48x64xf32>
    %cst_63 = arith.constant dense<0.000000e+00> : vector<48x64xf32>
    %144 = tpu.matmul %116, %12, %cst_63 {dimension_numbers = #tpu.dot_dimension_numbers<[1], [1], [0], [0], [0, 0, 1, 0], [], []>} : vector<48x64xf32>, vector<64x64xf32>, vector<48x64xf32> -> vector<48x64xf32>
    %cst_64 = arith.constant dense<0.000000e+00> : vector<48x48xf32>
    %145 = tpu.matmul %116, %118, %cst_64 {dimension_numbers = #tpu.dot_dimension_numbers<[1], [1], [0], [0], [0, 0, 1, 0], [], []>} : vector<48x64xf32>, vector<48x64xf32>, vector<48x48xf32> -> vector<48x48xf32>
    %146 = arith.mulf %145, %4 : vector<48x48xf32>
    %cst_65 = arith.constant dense<0.000000e+00> : vector<48x64xf32>
    %147 = tpu.matmul %146, %100, %cst_65 {dimension_numbers = #tpu.dot_dimension_numbers<[1], [0], [0], [1], [0, 0, 1, 1], [], []>} : vector<48x48xf32>, vector<48x64xf32>, vector<48x64xf32> -> vector<48x64xf32>
    %148 = arith.addf %144, %147 : vector<48x64xf32>
    %cst_66 = arith.constant dense<0.000000e+00> : vector<48x48xf32>
    %149 = tpu.matmul %116, %119, %cst_66 {dimension_numbers = #tpu.dot_dimension_numbers<[1], [1], [0], [0], [0, 0, 1, 0], [], []>} : vector<48x64xf32>, vector<48x64xf32>, vector<48x48xf32> -> vector<48x48xf32>
    %150 = arith.mulf %149, %4 : vector<48x48xf32>
    %cst_67 = arith.constant dense<0.000000e+00> : vector<48x64xf32>
    %151 = tpu.matmul %150, %143, %cst_67 {dimension_numbers = #tpu.dot_dimension_numbers<[1], [0], [0], [1], [0, 0, 1, 1], [], []>} : vector<48x48xf32>, vector<48x64xf32>, vector<48x64xf32> -> vector<48x64xf32>
    %152 = arith.addf %148, %151 : vector<48x64xf32>
    %153 = vector.broadcast %115 : vector<1x64xf32> to vector<64x64xf32>
    %154 = arith.mulf %12, %153 : vector<64x64xf32>
    %155 = vector.broadcast %115 : vector<1x64xf32> to vector<48x64xf32>
    %156 = arith.mulf %118, %155 : vector<48x64xf32>
    %cst_68 = arith.constant dense<0.000000e+00> : vector<64x64xf32>
    %157 = tpu.matmul %100, %156, %cst_68 {dimension_numbers = #tpu.dot_dimension_numbers<[0], [0], [1], [1], [0, 1, 1, 1], [], []>} : vector<48x64xf32>, vector<48x64xf32>, vector<64x64xf32> -> vector<64x64xf32>
    %158 = arith.addf %154, %157 : vector<64x64xf32>
    %159 = vector.broadcast %115 : vector<1x64xf32> to vector<48x64xf32>
    %160 = arith.mulf %119, %159 : vector<48x64xf32>
    %cst_69 = arith.constant dense<0.000000e+00> : vector<64x64xf32>
    %161 = tpu.matmul %143, %160, %cst_69 {dimension_numbers = #tpu.dot_dimension_numbers<[0], [0], [1], [1], [0, 1, 1, 1], [], []>} : vector<48x64xf32>, vector<48x64xf32>, vector<64x64xf32> -> vector<64x64xf32>
    %162 = arith.addf %158, %161 : vector<64x64xf32>
    %163 = tpu.concatenate %86, %152 in 1 : vector<48x64xf32>, vector<48x64xf32> -> vector<48x128xf32>
    %c0_70 = arith.constant 0 : index
    %164 = arith.index_cast %c0_i32 : i32 to index
    %c0_71 = arith.constant 0 : index
    %c0_72 = arith.constant 0 : index
    %165 = vector.load %arg8[%c0_70, %164, %c0_71, %c0_72] : memref<1x1x48x128xf32, #tpu.memory_space<vmem>>, vector<1x1x48x128xf32>
    %166 = vector.shape_cast %165 : vector<1x1x48x128xf32> to vector<48x128xf32>
    %167 = vector.shape_cast %163 : vector<48x128xf32> to vector<1x1x48x128xf32>
    tpu.vector_store %arg8[%c0_70, %164, %c0_71, %c0_72], %167 {strides = array<i32>} : memref<1x1x48x128xf32, #tpu.memory_space<vmem>>, vector<1x1x48x128xf32>,
    %c1_i32 = arith.constant 1 : i32
    return
  }
  func.func @transform_0(%arg0: i32, %arg1: i32) -> (i32, i32, i32, i32) {
    %c0_i32 = arith.constant 0 : i32
    %c0_i32_0 = arith.constant 0 : i32
    %c0_i32_1 = arith.constant 0 : i32
    return %arg0, %c0_i32, %c0_i32_0, %arg1 : i32, i32, i32, i32
  }
  func.func @transform_1(%arg0: i32, %arg1: i32) -> (i32, i32, i32, i32) {
    %c0_i32 = arith.constant 0 : i32
    %c0_i32_0 = arith.constant 0 : i32
    %c0_i32_1 = arith.constant 0 : i32
    return %arg0, %c0_i32, %c0_i32_0, %arg1 : i32, i32, i32, i32
  }
  func.func @transform_2(%arg0: i32, %arg1: i32) -> (i32, i32, i32, i32) {
    %c0_i32 = arith.constant 0 : i32
    %c0_i32_0 = arith.constant 0 : i32
    %c0_i32_1 = arith.constant 0 : i32
    return %arg0, %c0_i32, %c0_i32_0, %arg1 : i32, i32, i32, i32
  }
  func.func @transform_3(%arg0: i32, %arg1: i32) -> (i32, i32, i32, i32) {
    %c0_i32 = arith.constant 0 : i32
    %c0_i32_0 = arith.constant 0 : i32
    %c0_i32_1 = arith.constant 0 : i32
    return %arg0, %c0_i32, %c0_i32_0, %arg1 : i32, i32, i32, i32
  }
  func.func @transform_4(%arg0: i32, %arg1: i32) -> (i32, i32, i32, i32) {
    %c0_i32 = arith.constant 0 : i32
    %c0_i32_0 = arith.constant 0 : i32
    %c0_i32_1 = arith.constant 0 : i32
    return %arg0, %c0_i32, %c0_i32_0, %arg1 : i32, i32, i32, i32
  }
  func.func @transform_5(%arg0: i32, %arg1: i32) -> (i32, i32, i32, i32) {
    %c0_i32 = arith.constant 0 : i32
    %c0_i32_0 = arith.constant 0 : i32
    %c0_i32_1 = arith.constant 0 : i32
    return %arg0, %c0_i32, %c0_i32_0, %arg1 : i32, i32, i32, i32
  }
  func.func @transform_6(%arg0: i32, %arg1: i32) -> (i32, i32, i32, i32) {
    %c0_i32 = arith.constant 0 : i32
    %c0_i32_0 = arith.constant 0 : i32
    %c0_i32_1 = arith.constant 0 : i32
    return %arg0, %c0_i32, %c0_i32_0, %arg1 : i32, i32, i32, i32
  }
}

</mosaic_0001>

<bundles_post_ra>
// kernel: pallas_rwkv7.1
= control target key start
LH: loop header
LB: loop body
LE: loop exit
PB: predicated region body
PF: predicated region fallthrough
CT: control target
= control target key end

     0   :  { %s9754_s0 = inlined_call_operand.hbm [shape: f32[2,1,48,128], index: 0, kind: input, shape index: {}]   ;;  %s9755_s1 = inlined_call_operand.hbm [shape: f32[2,1,48,128], index: 1, kind: input, shape index: {}]   ;;  %s9756_s2 = inlined_call_operand.hbm [shape: f32[2,1,48,128], index: 2, kind: input, shape index: {}]   ;;  %s9757_s3 = inlined_call_operand.hbm [shape: f32[2,1,48,128], index: 3, kind: input, shape index: {}]   ;;  %s9758_s4 = inlined_call_operand.hbm [shape: f32[2,1,48,128], index: 4, kind: input, shape index: {}]   ;;  %s9759_s5 = inlined_call_operand.hbm [shape: f32[2,1,48,128], index: 5, kind: input, shape index: {}]   ;;  %s9760_s6 = inlined_call_operand.hbm [shape: f32[2,1,48,128], index: 6, kind: output, shape index: {}]  }
   0x1   :  { %9790 = sst [smem:[#allocation38_spill]] %s9755_s1 }
   0x2   :  { %9791 = sst [smem:[#allocation39_spill]] %s9757_s3 }
   0x3   :  { %9792 = sst [smem:[#allocation40_spill]] %s9760_s6 }
   0x4   :  { %11 = vsyncpa [#allocation3], 0 }
   0x5   :  { %13 = vsyncpa [#allocation3 + $0x1], 0 }
   0x6   :  { %14 = vsyncpa [#allocation6], 0 }
   0x7   :  { %16 = vsyncpa [#allocation6 + $0x1], 0 }
   0x8   :  { %17 = vsyncpa [#allocation9], 0 }
   0x9   :  { %19 = vsyncpa [#allocation9 + $0x1], 0 }
   0xa   :  { %20 = vsyncpa [#allocation12], 0 }
   0xb   :  { %22 = vsyncpa [#allocation12 + $0x1], 0 }
   0xc   :  { %23 = vsyncpa [#allocation4], 0 }
   0xd   :  { %25 = vsyncpa [#allocation4 + $0x1], 0  ;;  %s8150_s21 = smov 0   ;;  %s8152_s22 = smov 0  }
   0xe   :  { %s8154_s23 = smov 0   ;;  %s8156_s24 = smov 0  }
   0xf   :  { %s8158_s25 = smov 0   ;;  %s8160_s26 = smov 0  }
  0x10 LB: > { %9793 = sst [smem:[#allocation19_spill]] %s8080_s21  ;;  %s8181_s27 = sadd.s32 4294967295, %s8100_s26   ;;  %s8100_s26 = sphi %s8160_s26, %s31_s26   ;;  %s8096_s25 = sphi %s8158_s25, %s9855_s25   ;;  %s8092_s24 = sphi %s8156_s24, %s9854_s24   ;;  %s8088_s23 = sphi %s8154_s23, %s9853_s23   ;;  %s8084_s22 = sphi %s8152_s22, %s9857_s22   ;;  %s8080_s21 = sphi %s8150_s21, %s9856_s21  }
  0x11   : > { %9794 = sst [smem:[#allocation20_spill]] %s8088_s23  ;;  %s5974_s28 = sadd.s32 4294967294, %s8100_s26  }
  0x12   : > { %9795 = sst [smem:[#allocation21_spill]] %s8096_s25  ;;  %s43_s29 = sadd.s32 1, %s8096_s25 }
  0x13   : > { %9796 = sst [smem:[#allocation22_spill]] %s8100_s26  ;;  %s52_s30 = sadd.s32 1, %s8088_s23 }
  0x14   : > { %p45_p0 = scmp.ge.s32.totalorder %s43_s29, 2  ;;  %p59_p1 = scmp.ne.s32.totalorder %s8088_s23, %s8084_s22 }
  0x15   : > { %p60_p2 = scmp.eq.s32.totalorder %s8100_s26, 0  ;;  %p65_p3 = scmp.ne.s32.totalorder %s8084_s22, %s8080_s21 }
  0x16   : > { %s9859_s29 = smov (%p45_p0, %s43_s29), 0  ;;  %p66_p5 = scmp.eq.s32.totalorder %s8181_s27, 0 }
  0x17   : > { %9797 = sst [smem:[#allocation23_spill]] %s9859_s29  ;;  %p8193_p4 = por %p60_p2, %p59_p1 }
  0x18   : > { %s47_s8 = ssub.s32 %s8096_s25, %s9859_s29  ;;  %p231_p6 = scmp.eq.s32.totalorder %s8181_s27, 1 }
  0x19   : > { %p50_p7 = scmp.eq.s32.totalorder %s47_s8, 0  ;;  %p8201_p8 = por %p66_p5, %p65_p3 }
  0x1a   : > { %p8205_p9 = por %p231_p6, %p59_p1  ;;  %p237_p10 = scmp.eq.s32.totalorder %s5974_s28, 1 }
  0x1b   : > { %s8210_s11 = scalar_select %p50_p7, %s8088_s23, %s52_s30  }
  0x1c   : > { %p8212_p11 = por %p237_p10, %p65_p3  ;;  %p7682_p13 = scmp.lt.s32.totalorder %s8100_s26, 2 }
  0x1d   : > { %9801 = sst [smem:[#allocation24_spill]] %s8210_s11  ;;  %s8219_s13 = sand.u32 1, %s8088_s23  }
  0x1e   : > { %s9802_s12 = scalar_select %p8212_p11, 1, 0 }
  0x1f   : > { %s8222_s14 = smul.u32 48, %s8219_s13  ;;  %p8229_p0 = pnand %p7682_p13, %p8193_p4 }
  0x20   : > { %9803 = sst [smem:[#allocation25_spill]] %s9802_s12  ;;  %s8225_s15 = smul.u32 768, %s8096_s25 }
  0x21   : > { %s9762_s17 = sand.u32 1, %s8100_s26   ;;  %s9805_s1 = sld [smem:[#allocation38_spill]] }
  0x22   : > { %s283_s28 = scalar_lea.vmem [#allocation5], %s8222_s14  ;;  %p5983_p1 = scmp.ge.s32.totalorder %s8100_s26, 1 }
  0x23   : > { %s291_s30 = sshll.u32 %s283_s28, 4  ;;  %p387_p2 = scmp.lt.s32.totalorder %s8100_s26, 3  ;;  %s292_s30 = int_to_ptr.vmem [resolvable:$true] %s291_s30 }
  0x24   : > { %s8243_s8 = scalar_lea.sflag [#allocation6], %s9762_s17  ;;  %p8247_p3 = pneg %p8229_p0 }
  0x25   : > { %s7853_s29 = scalar_lea.vmem %s292_s30, 768  ;;  %s8102_s18 = smov [#allocation5]  }
  0x26   : > { %p7854_p4 = scmp.ne.s32.totalorder %s292_s30, %s7853_s29  ;;  %s7858_s19 = sshll.u32 %s8102_s18, 4  ;;  %s7859_s19 = int_to_ptr.vmem [resolvable:$false] %s7858_s19 }
  0x27   : > { %s290_s20 = scalar_lea.hbm %s9805_s1, %s8225_s15  ;;  %s7860_s28 = scalar_lea.vmem %s7859_s19, 1536 }
  0x28   : > { %p7856_p5 = pnand %p7854_p4, %p8247_p3  ;;  %p7861_p7 = scmp.lt.s32.totalorder %s292_s30, %s7859_s19 }
  0x29   : > { %p7862_p10 = scmp.lt.s32.totalorder %s7860_s28, %s7853_s29 }
  0x2a   : > { %p7857_p6 = pneg %p7856_p5 }
  0x2b   : > { %p7863_p13 = por %p7862_p10, %p7861_p7 }
  0x2d   : > { %p7864_p12 = pnand %p7863_p13, %p7857_p6 }
  0x2f   : > { %7867 = shalt.err (!%p7864_p12)
}
  0x30   : > { %s9767_s17 = smov 128   ;;  %s8104_s1 = smov 8  }
  0x31   : > { %7665 = dma.hbm_to_vmem [thread:$0]  (!%p8229_p0), %s290_s20, 768, %s292_s30, %s8243_s8, %s9767_s17, %s9767_s17, %s8104_s1  }
  0x32   : > { %p8263_p4 = pnand %p5983_p1, %p387_p2  ;;  %s9808_s3 = sld [smem:[#allocation39_spill]] }
  0x33   : > { %s327_s25 = scalar_lea.vmem [#allocation8], %s8222_s14  ;;  %s9809_s23 = sand.u32 1, %s8100_s26  }
  0x34   : > { %s335_s11 = sshll.u32 %s327_s25, 4  ;;  %s8274_s12 = scalar_lea.sflag [#allocation9], %s9809_s23  ;;  %s336_s11 = int_to_ptr.vmem [resolvable:$true] %s335_s11 }
  0x35   : > { %s7881_s21 = scalar_lea.vmem %s336_s11, 768  ;;  %s8105_s20 = smov [#allocation8]  }
  0x36   : > { %p7882_p12 = scmp.ne.s32.totalorder %s336_s11, %s7881_s21  ;;  %s7886_s30 = sshll.u32 %s8105_s20, 4  ;;  %s7887_s30 = int_to_ptr.vmem [resolvable:$false] %s7886_s30 }
  0x37   : > { %s7888_s17 = scalar_lea.vmem %s7887_s30, 1536  ;;  %p7889_p1 = scmp.lt.s32.totalorder %s336_s11, %s7887_s30 }
  0x38   : > { %s334_s28 = scalar_lea.hbm %s9808_s3, %s8225_s15  ;;  %p7884_p5 = pnand %p7882_p12, %p8247_p3 }
  0x39   : > { %p7890_p2 = scmp.lt.s32.totalorder %s7888_s17, %s7881_s21 }
  0x3a   : > { %p7885_p6 = pneg %p7884_p5 }
  0x3b   : > { %p7891_p7 = por %p7890_p2, %p7889_p1 }
  0x3d   : > { %p7892_p10 = pnand %p7891_p7, %p7885_p6 }
  0x3f   : > { %7895 = shalt.err (!%p7892_p10)
}
  0x40   : > { %s9810_s25 = smov 128   ;;  %s268_s19 = scalar_lea.hbm %s9754_s0, %s8225_s15 }
  0x41   : > { %7671 = dma.hbm_to_vmem [thread:$0]  (!%p8229_p0), %s334_s28, 768, %s336_s11, %s8274_s12, %s9810_s25, %s9810_s25, %s8104_s1  }
  0x42   : > { %s261_s20 = scalar_lea.vmem [#allocation2], %s8222_s14  ;;  %s258_s17 = scalar_lea.sflag [#allocation3], %s8219_s13 }
  0x43   : > { %s269_s21 = sshll.u32 %s261_s20, 4  ;;  %s8106_s3 = smov [#allocation2]   ;;  %s270_s21 = int_to_ptr.vmem [resolvable:$true] %s269_s21 }
  0x44   : > { %s7909_s30 = scalar_lea.vmem %s270_s21, 768  ;;  %s7914_s26 = sshll.u32 %s8106_s3, 4  ;;  %s7915_s26 = int_to_ptr.vmem [resolvable:$false] %s7914_s26 }
  0x45   : > { %p7910_p13 = scmp.ne.s32.totalorder %s270_s21, %s7909_s30  ;;  %s7916_s6 = scalar_lea.vmem %s7915_s26, 1536 }
  0x46   : > { %p7917_p6 = scmp.lt.s32.totalorder %s270_s21, %s7915_s26  ;;  %p7918_p1 = scmp.lt.s32.totalorder %s7916_s6, %s7909_s30 }
  0x47   : > { %p7912_p12 = pnand %p7910_p13, %p8247_p3 }
  0x48   : > { %p7919_p2 = por %p7918_p1, %p7917_p6 }
  0x49   : > { %p7913_p5 = pneg %p7912_p12 }
  0x4b   : > { %p7920_p7 = pnand %p7919_p2, %p7913_p5 }
  0x4d   : > { %7923 = shalt.err (!%p7920_p7)
}
  0x4e   : > { %7662 = dma.hbm_to_vmem [thread:$0]  (!%p8229_p0), %s268_s19, 768, %s270_s21, %s258_s17, %s9810_s25, %s9810_s25, %s8104_s1  }
  0x4f   : > { %s312_s3 = scalar_lea.hbm %s9756_s2, %s8225_s15  ;;  %s305_s23 = scalar_lea.vmem [#allocation7], %s8222_s14 }
  0x50   : > { %s313_s18 = sshll.u32 %s305_s23, 4  ;;  %s8107_s26 = smov [#allocation7]   ;;  %s314_s18 = int_to_ptr.vmem [resolvable:$true] %s313_s18 }
  0x51   : > { %s7937_s6 = scalar_lea.vmem %s314_s18, 768  ;;  %s7942_s20 = sshll.u32 %s8107_s26, 4  ;;  %s7943_s20 = int_to_ptr.vmem [resolvable:$false] %s7942_s20 }
  0x52   : > { %p7938_p10 = scmp.ne.s32.totalorder %s314_s18, %s7937_s6  ;;  %s7944_s30 = scalar_lea.vmem %s7943_s20, 1536 }
  0x53   : > { %p7945_p5 = scmp.lt.s32.totalorder %s314_s18, %s7943_s20  ;;  %p7946_p6 = scmp.lt.s32.totalorder %s7944_s30, %s7937_s6 }
  0x54   : > { %p7940_p13 = pnand %p7938_p10, %p8247_p3 }
  0x55   : > { %p7947_p1 = por %p7946_p6, %p7945_p5 }
  0x56   : > { %p7941_p12 = pneg %p7940_p13 }
  0x58   : > { %p7948_p2 = pnand %p7947_p1, %p7941_p12 }
  0x5a   : > { %7951 = shalt.err (!%p7948_p2)
}
  0x5b   : > { %7668 = dma.hbm_to_vmem [thread:$0]  (!%p8229_p0), %s312_s3, 768, %s314_s18, %s8243_s8, %s9810_s25, %s9810_s25, %s8104_s1  }
  0x5c   : > { %s356_s17 = scalar_lea.hbm %s9758_s4, %s8225_s15  ;;  %s349_s11 = scalar_lea.vmem [#allocation10], %s8222_s14 }
  0x5d   : > { %s357_s28 = sshll.u32 %s349_s11, 4  ;;  %s8108_s6 = smov [#allocation10]   ;;  %s358_s28 = int_to_ptr.vmem [resolvable:$true] %s357_s28 }
  0x5e   : > { %s7965_s23 = scalar_lea.vmem %s358_s28, 768  ;;  %s7970_s26 = sshll.u32 %s8108_s6, 4  ;;  %s7971_s26 = int_to_ptr.vmem [resolvable:$false] %s7970_s26 }
  0x5f   : > { %p7966_p7 = scmp.ne.s32.totalorder %s358_s28, %s7965_s23  ;;  %s7972_s20 = scalar_lea.vmem %s7971_s26, 1536 }
  0x60   : > { %p7973_p12 = scmp.lt.s32.totalorder %s358_s28, %s7971_s26  ;;  %p7974_p5 = scmp.lt.s32.totalorder %s7972_s20, %s7965_s23 }
  0x61   : > { %p7968_p10 = pnand %p7966_p7, %p8247_p3 }
  0x62   : > { %p7975_p6 = por %p7974_p5, %p7973_p12 }
  0x63   : > { %p7969_p13 = pneg %p7968_p10 }
  0x65   : > { %p7976_p1 = pnand %p7975_p6, %p7969_p13 }
  0x67   : > { %7979 = shalt.err (!%p7976_p1)
}
  0x68   : > { %7674 = dma.hbm_to_vmem [thread:$0]  (!%p8229_p0), %s356_s17, 768, %s358_s28, %s8274_s12, %s9810_s25, %s9810_s25, %s8104_s1  }
  0x69   : > { %s378_s18 = scalar_lea.hbm %s9759_s5, %s8225_s15  ;;  %s371_s30 = scalar_lea.vmem [#allocation11], %s8222_s14 }
  0x6a   : > { %s379_s19 = sshll.u32 %s371_s30, 4  ;;  %s368_s21 = scalar_lea.sflag [#allocation12], %s8219_s13  ;;  %s380_s19 = int_to_ptr.vmem [resolvable:$true] %s379_s19 }
  0x6b   : > { %s7993_s11 = scalar_lea.vmem %s380_s19, 768  ;;  %s8109_s23 = smov [#allocation11]  }
  0x6c   : > { %p7994_p2 = scmp.ne.s32.totalorder %s380_s19, %s7993_s11  ;;  %s7998_s6 = sshll.u32 %s8109_s23, 4  ;;  %s7999_s6 = int_to_ptr.vmem [resolvable:$false] %s7998_s6 }
  0x6d   : > { %s8000_s26 = scalar_lea.vmem %s7999_s6, 1536  ;;  %p8001_p13 = scmp.lt.s32.totalorder %s380_s19, %s7999_s6 }
  0x6e   : > { %p7996_p7 = pnand %p7994_p2, %p8247_p3  ;;  %p8002_p12 = scmp.lt.s32.totalorder %s8000_s26, %s7993_s11 }
  0x70   : > { %p7997_p10 = pneg %p7996_p7  ;;  %p8003_p5 = por %p8002_p12, %p8001_p13 }
  0x72   : > { %p8004_p6 = pnand %p8003_p5, %p7997_p10 }
  0x74   : > { %8007 = shalt.err (!%p8004_p6)
}
  0x75   : > { %7677 = dma.hbm_to_vmem [thread:$0]  (!%p8229_p0), %s378_s18, 768, %s380_s19, %s368_s21, %s9810_s25, %s9810_s25, %s8104_s1  }
  0x76   : > { %391 = sbr.rel (%p8263_p4) target bundleno = 4679 (0x1247), region = 44 }
  0x7b   : > { %s8339_s12 = sand.u32 1, %s8084_s22  }
  0x7c   : > { %s8342_s13 = smul.u32 48, %s8339_s12  ;;  %s394_s14 = scalar_lea.sflag [#allocation3], %s8339_s12 }
  0x7e   : > { %s8346_s15 = scalar_lea.vmem [#allocation2], %s8342_s13 }
  0x7f   : > { %8059 = dma.done.wait (%p8201_p8), %s394_s14, 768  }
  0x80   : > { %8061 = vsyncadd (%p8201_p8), %s394_s14, 4294966528  ;;  %s402_s1 = sand.u32 1, %s8181_s27   ;;  %s406_s7 = scalar_lea.vmem [#allocation5], %s8342_s13 }
  0x81   : > { %s403_s16 = scalar_lea.sflag [#allocation6], %s402_s1 }
  0x82   : > { %8063 = dma.done.wait (%p8201_p8), %s403_s16, 1536  }
  0x83   : > { %8065 = vsyncadd (%p8201_p8), %s403_s16, 4294965760  ;;  %s8359_s29 = scalar_lea.vmem [#allocation7], %s8342_s13  ;;  %s421_s25 = scalar_lea.sflag [#allocation9], %s402_s1 }
  0x84   : > { %s8362_s17 = scalar_lea.vmem [#allocation8], %s8342_s13 }
  0x85   : > { %8067 = dma.done.wait (%p8201_p8), %s421_s25, 1536  }
  0x86   : > { %8069 = vsyncadd (%p8201_p8), %s421_s25, 4294965760  ;;  %s8369_s27 = scalar_lea.vmem [#allocation10], %s8342_s13  ;;  %s439_s28 = scalar_lea.sflag [#allocation12], %s8339_s12 }
  0x87   : > { %s8373_s20 = scalar_lea.vmem [#allocation11], %s8342_s13 }
  0x88   : > { %8071 = dma.done.wait (%p8201_p8), %s439_s28, 768  }
  0x89   : > { %8073 = vsyncadd (%p8201_p8), %s439_s28, 4294966528  ;;  %v496_v0 = vlaneseq  ;;  %vm613_vm0 = vcmask 392192   ;;  %v9773_v3 = vmov 0.0   ;;  %v570_v5 = vld [vmem:[%s406_s7 + $0x28] sm:$0xff]  ;;  %v569_v6 = vld [vmem:[%s406_s7 + $0x20] sm:$0xff]  ;;  %vm799_vm7 = vcmask 523264  }
  0x8a   : > { %v568_v7 = vld [vmem:[%s406_s7 + $0x18] sm:$0xff]  ;;  %v605_v8 = vmul.f32 1.442695, %v570_v5  ;;  %v603_v9 = vmul.f32 1.442695, %v569_v6  ;;  %v567_v11 = vld [vmem:[%s406_s7 + $0x10] sm:$0xff] }
  0x8b   : > { %v8379_v1 = vshrl.u32 %v496_v0, 7  ;;  %v8381_v2 = vand.u32 127, %v496_v0  ;;  %v601_v10 = vmul.f32 1.442695, %v568_v7  ;;  %v566_v12 = vld [vmem:[%s406_s7 + $0x8] sm:$0xff]  ;;  %v565_v13 = vld [vmem:[%s406_s7] sm:$0xff] }
  0x8c   : > { %7738 = vpow2.f32 %v605_v8  ;;  %v599_v14 = vmul.f32 1.442695, %v567_v11  ;;  %v597_v15 = vmul.f32 1.442695, %v566_v12  ;;  %v595_v16 = vmul.f32 1.442695, %v565_v13 }
  0x8d   : > { %vm505_vm1 = vcmp.ge.s32.totalorder %v8379_v1, %v8381_v2  ;;  %7740 = vpow2.f32 %v603_v9  ;;  %v8402_v26 = vadd.s32 8, %v8379_v1  ;;  %v8406_v28 = vadd.s32 16, %v8379_v1  ;;  %v583_v54 = vld [vmem:[%s8369_s27] sm:$0xff]  ;;  %v594_v61 = vld [vmem:[%s8373_s20 + $0x28] sm:$0xff]  ;;  %s8111_s9 = smov 64   ;;  %s495_s8 = scalar_lea.vmem [#allocation13], %s8342_s13 }
  0x8e   : > { %v8386_v4 = vsel %vm505_vm1, 1.0, %v9773_v3  ;;  %7742 = vpow2.f32 %v601_v10  ;;  %v8418_v31 = vadd.s32 24, %v8379_v1  ;;  %v8424_v32 = vadd.s32 32, %v8379_v1  ;;  %v576_v62 = vld [vmem:[%s8359_s29 + $0x28] sm:$0xff]  ;;  %v593_v8 = vld [vmem:[%s8373_s20 + $0x20] sm:$0xff]  ;;  %s5769_s3 = sshll.u32 %s495_s8, 4  ;;  %s9697_s3 = int_to_ptr.vmem [resolvable:$true] %s5769_s3 }
  0x8f   : > { %6801 = vmatprep.mubr.msk.f32.mxu0 %vm613_vm0, %v8386_v4  ;;  %7744 = vpow2.f32 %v599_v14  ;;  %vm506_vm2 = vcmp.ge.s32.totalorder %v8402_v26, %v8381_v2  ;;  %vm507_vm3 = vcmp.ge.s32.totalorder %v8406_v28, %v8381_v2  ;;  %v8438_v35 = vadd.s32 40, %v8379_v1  ;;  %v575_v9 = vld [vmem:[%s8359_s29 + $0x20] sm:$0xff]  ;;  %s7644_s18 = smul.u32 768, %s8092_s24  ;;  %s9845_s21 = sld [smem:[#allocation40_spill]] }
  0x90   : > { %7746 = vpow2.f32 %v597_v15  ;;  %v8429_v33 = vsel %vm506_vm2, 1.0, %v9773_v3  ;;  %v8433_v34 = vsel %vm507_vm3, 1.0, %v9773_v3  ;;  %vm508_vm4 = vcmp.ge.s32.totalorder %v8418_v31, %v8381_v2  ;;  %v592_v15 = vld [vmem:[%s8373_s20 + $0x18] sm:$0xff]  ;;  %s5755_s24 = scalar_lea.sflag [#allocation4], %s8339_s12  ;;  %s8008_s6 = scalar_lea.vmem %s9697_s3, 768 }
  0x91   : > { %7748 = vpow2.f32 %v595_v16  ;;  %9811 = vst [vmem:[#allocation26_spill] sm:$0xff] %v8429_v33  ;;  %9812 = vst [vmem:[#allocation27_spill] sm:$0xff] %v8433_v34  ;;  %vm509_vm5 = vcmp.ge.s32.totalorder %v8424_v32, %v8381_v2  ;;  %v8448_v36 = vsel %vm508_vm4, 1.0, %v9773_v3  ;;  %vm510_vm6 = vcmp.ge.s32.totalorder %v8438_v35, %v8381_v2  ;;  %v574_v16 = vld [vmem:[%s8359_s29 + $0x18] sm:$0xff]  ;;  %p8009_p8 = scmp.ne.s32.totalorder %s9697_s3, %s8008_s6  ;;  %s8112_s26 = smov [#allocation13]  }
  0x92   : > { %9813 = vst [vmem:[#allocation28_spill] sm:$0xff] %v8448_v36  ;;  %v8451_v37 = vsel %vm509_vm5, 1.0, %v9773_v3  ;;  %v8460_v38 = vsel %vm510_vm6, 1.0, %v9773_v3  ;;  %vm523_vm8 = vcmp.gt.s32.totalorder %v8379_v1, %v8381_v2  ;;  %vm541_vm9 = vcmp.eq.s32.totalorder %v8379_v1, %v8381_v2  ;;  %s8012_s13 = sshll.u32 %s8112_s26, 4  ;;  %s8013_s13 = int_to_ptr.vmem [resolvable:$false] %s8012_s13 }
  0x93   : > { %9814 = vst [vmem:[#allocation29_spill] sm:$0xff] %v8451_v37  ;;  %9815 = vst [vmem:[#allocation30_spill] sm:$0xff] %v8460_v38  ;;  %vm528_vm10 = vcmp.gt.s32.totalorder %v8438_v35, %v8381_v2  ;;  %vm527_vm11 = vcmp.gt.s32.totalorder %v8424_v32, %v8381_v2  ;;  %vm526_vm12 = vcmp.gt.s32.totalorder %v8418_v31, %v8381_v2  ;;  %p8010_p0 = pnand %p8009_p8, %p8205_p9  ;;  %s8014_s14 = scalar_lea.vmem %s8013_s13, 1536 }
  0x94   : > { %vm525_vm13 = vcmp.gt.s32.totalorder %v8406_v28, %v8381_v2  ;;  %vm524_vm14 = vcmp.gt.s32.totalorder %v8402_v26, %v8381_v2  ;;  %vm542_vm15 = vcmp.eq.s32.totalorder %v8402_v26, %v8381_v2  ;;  %vm543_vm1 = vcmp.eq.s32.totalorder %v8406_v28, %v8381_v2  ;;  %p8015_p4 = scmp.lt.s32.totalorder %s9697_s3, %s8013_s13  ;;  %p8016_p1 = scmp.lt.s32.totalorder %s8014_s14, %s8008_s6 }
  0x95   : > { %vm544_vm2 = vcmp.eq.s32.totalorder %v8418_v31, %v8381_v2  ;;  %vm545_vm3 = vcmp.eq.s32.totalorder %v8424_v32, %v8381_v2  ;;  %vm546_vm4 = vcmp.eq.s32.totalorder %v8438_v35, %v8381_v2  ;;  %s9846_s11 = smov %s9845_s21  ;;  %s9704_s23 = scalar_lea.hbm %s9845_s21, %s7644_s18 }
  0x96   : > { %v8713_v31 = vsel %vm545_vm3, 1.0, %v9773_v3  ;;  %p8011_p3 = pneg %p8010_p0  ;;  %p8017_p2 = por %p8016_p1, %p8015_p4 }
  0x97   : > { %9820 = vst [vmem:[#allocation35_spill] sm:$0xff] %v8713_v31 }
  0x98   : > { %p8018_p7 = pnand %p8017_p2, %p8011_p3 }
  0x99   : > { %v7739_v17 = vpop.eup %7738 }
  0x9a   : > { %v7741_v18 = vpop.eup %7740  ;;  %v8390_v19 = vsub.f32 0.0, %v7739_v17 }
  0x9b   : > { %v7743_v20 = vpop.eup %7742  ;;  %v8392_v21 = vsub.f32 0.0, %v7741_v18 }
  0x9c   : > { %v7745_v22 = vpop.eup %7744  ;;  %6789 = vmatprep.subr.mxu0 %v8390_v19  ;;  %v8395_v23 = vsub.f32 0.0, %v7743_v20  ;;  %3109 = vrot.lane.b32.xlu0 %v8390_v19, %s8111_s9 }
  0x9d   : > { %v7747_v24 = vpop.eup %7746  ;;  %6790 = vmatpush3.msra.mxu0 %v8390_v19  ;;  %v8399_v25 = vsub.f32 0.0, %v7745_v22 }
  0x9e   : > { %6791 = vmatprep.subr.mxu0 %v8392_v21  ;;  %v7749_v27 = vpop.eup %7748  ;;  %v8409_v29 = vsub.f32 0.0, %v7747_v24  ;;  %3105 = vrot.lane.b32.xlu1 %v8395_v23, %s8111_s9 }
  0x9f   : > { %6792 = vmatpush3.msra.mxu0 %v8392_v21  ;;  %v8413_v30 = vsub.f32 0.0, %v7749_v27 }
  0xa0   : > { %6793 = vmatprep.subr.mxu0 %v8395_v23  ;;  %3107 = vrot.lane.b32.xlu0 %v8392_v21, %s8111_s9 }
  0xa1   : > { %6794 = vmatpush3.msra.mxu0 %v8395_v23 }
  0xa2   : > { %6795 = vmatprep.subr.mxu0 %v8399_v25  ;;  %3103 = vrot.lane.b32.xlu1 %v8399_v25, %s8111_s9 }
  0xa3   : > { %6796 = vmatpush3.msra.mxu0 %v8399_v25 }
  0xa4   : > { %6797 = vmatprep.subr.mxu0 %v8409_v29  ;;  %3101 = vrot.lane.b32.xlu0 %v8409_v29, %s8111_s9 }
  0xa5   : > { %6798 = vmatpush3.msra.mxu0 %v8409_v29 }
  0xa6   : > { %6799 = vmatprep.subr.mxu0 %v8413_v30  ;;  %3099 = vrot.lane.b32.xlu1 %v8413_v30, %s8111_s9 }
  0xa7   : > { %6800 = vmatpush3.msra.mxu0 %v8413_v30 }
  0xa8   : > { %6802 = vmatmul.mubr.msk.f32.vlgmr.msra.gmra.mxu0 %vm613_vm0, %v8429_v33 }
  0xa9   : > { %6804 = vmatprep.mubr.msk.f32.mxu0 %vm613_vm0, %v8433_v34 }
  0xac   : > { %6805 = vmatmul.mubr.msk.f32.gmra.mxu0 %vm613_vm0, %v8448_v36 }
  0xad   : > { %6807 = vmatprep.mubr.msk.f32.mxu0 %vm613_vm0, %v8451_v37 }
  0xb0   : > { %6808 = vmatmul.mubr.msk.f32.gmra.mxu0 %vm613_vm0, %v8460_v38 }
 0x168   : > { %v8464_v39 = vpop.f32.mrf.mxu0 }
 0x169   : > { %v758_v56 = vsub.f32 0.0, %v8464_v39  ;;  %v740_v5 = vsub.f32 %v8464_v39, %v8409_v29 }
 0x16a   : > { %v8466_v40 = vpop.f32.mrf.mxu0 }
 0x16b   : > { %v739_v41 = vsub.f32 %v8466_v40, %v8413_v30  ;;  %v765_v59 = vmul.f32 1.442695, %v758_v56  ;;  %v757_v60 = vsub.f32 0.0, %v8466_v40  ;;  %v747_v17 = vmul.f32 1.442695, %v740_v5 }
 0x16c   : > { %v8470_v42 = vpop.f32.mrf.mxu0 }
 0x16d   : > { %v745_v43 = vmul.f32 1.442695, %v739_v41  ;;  %v760_v49 = vsub.f32 0.0, %v8470_v42  ;;  %v763_v63 = vmul.f32 1.442695, %v757_v60  ;;  %v742_v18 = vsub.f32 %v8470_v42, %v8395_v23 }
 0x16e   : > { %v8472_v44 = vpop.f32.mrf.mxu0 }
 0x16f   : > { %7750 = vpow2.f32 %v745_v43  ;;  %v769_v52 = vmul.f32 1.442695, %v760_v49  ;;  %v759_v53 = vsub.f32 0.0, %v8472_v44  ;;  %v741_v10 = vsub.f32 %v8472_v44, %v8399_v25  ;;  %v591_v43 = vld [vmem:[%s8373_s20 + $0x10] sm:$0xff] }
 0x170   : > { %v8474_v45 = vpop.f32.mrf.mxu0 }
 0x171   : > { %v762_v46 = vsub.f32 0.0, %v8474_v45  ;;  %v767_v57 = vmul.f32 1.442695, %v759_v53  ;;  %v749_v20 = vmul.f32 1.442695, %v741_v10  ;;  %v744_v49 = vsub.f32 %v8474_v45, %v8390_v19  ;;  %v585_v10 = vld [vmem:[%s8369_s27 + $0x10] sm:$0xff] }
 0x172   : > { %v8477_v47 = vpop.f32.mrf.mxu0 }
 0x173   : > { %v761_v48 = vsub.f32 0.0, %v8477_v47  ;;  %v773_v50 = vmul.f32 1.442695, %v762_v46  ;;  %v743_v22 = vsub.f32 %v8477_v47, %v8392_v21  ;;  %v573_v46 = vld [vmem:[%s8359_s29 + $0x10] sm:$0xff]  ;;  %v755_v56 = vmul.f32 1.442695, %v744_v49 }
 0x174   : > { %v8625_v49 = vsel %vm523_vm8, 1.0, %v9773_v3 }
 0x175   : > { %v771_v51 = vmul.f32 1.442695, %v761_v48  ;;  %7752 = vpow2.f32 %v773_v50  ;;  %v751_v48 = vmul.f32 1.442695, %v742_v18  ;;  %v753_v50 = vmul.f32 1.442695, %v743_v22 }
 0x176   : > { %v587_v18 = vld [vmem:[%s8369_s27 + $0x20] sm:$0xff] }
 0x177   : > { %7754 = vpow2.f32 %v771_v51 }
 0x178   : > { %7756 = vpow2.f32 %v769_v52 }
 0x179   : > { %7758 = vpow2.f32 %v767_v57 }
 0x17a   : > { %7760 = vpow2.f32 %v765_v59 }
 0x17b   : > { %7762 = vpow2.f32 %v763_v63 }
 0x17c   : > { %v7751_v55 = vpop.eup %7750  ;;  %7764 = vpow2.f32 %v747_v17 }
 0x17d   : > { %v8484_v58 = vmul.f32 %v7751_v55, %v583_v54  ;;  %7766 = vpow2.f32 %v749_v20  ;;  %v590_v54 = vld [vmem:[%s8373_s20 + $0x8] sm:$0xff] }
 0x17e   : > { %v572_v55 = vld [vmem:[%s8359_s29 + $0x8] sm:$0xff]  ;;  %7768 = vpow2.f32 %v751_v48 }
 0x17f   : > { %6822 = vmatprep.mubr.msk.f32.mxu1 %vm799_vm7, %v8484_v58  ;;  %6843 = vmatprep.mubr.msk.f32.mxu0 %vm799_vm7, %v8484_v58  ;;  %7770 = vpow2.f32 %v753_v50 }
 0x180   : > { %7772 = vpow2.f32 %v755_v56 }
 0x182   : > { %v7753_v0 = vpop.eup %7752 }
 0x183   : > { %v8495_v6 = vmul.f32 %v7753_v0, %v594_v61  ;;  %v8497_v7 = vmul.f32 %v7753_v0, %v576_v62  ;;  %v589_v61 = vld [vmem:[%s8373_s20] sm:$0xff] }
 0x184   : > { %v7755_v11 = vpop.eup %7754  ;;  %v571_v62 = vld [vmem:[%s8359_s29] sm:$0xff] }
 0x185   : > { %6810 = vmatprep.subr.msk.mxu1 %vm799_vm7, %v8495_v6  ;;  %6831 = vmatprep.subr.msk.mxu0 %vm799_vm7, %v8497_v7  ;;  %v7757_v12 = vpop.eup %7756  ;;  %v8511_v13 = vmul.f32 %v7755_v11, %v593_v8  ;;  %v8513_v14 = vmul.f32 %v7755_v11, %v575_v9  ;;  %v584_v8 = vld [vmem:[%s8369_s27 + $0x8] sm:$0xff] }
 0x186   : > { %6811 = vmatpush3.xpose.msk.msra.mxu1 %vm799_vm7, %v8495_v6  ;;  %6832 = vmatpush3.xpose.msk.msra.mxu0 %vm799_vm7, %v8497_v7  ;;  %v8525_v24 = vmul.f32 %v7757_v12, %v592_v15  ;;  %v8527_v27 = vmul.f32 %v7757_v12, %v574_v16  ;;  %v7759_v41 = vpop.eup %7758  ;;  %v586_v16 = vld [vmem:[%s8369_s27 + $0x18] sm:$0xff] }
 0x187   : > { %6812 = vmatprep.subr.msk.mxu1 %vm799_vm7, %v8511_v13  ;;  %6833 = vmatprep.subr.msk.mxu0 %vm799_vm7, %v8513_v14  ;;  %v8541_v51 = vmul.f32 %v7759_v41, %v591_v43  ;;  %v8543_v52 = vmul.f32 %v7759_v41, %v573_v46  ;;  %v7761_v53 = vpop.eup %7760  ;;  %v588_v43 = vld [vmem:[%s8369_s27 + $0x28] sm:$0xff] }
 0x188   : > { %v8555_v57 = vmul.f32 %v7761_v53, %v590_v54  ;;  %v8557_v59 = vmul.f32 %v7761_v53, %v572_v55  ;;  %v7763_v60 = vpop.eup %7762  ;;  %v8628_v53 = vsel %vm541_vm9, 1.0, %v9773_v3 }
 0x189   : > { %v8569_v63 = vmul.f32 %v7763_v60, %v589_v61  ;;  %v8571_v0 = vmul.f32 %v7763_v60, %v571_v62  ;;  %v7765_v5 = vpop.eup %7764  ;;  %9816 = vst [vmem:[#allocation31_spill] sm:$0xff] %v8628_v53  ;;  %v8640_v60 = vsel %vm528_vm10, 1.0, %v9773_v3  ;;  %v8647_v62 = vsel %vm527_vm11, 1.0, %v9773_v3 }
 0x18a   : > { %6813 = vmatpush3.xpose.msk.msra.mxu1 %vm799_vm7, %v8511_v13  ;;  %6834 = vmatpush3.xpose.msk.msra.mxu0 %vm799_vm7, %v8513_v14  ;;  %v7767_v9 = vpop.eup %7766  ;;  %v8587_v11 = vmul.f32 %v7765_v5, %v584_v8  ;;  %v8655_v8 = vsel %vm526_vm12, 1.0, %v9773_v3 }
 0x18b   : > { %6814 = vmatprep.subr.msk.mxu1 %vm799_vm7, %v8525_v24  ;;  %6835 = vmatprep.subr.msk.mxu0 %vm799_vm7, %v8527_v27  ;;  %v7769_v12 = vpop.eup %7768  ;;  %v8589_v15 = vmul.f32 %v7767_v9, %v585_v10 }
 0x18c   : > { %v7771_v17 = vpop.eup %7770  ;;  %v8601_v20 = vmul.f32 %v7769_v12, %v586_v16  ;;  %v8664_v12 = vsel %vm525_vm13, 1.0, %v9773_v3 }
 0x18d   : > { %v7773_v22 = vpop.eup %7772  ;;  %v8603_v41 = vmul.f32 %v7771_v17, %v587_v18  ;;  %v8672_v17 = vsel %vm524_vm14, 1.0, %v9773_v3 }
 0x18e   : > { %6815 = vmatpush3.xpose.msk.msra.mxu1 %vm799_vm7, %v8525_v24  ;;  %6836 = vmatpush3.xpose.msk.msra.mxu0 %vm799_vm7, %v8527_v27  ;;  %v8614_v46 = vmul.f32 %v7773_v22, %v588_v43 }
 0x18f   : > { %6816 = vmatprep.subr.msk.mxu1 %vm799_vm7, %v8541_v51  ;;  %6837 = vmatprep.subr.msk.mxu0 %vm799_vm7, %v8543_v52 }
 0x192   : > { %6817 = vmatpush3.xpose.msk.msra.mxu1 %vm799_vm7, %v8541_v51  ;;  %6838 = vmatpush3.xpose.msk.msra.mxu0 %vm799_vm7, %v8543_v52 }
 0x193   : > { %6818 = vmatprep.subr.msk.mxu1 %vm799_vm7, %v8555_v57  ;;  %6839 = vmatprep.subr.msk.mxu0 %vm799_vm7, %v8557_v59 }
 0x196   : > { %6819 = vmatpush3.xpose.msk.msra.mxu1 %vm799_vm7, %v8555_v57  ;;  %6840 = vmatpush3.xpose.msk.msra.mxu0 %vm799_vm7, %v8557_v59 }
 0x197   : > { %6820 = vmatprep.subr.msk.mxu1 %vm799_vm7, %v8569_v63  ;;  %6841 = vmatprep.subr.msk.mxu0 %vm799_vm7, %v8571_v0 }
 0x19a   : > { %6821 = vmatpush3.xpose.msk.msra.mxu1 %vm799_vm7, %v8569_v63  ;;  %6842 = vmatpush3.xpose.msk.msra.mxu0 %vm799_vm7, %v8571_v0 }
 0x19d   : > { %6823 = vmatmul.mubr.msk.f32.vlgmr.msra.gmra.mxu1 %vm799_vm7, %v8587_v11  ;;  %6844 = vmatmul.mubr.msk.f32.vlgmr.msra.gmra.mxu0 %vm799_vm7, %v8587_v11 }
 0x19e   : > { %6825 = vmatprep.mubr.msk.f32.mxu1 %vm799_vm7, %v8589_v15  ;;  %6846 = vmatprep.mubr.msk.f32.mxu0 %vm799_vm7, %v8589_v15 }
 0x1a1   : > { %6826 = vmatmul.mubr.msk.f32.gmra.mxu1 %vm799_vm7, %v8601_v20  ;;  %6847 = vmatmul.mubr.msk.f32.gmra.mxu0 %vm799_vm7, %v8601_v20 }
 0x1a2   : > { %6828 = vmatprep.mubr.msk.f32.mxu1 %vm799_vm7, %v8603_v41  ;;  %6849 = vmatprep.mubr.msk.f32.mxu0 %vm799_vm7, %v8603_v41 }
 0x1a5   : > { %6829 = vmatmul.mubr.msk.f32.gmra.mxu1 %vm799_vm7, %v8614_v46  ;;  %6850 = vmatmul.mubr.msk.f32.gmra.mxu0 %vm799_vm7, %v8614_v46 }
 0x25d   : > { %v6824_v48 = vpop.f32.mrf.mxu1  ;;  %v8734_v35 = vpop.f32.mrf.mxu0 }
 0x25e   : > { %v932_v22 = vmul.f32 %v6824_v48, %v8672_v17 }
 0x25f   : > { %v902_v50 = vpop.f32.mrf.mxu1 }
 0x260   : > { %v931_v54 = vmul.f32 %v8625_v49, %v902_v50 }
 0x261   : > { %v6827_v55 = vpop.f32.mrf.mxu1 }
 0x262   : > { %6864 = vmatprep.mubr.msk.f32.mxu1 %vm613_vm0, %v931_v54  ;;  %v8635_v56 = vadd.f32 %v8628_v53, %v931_v54  ;;  %v8668_v16 = vmul.f32 %v6827_v55, %v8655_v8  ;;  %v8707_v53 = vsel %vm544_vm2, 1.0, %v9773_v3 }
 0x263   : > { %v912_v1 = vpop.f32.mrf.mxu1  ;;  %9819 = vst [vmem:[#allocation34_spill] sm:$0xff] %v8707_v53 }
 0x264   : > { %6885 = vmatprep.mubr.msk.f32.mxu0 %vm613_vm0, %v8635_v56  ;;  %v933_v18 = vmul.f32 %v8664_v12, %v912_v1  ;;  %v1059_v32 = vadd.f32 %v8707_v53, %v8668_v16 }
 0x265   : > { %v6830_v61 = vpop.f32.mrf.mxu1 }
 0x266   : > { %v8652_v5 = vmul.f32 %v6830_v61, %v8640_v60  ;;  %v8693_v61 = vsel %vm542_vm15, 1.0, %v9773_v3 }
 0x267   : > { %v922_v9 = vpop.f32.mrf.mxu1  ;;  %9817 = vst [vmem:[#allocation32_spill] sm:$0xff] %v8693_v61  ;;  %v8703_v26 = vadd.f32 %v8693_v61, %v932_v22 }
 0x268   : > { %v8660_v10 = vmul.f32 %v8647_v62, %v922_v9  ;;  %6852 = vmatprep.subr.mxu1 %v8652_v5  ;;  %v8696_v9 = vsel %vm543_vm1, 1.0, %v9773_v3 }
 0x269   : > { %6853 = vmatpush3.msra.mxu1 %v8652_v5  ;;  %9818 = vst [vmem:[#allocation33_spill] sm:$0xff] %v8696_v9  ;;  %v1058_v28 = vadd.f32 %v8696_v9, %v933_v18 }
 0x26a   : > { %6854 = vmatprep.subr.mxu1 %v8660_v10 }
 0x26b   : > { %6855 = vmatpush3.msra.mxu1 %v8660_v10 }
 0x26c   : > { %6856 = vmatprep.subr.mxu1 %v8668_v16 }
 0x26d   : > { %6857 = vmatpush3.msra.mxu1 %v8668_v16 }
 0x26e   : > { %6858 = vmatprep.subr.mxu1 %v933_v18 }
 0x26f   : > { %6859 = vmatpush3.msra.mxu1 %v933_v18 }
 0x270   : > { %6860 = vmatprep.subr.mxu1 %v932_v22 }
 0x271   : > { %6861 = vmatpush3.msra.mxu1 %v932_v22 }
 0x272   : > { %6862 = vmatprep.subr.mxu1 %v931_v54 }
 0x273   : > { %6863 = vmatpush3.msra.mxu1 %v931_v54 }
 0x274   : > { %6865 = vmatmul.mubr.msk.f32.vlgmr.msra.gmra.mxu1 %vm613_vm0, %v932_v22  ;;  %v8724_v22 = vsel %vm546_vm4, 1.0, %v9773_v3 }
 0x275   : > { %6867 = vmatprep.mubr.msk.f32.mxu1 %vm613_vm0, %v933_v18  ;;  %v1060_v18 = vadd.f32 %v8713_v31, %v8660_v10  ;;  %9821 = vst [vmem:[#allocation36_spill] sm:$0xff] %v8724_v22  ;;  %v1061_v2 = vadd.f32 %v8724_v22, %v8652_v5 }
 0x278   : > { %6868 = vmatmul.mubr.msk.f32.gmra.mxu1 %vm613_vm0, %v8668_v16 }
 0x279   : > { %6870 = vmatprep.mubr.msk.f32.mxu1 %vm613_vm0, %v8660_v10  ;;  %v8736_v10 = vpop.f32.mrf.mxu0 }
 0x27b   : > { %v8738_v16 = vpop.f32.mrf.mxu0 }
 0x27c   : > { %6871 = vmatmul.mubr.msk.f32.gmra.mxu1 %vm613_vm0, %v8652_v5 }
 0x334   : > { %v6866_v43 = vpop.f32.mrf.mxu1 }
 0x336   : > { %v1146_v48 = vpop.f32.mrf.mxu1 }
 0x337   : > { %6906 = vmatprep.mubr.msk.f32.mxu1 %vm613_vm0, %v1146_v48 }
 0x338   : > { %v6869_v50 = vpop.f32.mrf.mxu1 }
 0x33a   : > { %v1156_v55 = vpop.f32.mrf.mxu1 }
 0x33c   : > { %v6872_v54 = vpop.f32.mrf.mxu1 }
 0x33d   : > { %6873 = vmatprep.subr.mxu0 %v6872_v54  ;;  %6894 = vmatprep.subr.mxu1 %v6872_v54 }
 0x33e   : > { %v1166_v1 = vpop.f32.mrf.mxu1  ;;  %6874 = vmatpush3.msra.mxu0 %v6872_v54  ;;  %6895 = vmatpush3.msra.mxu1 %v6872_v54 }
 0x33f   : > { %6875 = vmatprep.subr.mxu0 %v1166_v1  ;;  %6896 = vmatprep.subr.mxu1 %v1166_v1 }
 0x340   : > { %6876 = vmatpush3.msra.mxu0 %v1166_v1  ;;  %6897 = vmatpush3.msra.mxu1 %v1166_v1 }
 0x341   : > { %6877 = vmatprep.subr.mxu0 %v6869_v50  ;;  %6898 = vmatprep.subr.mxu1 %v6869_v50 }
 0x342   : > { %6878 = vmatpush3.msra.mxu0 %v6869_v50  ;;  %6899 = vmatpush3.msra.mxu1 %v6869_v50 }
 0x343   : > { %6879 = vmatprep.subr.mxu0 %v1156_v55  ;;  %6900 = vmatprep.subr.mxu1 %v1156_v55 }
 0x344   : > { %6880 = vmatpush3.msra.mxu0 %v1156_v55  ;;  %6901 = vmatpush3.msra.mxu1 %v1156_v55 }
 0x345   : > { %6881 = vmatprep.subr.mxu0 %v6866_v43  ;;  %6902 = vmatprep.subr.mxu1 %v6866_v43 }
 0x346   : > { %6882 = vmatpush3.msra.mxu0 %v6866_v43  ;;  %6903 = vmatpush3.msra.mxu1 %v6866_v43 }
 0x347   : > { %6883 = vmatprep.subr.mxu0 %v1146_v48  ;;  %6904 = vmatprep.subr.mxu1 %v1146_v48 }
 0x348   : > { %6884 = vmatpush3.msra.mxu0 %v1146_v48  ;;  %6905 = vmatpush3.msra.mxu1 %v1146_v48 }
 0x349   : > { %6886 = vmatmul.mubr.msk.f32.vlgmr.msra.gmra.mxu0 %vm613_vm0, %v8703_v26  ;;  %6907 = vmatmul.mubr.msk.f32.vlgmr.msra.gmra.mxu1 %vm613_vm0, %v6866_v43  ;;  %v8740_v43 = vpop.f32.mrf.mxu0 }
 0x34a   : > { %6888 = vmatprep.mubr.msk.f32.mxu0 %vm613_vm0, %v1058_v28  ;;  %6909 = vmatprep.mubr.msk.f32.mxu1 %vm613_vm0, %v1156_v55 }
 0x34b   : > { %v8742_v48 = vpop.f32.mrf.mxu0 }
 0x34d   : > { %6889 = vmatmul.mubr.msk.f32.gmra.mxu0 %vm613_vm0, %v1059_v32  ;;  %6910 = vmatmul.mubr.msk.f32.gmra.mxu1 %vm613_vm0, %v6869_v50  ;;  %v8744_v50 = vpop.f32.mrf.mxu0 }
 0x34e   : > { %6891 = vmatprep.mubr.msk.f32.mxu0 %vm613_vm0, %v1060_v18  ;;  %6912 = vmatprep.mubr.msk.f32.mxu1 %vm613_vm0, %v1166_v1 }
 0x351   : > { %6892 = vmatmul.mubr.msk.f32.gmra.mxu0 %vm613_vm0, %v1061_v2  ;;  %6913 = vmatmul.mubr.msk.f32.gmra.mxu1 %vm613_vm0, %v6872_v54 }
 0x409   : > { %v6887_v55 = vpop.f32.mrf.mxu0  ;;  %v6908_v1 = vpop.f32.mrf.mxu1 }
 0x40b   : > { %v1259_v3 = vpop.f32.mrf.mxu0  ;;  %v1378_v5 = vpop.f32.mrf.mxu1 }
 0x40c   : > { %v1288_v22 = vadd.f32 %v1259_v3, %v8635_v56  ;;  %6948 = vmatprep.mubr.msk.f32.mxu1 %vm613_vm0, %v1378_v5  ;;  %v1289_v56 = vadd.f32 %v6887_v55, %v8703_v26 }
 0x40d   : > { %v6911_v54 = vpop.f32.mrf.mxu1  ;;  %v6890_v9 = vpop.f32.mrf.mxu0 }
 0x40e   : > { %6927 = vmatprep.mubr.msk.f32.mxu0 %vm613_vm0, %v1288_v22  ;;  %v1291_v34 = vadd.f32 %v6890_v9, %v1059_v32 }
 0x40f   : > { %v1388_v31 = vpop.f32.mrf.mxu1  ;;  %v1269_v38 = vpop.f32.mrf.mxu0 }
 0x410   : > { %v1290_v37 = vadd.f32 %v1269_v38, %v1058_v28 }
 0x411   : > { %v6914_v53 = vpop.f32.mrf.mxu1  ;;  %v6893_v3 = vpop.f32.mrf.mxu0 }
 0x412   : > { %6915 = vmatprep.subr.mxu0 %v6914_v53  ;;  %6936 = vmatprep.subr.mxu1 %v6914_v53  ;;  %v1293_v38 = vadd.f32 %v6893_v3, %v1061_v2 }
 0x413   : > { %v1398_v61 = vpop.f32.mrf.mxu1  ;;  %6916 = vmatpush3.msra.mxu0 %v6914_v53  ;;  %6937 = vmatpush3.msra.mxu1 %v6914_v53  ;;  %v1279_v36 = vpop.f32.mrf.mxu0 }
 0x414   : > { %6917 = vmatprep.subr.mxu0 %v1398_v61  ;;  %6938 = vmatprep.subr.mxu1 %v1398_v61  ;;  %v1292_v33 = vadd.f32 %v1279_v36, %v1060_v18 }
 0x415   : > { %6918 = vmatpush3.msra.mxu0 %v1398_v61  ;;  %6939 = vmatpush3.msra.mxu1 %v1398_v61 }
 0x416   : > { %6919 = vmatprep.subr.mxu0 %v6911_v54  ;;  %6940 = vmatprep.subr.mxu1 %v6911_v54 }
 0x417   : > { %6920 = vmatpush3.msra.mxu0 %v6911_v54  ;;  %6941 = vmatpush3.msra.mxu1 %v6911_v54 }
 0x418   : > { %6921 = vmatprep.subr.mxu0 %v1388_v31  ;;  %6942 = vmatprep.subr.mxu1 %v1388_v31 }
 0x419   : > { %6922 = vmatpush3.msra.mxu0 %v1388_v31  ;;  %6943 = vmatpush3.msra.mxu1 %v1388_v31 }
 0x41a   : > { %6923 = vmatprep.subr.mxu0 %v6908_v1  ;;  %6944 = vmatprep.subr.mxu1 %v6908_v1 }
 0x41b   : > { %6924 = vmatpush3.msra.mxu0 %v6908_v1  ;;  %6945 = vmatpush3.msra.mxu1 %v6908_v1 }
 0x41c   : > { %6925 = vmatprep.subr.mxu0 %v1378_v5  ;;  %6946 = vmatprep.subr.mxu1 %v1378_v5 }
 0x41d   : > { %6926 = vmatpush3.msra.mxu0 %v1378_v5  ;;  %6947 = vmatpush3.msra.mxu1 %v1378_v5 }
 0x41e   : > { %6928 = vmatmul.mubr.msk.f32.vlgmr.msra.gmra.mxu0 %vm613_vm0, %v1289_v56  ;;  %6949 = vmatmul.mubr.msk.f32.vlgmr.msra.gmra.mxu1 %vm613_vm0, %v6908_v1 }
 0x41f   : > { %6930 = vmatprep.mubr.msk.f32.mxu0 %vm613_vm0, %v1290_v37  ;;  %6951 = vmatprep.mubr.msk.f32.mxu1 %vm613_vm0, %v1388_v31 }
 0x422   : > { %6931 = vmatmul.mubr.msk.f32.gmra.mxu0 %vm613_vm0, %v1291_v34  ;;  %6952 = vmatmul.mubr.msk.f32.gmra.mxu1 %vm613_vm0, %v6911_v54 }
 0x423   : > { %6933 = vmatprep.mubr.msk.f32.mxu0 %vm613_vm0, %v1292_v33  ;;  %6954 = vmatprep.mubr.msk.f32.mxu1 %vm613_vm0, %v1398_v61 }
 0x426   : > { %6934 = vmatmul.mubr.msk.f32.gmra.mxu0 %vm613_vm0, %v1293_v38  ;;  %6955 = vmatmul.mubr.msk.f32.gmra.mxu1 %vm613_vm0, %v6914_v53 }
 0x4de   : > { %v6929_v26 = vpop.f32.mrf.mxu0  ;;  %v6950_v28 = vpop.f32.mrf.mxu1 }
 0x4df   : > { %v1521_v2 = vadd.f32 %v6929_v26, %v1289_v56 }
 0x4e0   : > { %v1491_v55 = vpop.f32.mrf.mxu0  ;;  %v1610_v1 = vpop.f32.mrf.mxu1 }
 0x4e1   : > { %v1520_v31 = vadd.f32 %v1491_v55, %v1288_v22  ;;  %6990 = vmatprep.mubr.msk.f32.mxu1 %vm613_vm0, %v1610_v1 }
 0x4e2   : > { %v6953_v36 = vpop.f32.mrf.mxu1  ;;  %v6932_v18 = vpop.f32.mrf.mxu0 }
 0x4e3   : > { %6969 = vmatprep.mubr.msk.f32.mxu0 %vm613_vm0, %v1520_v31  ;;  %v1523_v3 = vadd.f32 %v6932_v18, %v1291_v34 }
 0x4e4   : > { %v1620_v9 = vpop.f32.mrf.mxu1  ;;  %v1501_v53 = vpop.f32.mrf.mxu0 }
 0x4e5   : > { %v1522_v5 = vadd.f32 %v1501_v53, %v1290_v37  ;;  %v8780_v53 = vld [vmem:[%s8362_s17 + $0x28] sm:$0xff] }
 0x4e6   : > { %v6956_v32 = vpop.f32.mrf.mxu1  ;;  %v6935_v22 = vpop.f32.mrf.mxu0 }
 0x4e7   : > { %6957 = vmatprep.subr.mxu0 %v6956_v32  ;;  %6978 = vmatprep.subr.mxu1 %v6956_v32  ;;  %v1525_v37 = vadd.f32 %v6935_v22, %v1293_v38 }
 0x4e8   : > { %v1630_v61 = vpop.f32.mrf.mxu1  ;;  %6958 = vmatpush3.msra.mxu0 %v6956_v32  ;;  %6979 = vmatpush3.msra.mxu1 %v6956_v32  ;;  %v1511_v54 = vpop.f32.mrf.mxu0 }
 0x4e9   : > { %6959 = vmatprep.subr.mxu0 %v1630_v61  ;;  %6980 = vmatprep.subr.mxu1 %v1630_v61  ;;  %v1524_v55 = vadd.f32 %v1511_v54, %v1292_v33  ;;  %v8788_v54 = vld [vmem:[%s8362_s17 + $0x20] sm:$0xff] }
 0x4ea   : > { %6960 = vmatpush3.msra.mxu0 %v1630_v61  ;;  %6981 = vmatpush3.msra.mxu1 %v1630_v61 }
 0x4eb   : > { %6961 = vmatprep.subr.mxu0 %v6953_v36  ;;  %6982 = vmatprep.subr.mxu1 %v6953_v36 }
 0x4ec   : > { %6962 = vmatpush3.msra.mxu0 %v6953_v36  ;;  %6983 = vmatpush3.msra.mxu1 %v6953_v36 }
 0x4ed   : > { %6963 = vmatprep.subr.mxu0 %v1620_v9  ;;  %6984 = vmatprep.subr.mxu1 %v1620_v9 }
 0x4ee   : > { %6964 = vmatpush3.msra.mxu0 %v1620_v9  ;;  %6985 = vmatpush3.msra.mxu1 %v1620_v9 }
 0x4ef   : > { %6965 = vmatprep.subr.mxu0 %v6950_v28  ;;  %6986 = vmatprep.subr.mxu1 %v6950_v28 }
 0x4f0   : > { %6966 = vmatpush3.msra.mxu0 %v6950_v28  ;;  %6987 = vmatpush3.msra.mxu1 %v6950_v28 }
 0x4f1   : > { %6967 = vmatprep.subr.mxu0 %v1610_v1  ;;  %6988 = vmatprep.subr.mxu1 %v1610_v1 }
 0x4f2   : > { %6968 = vmatpush3.msra.mxu0 %v1610_v1  ;;  %6989 = vmatpush3.msra.mxu1 %v1610_v1 }
 0x4f3   : > { %6970 = vmatmul.mubr.msk.f32.vlgmr.msra.gmra.mxu0 %vm613_vm0, %v1521_v2  ;;  %6991 = vmatmul.mubr.msk.f32.vlgmr.msra.gmra.mxu1 %vm613_vm0, %v6950_v28 }
 0x4f4   : > { %6972 = vmatprep.mubr.msk.f32.mxu0 %vm613_vm0, %v1522_v5  ;;  %6993 = vmatprep.mubr.msk.f32.mxu1 %vm613_vm0, %v1620_v9 }
 0x4f7   : > { %6973 = vmatmul.mubr.msk.f32.gmra.mxu0 %vm613_vm0, %v1523_v3  ;;  %6994 = vmatmul.mubr.msk.f32.gmra.mxu1 %vm613_vm0, %v6953_v36 }
 0x4f8   : > { %6975 = vmatprep.mubr.msk.f32.mxu0 %vm613_vm0, %v1524_v55  ;;  %6996 = vmatprep.mubr.msk.f32.mxu1 %vm613_vm0, %v1630_v61 }
 0x4fb   : > { %6976 = vmatmul.mubr.msk.f32.gmra.mxu0 %vm613_vm0, %v1525_v37  ;;  %6997 = vmatmul.mubr.msk.f32.gmra.mxu1 %vm613_vm0, %v6956_v32 }
 0x5b3   : > { %v6971_v56 = vpop.f32.mrf.mxu0  ;;  %v6992_v26 = vpop.f32.mrf.mxu1 }
 0x5b4   : > { %v8777_v61 = vadd.f32 %v6971_v56, %v1521_v2 }
 0x5b5   : > { %v1723_v28 = vpop.f32.mrf.mxu0  ;;  %v1842_v1 = vpop.f32.mrf.mxu1 }
 0x5b6   : > { %v8772_v9 = vadd.f32 %v1723_v28, %v1520_v31  ;;  %7032 = vmatprep.mubr.msk.f32.mxu1 %vm613_vm0, %v1842_v1 }
 0x5b7   : > { %v6995_v33 = vpop.f32.mrf.mxu1  ;;  %v6974_v38 = vpop.f32.mrf.mxu0 }
 0x5b8   : > { %7011 = vmatprep.mubr.msk.f32.mxu0 %vm613_vm0, %v8772_v9  ;;  %v8793_v2 = vadd.f32 %v6974_v38, %v1523_v3  ;;  %v8809_v3 = vld [vmem:[%s8362_s17 + $0x10] sm:$0xff] }
 0x5b9   : > { %v1852_v34 = vpop.f32.mrf.mxu1  ;;  %v1733_v31 = vpop.f32.mrf.mxu0 }
 0x5ba   : > { %v8782_v22 = vadd.f32 %v1733_v31, %v1522_v5  ;;  %v8798_v5 = vld [vmem:[%s8362_s17 + $0x18] sm:$0xff] }
 0x5bb   : > { %v6998_v36 = vpop.f32.mrf.mxu1  ;;  %v6977_v32 = vpop.f32.mrf.mxu0 }
 0x5bc   : > { %6999 = vmatprep.subr.mxu0 %v6998_v36  ;;  %7020 = vmatprep.subr.mxu1 %v6998_v36 }
 0x5bd   : > { %v1862_v18 = vpop.f32.mrf.mxu1  ;;  %7000 = vmatpush3.msra.mxu0 %v6998_v36  ;;  %7021 = vmatpush3.msra.mxu1 %v6998_v36  ;;  %v1743_v28 = vpop.f32.mrf.mxu0 }
 0x5be   : > { %7001 = vmatprep.subr.mxu0 %v1862_v18  ;;  %7022 = vmatprep.subr.mxu1 %v1862_v18  ;;  %v8801_v56 = vadd.f32 %v1743_v28, %v1524_v55  ;;  %v8818_v55 = vld [vmem:[%s8362_s17 + $0x8] sm:$0xff] }
 0x5bf   : > { %7002 = vmatpush3.msra.mxu0 %v1862_v18  ;;  %7023 = vmatpush3.msra.mxu1 %v1862_v18 }
 0x5c0   : > { %7003 = vmatprep.subr.mxu0 %v6995_v33  ;;  %7024 = vmatprep.subr.mxu1 %v6995_v33 }
 0x5c1   : > { %7004 = vmatpush3.msra.mxu0 %v6995_v33  ;;  %7025 = vmatpush3.msra.mxu1 %v6995_v33 }
 0x5c2   : > { %7005 = vmatprep.subr.mxu0 %v1852_v34  ;;  %7026 = vmatprep.subr.mxu1 %v1852_v34 }
 0x5c3   : > { %7006 = vmatpush3.msra.mxu0 %v1852_v34  ;;  %7027 = vmatpush3.msra.mxu1 %v1852_v34 }
 0x5c4   : > { %7007 = vmatprep.subr.mxu0 %v6992_v26  ;;  %7028 = vmatprep.subr.mxu1 %v6992_v26 }
 0x5c5   : > { %7008 = vmatpush3.msra.mxu0 %v6992_v26  ;;  %7029 = vmatpush3.msra.mxu1 %v6992_v26 }
 0x5c6   : > { %7009 = vmatprep.subr.mxu0 %v1842_v1  ;;  %7030 = vmatprep.subr.mxu1 %v1842_v1 }
 0x5c7   : > { %7010 = vmatpush3.msra.mxu0 %v1842_v1  ;;  %7031 = vmatpush3.msra.mxu1 %v1842_v1  ;;  %v1050_v1 = vmul.f32 %v8625_v49, %v8736_v10  ;;  %v1052_v10 = vmul.f32 %v8664_v12, %v8740_v43 }
 0x5c8   : > { %7012 = vmatmul.mubr.msk.f32.vlgmr.msra.gmra.mxu0 %vm613_vm0, %v8777_v61  ;;  %7033 = vmatmul.mubr.msk.f32.vlgmr.msra.gmra.mxu1 %vm613_vm0, %v6992_v26  ;;  %v8811_v26 = vadd.f32 %v6977_v32, %v1525_v37  ;;  %v8827_v37 = vld [vmem:[%s8362_s17] sm:$0xff] }
 0x5c9   : > { %7062 = vmatprep.subr.mxu1 %v8780_v53  ;;  %7014 = vmatprep.mubr.msk.f32.mxu0 %vm613_vm0, %v8782_v22 }
 0x5ca   : > { %7035 = vmatprep.mubr.msk.f32.mxu1 %vm613_vm0, %v1852_v34  ;;  %7063 = vmatpush3.msra.mxu1 %v8780_v53  ;;  %v1053_v34 = vmul.f32 %v8738_v16, %v8655_v8 }
 0x5cb   : > { %7064 = vmatprep.subr.mxu1 %v8788_v54 }
 0x5cc   : > { %7065 = vmatpush3.msra.mxu1 %v8788_v54  ;;  %7015 = vmatmul.mubr.msk.f32.gmra.mxu0 %vm613_vm0, %v8793_v2 }
 0x5cd   : > { %7036 = vmatmul.mubr.msk.f32.gmra.mxu1 %vm613_vm0, %v6995_v33  ;;  %7066 = vmatprep.subr.mxu1 %v8798_v5  ;;  %v1051_v33 = vmul.f32 %v8734_v35, %v8672_v17  ;;  %v1055_v35 = vmul.f32 %v8742_v48, %v8640_v60 }
 0x5ce   : > { %7017 = vmatprep.mubr.msk.f32.mxu0 %vm613_vm0, %v8801_v56  ;;  %7038 = vmatprep.mubr.msk.f32.mxu1 %vm613_vm0, %v1862_v18 }
 0x5cf   : > { %7067 = vmatpush3.msra.mxu1 %v8798_v5 }
 0x5d0   : > { %7068 = vmatprep.subr.mxu1 %v8809_v3  ;;  %7018 = vmatmul.mubr.msk.f32.gmra.mxu0 %vm613_vm0, %v8811_v26 }
 0x5d1   : > { %7069 = vmatpush3.msra.mxu1 %v8809_v3 }
 0x5d2   : > { %7039 = vmatmul.mubr.msk.f32.gmra.mxu1 %vm613_vm0, %v6998_v36  ;;  %7070 = vmatprep.subr.mxu1 %v8818_v55  ;;  %v1054_v36 = vmul.f32 %v8647_v62, %v8744_v50 }
 0x5d3   : > { %7071 = vmatpush3.msra.mxu1 %v8818_v55  ;;  %7074 = vmatprep.mubr.msk.f32.mxu1 %vm613_vm0, %v1050_v1 }
 0x5d4   : > { %7072 = vmatprep.subr.mxu1 %v8827_v37 }
 0x5d5   : > { %7073 = vmatpush3.msra.mxu1 %v8827_v37 }
 0x5d6   : > { %7075 = vmatmul.mubr.msk.f32.vlgmr.msra.gmra.mxu1 %vm613_vm0, %v1051_v33 }
 0x5d7   : > { %7077 = vmatprep.mubr.msk.f32.mxu1 %vm613_vm0, %v1052_v10 }
 0x5da   : > { %7078 = vmatmul.mubr.msk.f32.gmra.mxu1 %vm613_vm0, %v1053_v34  ;;  %v727_v34 = vmul.f32 1.442695, %v8466_v40 }
 0x5db   : > { %7080 = vmatprep.mubr.msk.f32.mxu1 %vm613_vm0, %v1054_v36 }
 0x5dc   : > { %7774 = vpow2.f32 %v727_v34 }
 0x5de   : > { %7081 = vmatmul.mubr.msk.f32.gmra.mxu1 %vm613_vm0, %v1055_v35 }
 0x688   : > { %v7013_v43 = vpop.f32.mrf.mxu0  ;;  %v7034_v38 = vpop.f32.mrf.mxu1 }
 0x68a   : > { %v1955_v18 = vpop.f32.mrf.mxu0  ;;  %v2074_v31 = vpop.f32.mrf.mxu1 }
 0x68b   : > { %v8851_v32 = vadd.f32 %v1955_v18, %v8772_v9  ;;  %v8856_v9 = vadd.f32 %v7013_v43, %v8777_v61  ;;  %v9822_v18 = vmov 0.0  }
 0x68c   : > { %v7016_v1 = vpop.f32.mrf.mxu0 }
 0x68d   : > { %v7037_v16 = vpop.f32.mrf.mxu1  ;;  %7053 = vmatprep.mubr.msk.f32.mxu0 %vm613_vm0, %v8851_v32  ;;  %v8869_v61 = vadd.f32 %v7016_v1, %v8793_v2  ;;  %v729_v2 = vmul.f32 1.442695, %v8464_v39  ;;  %v733_v39 = vmul.f32 1.442695, %v8470_v42  ;;  %v737_v42 = vmul.f32 1.442695, %v8474_v45 }
 0x68e   : > { %v1965_v48 = vpop.f32.mrf.mxu0 }
 0x68f   : > { %v2084_v50 = vpop.f32.mrf.mxu1  ;;  %v8860_v36 = vadd.f32 %v1965_v48, %v8782_v22  ;;  %7776 = vpow2.f32 %v729_v2 }
 0x690   : > { %v7019_v10 = vpop.f32.mrf.mxu0 }
 0x691   : > { %v8881_v22 = vadd.f32 %v7019_v10, %v8811_v26  ;;  %v7775_v26 = vpop.eup %7774 }
 0x692   : > { %v7040_v28 = vpop.f32.mrf.mxu1  ;;  %v1975_v35 = vpop.f32.mrf.mxu0 }
 0x693   : > { %7041 = vmatprep.subr.mxu0 %v7040_v28  ;;  %v8874_v40 = vadd.f32 %v1975_v35, %v8801_v56  ;;  %v731_v56 = vmul.f32 1.442695, %v8472_v44  ;;  %v735_v44 = vmul.f32 1.442695, %v8477_v47  ;;  %v8931_v47 = vld [vmem:[%s8346_s15 + $0x8] sm:$0xff] }
 0x694   : > { %v2094_v33 = vpop.f32.mrf.mxu1  ;;  %7042 = vmatpush3.msra.mxu0 %v7040_v28 }
 0x695   : > { %7043 = vmatprep.subr.mxu0 %v2094_v33  ;;  %7778 = vpow2.f32 %v731_v56 }
 0x696   : > { %7044 = vmatpush3.msra.mxu0 %v2094_v33  ;;  %7780 = vpow2.f32 %v733_v39 }
 0x697   : > { %7045 = vmatprep.subr.mxu0 %v7037_v16  ;;  %7782 = vpow2.f32 %v735_v44 }
 0x698   : > { %7046 = vmatpush3.msra.mxu0 %v7037_v16  ;;  %7784 = vpow2.f32 %v737_v42 }
 0x699   : > { %7047 = vmatprep.subr.mxu0 %v2084_v50 }
 0x69a   : > { %7048 = vmatpush3.msra.mxu0 %v2084_v50 }
 0x69b   : > { %7049 = vmatprep.subr.mxu0 %v7034_v38 }
 0x69c   : > { %7050 = vmatpush3.msra.mxu0 %v7034_v38  ;;  %v7777_v45 = vpop.eup %7776  ;;  %v8967_v38 = vld [vmem:[%s8346_s15 + $0x28] sm:$0xff] }
 0x69d   : > { %7051 = vmatprep.subr.mxu0 %v2074_v31 }
 0x69e   : > { %7052 = vmatpush3.msra.mxu0 %v2074_v31 }
 0x69f   : > { %7054 = vmatmul.mubr.msk.f32.vlgmr.msra.gmra.mxu0 %vm613_vm0, %v8856_v9  ;;  %7083 = vmatprep.subr.mxu0 %v9822_v18 }
 0x6a0   : > { %7056 = vmatprep.mubr.msk.f32.mxu0 %vm613_vm0, %v8860_v36  ;;  %7084 = vmatpush3.xpose.msra.mxu0 %v9822_v18 }
 0x6a1   : > { %7115 = vmatprep.subr.msk.mxu0 %vm799_vm7, %v8497_v7 }
 0x6a3   : > { %7057 = vmatmul.mubr.msk.f32.gmra.mxu0 %vm613_vm0, %v8869_v61 }
 0x6a4   : > { %7059 = vmatprep.mubr.msk.f32.mxu0 %vm613_vm0, %v8874_v40 }
 0x6a7   : > { %7060 = vmatmul.mubr.msk.f32.gmra.mxu0 %vm613_vm0, %v8881_v22 }
 0x6a8   : > { %7085 = vmatprep.mubr.msk.f32.mxu0 %vm799_vm7, %v8484_v58  ;;  %v8900_v58 = vld [vmem:[%s8346_s15] sm:$0xff] }
 0x6ab   : > { %7086 = vmatmul.mubr.msk.f32.vlgmr.msra.gmra.mxu0 %vm799_vm7, %v8587_v11 }
 0x6ac   : > { %7116 = vmatpush3.xpose.msk.msra.mxu0 %vm799_vm7, %v8497_v7  ;;  %7088 = vmatprep.mubr.msk.f32.mxu0 %vm799_vm7, %v8589_v15  ;;  %v8911_v7 = vmul.f32 %v7775_v26, %v8900_v58  ;;  %v8947_v15 = vld [vmem:[%s8346_s15 + $0x18] sm:$0xff] }
 0x6ad   : > { %7117 = vmatprep.subr.msk.mxu0 %vm799_vm7, %v8513_v14 }
 0x6af   : > { %7089 = vmatmul.mubr.msk.f32.gmra.mxu0 %vm799_vm7, %v8601_v20 }
 0x6b0   : > { %7118 = vmatpush3.xpose.msk.msra.mxu0 %vm799_vm7, %v8513_v14  ;;  %7091 = vmatprep.mubr.msk.f32.mxu0 %vm799_vm7, %v8603_v41  ;;  %v7779_v14 = vpop.eup %7778  ;;  %v8952_v41 = vld [vmem:[%s8346_s15 + $0x20] sm:$0xff] }
 0x6b1   : > { %7119 = vmatprep.subr.msk.mxu0 %vm799_vm7, %v8527_v27 }
 0x6b3   : > { %7092 = vmatmul.mubr.msk.f32.gmra.mxu0 %vm799_vm7, %v8614_v46 }
 0x6b4   : > { %7120 = vmatpush3.xpose.msk.msra.mxu0 %vm799_vm7, %v8527_v27  ;;  %7127 = vmatprep.mubr.msk.f32.mxu0 %vm799_vm7, %v8911_v7  ;;  %v8934_v27 = vld [vmem:[%s8346_s15 + $0x10] sm:$0xff] }
 0x6b5   : > { %7121 = vmatprep.subr.msk.mxu0 %vm799_vm7, %v8543_v52  ;;  %v8944_v11 = vmul.f32 %v7779_v14, %v8934_v27 }
 0x6b8   : > { %7122 = vmatpush3.xpose.msk.msra.mxu0 %vm799_vm7, %v8543_v52  ;;  %v8941_v52 = vmul.f32 %v7777_v45, %v8931_v47 }
 0x6b9   : > { %7123 = vmatprep.subr.msk.mxu0 %vm799_vm7, %v8557_v59 }
 0x6bc   : > { %7124 = vmatpush3.xpose.msk.msra.mxu0 %vm799_vm7, %v8557_v59  ;;  %v7781_v59 = vpop.eup %7780 }
 0x6bd   : > { %7125 = vmatprep.subr.msk.mxu0 %vm799_vm7, %v8571_v0  ;;  %v7783_v20 = vpop.eup %7782 }
 0x6be   : > { %v7785_v46 = vpop.eup %7784  ;;  %v8964_v43 = vmul.f32 %v7783_v20, %v8952_v41 }
 0x6c0   : > { %7126 = vmatpush3.xpose.msk.msra.mxu0 %vm799_vm7, %v8571_v0  ;;  %v8961_v0 = vmul.f32 %v7781_v59, %v8947_v15 }
 0x6c1   : > { %7168 = vmatprep.subr.msk.mxu0 %vm799_vm7, %v8495_v6 }
 0x6c3   : > { %7128 = vmatmul.mubr.msk.f32.vlgmr.msra.gmra.mxu0 %vm799_vm7, %v8941_v52 }
 0x6c4   : > { %7130 = vmatprep.mubr.msk.f32.mxu0 %vm799_vm7, %v8944_v11  ;;  %7169 = vmatpush3.xpose.msk.msra.mxu0 %vm799_vm7, %v8495_v6  ;;  %v8978_v6 = vmul.f32 %v7785_v46, %v8967_v38  ;;  %v9823_v46 = vld [vmem:[#allocation26_spill] sm:$0xff] }
 0x6c5   : > { %7170 = vmatprep.subr.msk.mxu0 %vm799_vm7, %v8511_v13 }
 0x6c7   : > { %7131 = vmatmul.mubr.msk.f32.gmra.mxu0 %vm799_vm7, %v8961_v0 }
 0x6c8   : > { %7133 = vmatprep.mubr.msk.f32.mxu0 %vm799_vm7, %v8964_v43  ;;  %7171 = vmatpush3.xpose.msk.msra.mxu0 %vm799_vm7, %v8511_v13 }
 0x6c9   : > { %7172 = vmatprep.subr.msk.mxu0 %vm799_vm7, %v8525_v24 }
 0x6cb   : > { %7134 = vmatmul.mubr.msk.f32.gmra.mxu0 %vm799_vm7, %v8978_v6 }
 0x6cc   : > { %7173 = vmatpush3.xpose.msk.msra.mxu0 %vm799_vm7, %v8525_v24  ;;  %7180 = vmatprep.mubr.msk.f32.mxu0 %vm799_vm7, %v8911_v7  ;;  %v7076_v24 = vpop.f32.mrf.mxu1 }
 0x6cd   : > { %7174 = vmatprep.subr.msk.mxu0 %vm799_vm7, %v8541_v51 }
 0x6ce   : > { %v2306_v23 = vpop.f32.mrf.mxu1 }
 0x6d0   : > { %7175 = vmatpush3.xpose.msk.msra.mxu0 %vm799_vm7, %v8541_v51  ;;  %v7079_v31 = vpop.f32.mrf.mxu1 }
 0x6d1   : > { %7176 = vmatprep.subr.msk.mxu0 %vm799_vm7, %v8555_v57 }
 0x6d2   : > { %v2316_v50 = vpop.f32.mrf.mxu1 }
 0x6d4   : > { %7177 = vmatpush3.xpose.msk.msra.mxu0 %vm799_vm7, %v8555_v57  ;;  %v7082_v1 = vpop.f32.mrf.mxu1 }
 0x6d5   : > { %7178 = vmatprep.subr.msk.mxu0 %vm799_vm7, %v8569_v63 }
 0x6d6   : > { %v2326_v10 = vpop.f32.mrf.mxu1 }
 0x6d8   : > { %7179 = vmatpush3.xpose.msk.msra.mxu0 %vm799_vm7, %v8569_v63 }
 0x6db   : > { %7181 = vmatmul.mubr.msk.f32.vlgmr.msra.gmra.mxu0 %vm799_vm7, %v8941_v52 }
 0x6dc   : > { %7183 = vmatprep.mubr.msk.f32.mxu0 %vm799_vm7, %v8944_v11 }
 0x6df   : > { %7184 = vmatmul.mubr.msk.f32.gmra.mxu0 %vm799_vm7, %v8961_v0 }
 0x6e0   : > { %7186 = vmatprep.mubr.msk.f32.mxu0 %vm799_vm7, %v8964_v43 }
 0x6e3   : > { %7187 = vmatmul.mubr.msk.f32.gmra.mxu0 %vm799_vm7, %v8978_v6 }
 0x75f   : > { %v7055_v13 = vpop.f32.mrf.mxu0 }
 0x760   : > { %v2217_v39 = vadd.f32 %v7055_v13, %v8856_v9 }
 0x761   : > { %v2187_v51 = vpop.f32.mrf.mxu0 }
 0x762   : > { %v2216_v19 = vadd.f32 %v2187_v51, %v8851_v32 }
 0x763   : > { %v7058_v57 = vpop.f32.mrf.mxu0 }
 0x764   : > { %7106 = vmatprep.mubr.msk.f32.mxu1 %vm613_vm0, %v2216_v19  ;;  %v2219_v45 = vadd.f32 %v7058_v57, %v8869_v61  ;;  %v9825_v19 = vld [vmem:[#allocation28_spill] sm:$0xff] }
 0x765   : > { %v2197_v63 = vpop.f32.mrf.mxu0 }
 0x766   : > { %v2218_v44 = vadd.f32 %v2197_v63, %v8860_v36 }
 0x767   : > { %v7061_v21 = vpop.f32.mrf.mxu0 }
 0x768   : > { %v2221_v59 = vadd.f32 %v7061_v21, %v8881_v22  ;;  %v9824_v22 = vld [vmem:[#allocation27_spill] sm:$0xff]  ;;  %v9827_v21 = vld [vmem:[#allocation30_spill] sm:$0xff] }
 0x769   : > { %v2207_v16 = vpop.f32.mrf.mxu0 }
 0x76a   : > { %v2220_v14 = vadd.f32 %v2207_v16, %v8874_v40 }
 0x76b   : > { %v7087_v25 = vpop.f32.mrf.mxu0 }
 0x76c   : > { %v2410_v56 = vadd.f32 %v7087_v25, %v7076_v24 }
 0x76d   : > { %v2404_v28 = vpop.f32.mrf.mxu0 }
 0x76e   : > { %v2405_v26 = vadd.f32 %v2404_v28, %v2306_v23  ;;  %v9826_v23 = vld [vmem:[#allocation29_spill] sm:$0xff] }
 0x76f   : > { %v7090_v29 = vpop.f32.mrf.mxu0 }
 0x770   : > { %v2420_v32 = vadd.f32 %v7090_v29, %v7079_v31 }
 0x771   : > { %v2414_v33 = vpop.f32.mrf.mxu0 }
 0x772   : > { %v2415_v2 = vadd.f32 %v2414_v33, %v2316_v50 }
 0x773   : > { %v7093_v30 = vpop.f32.mrf.mxu0 }
 0x774   : > { %v2430_v48 = vadd.f32 %v7093_v30, %v7082_v1 }
 0x775   : > { %v2424_v34 = vpop.f32.mrf.mxu0 }
 0x776   : > { %v2425_v35 = vadd.f32 %v2424_v34, %v2326_v10  ;;  %7094 = vmatprep.subr.mxu1 %v2430_v48  ;;  %v9074_v10 = vpop.permute.xlu1 %3105 }
 0x777   : > { %7095 = vmatpush3.msra.mxu1 %v2430_v48  ;;  %v9072_v48 = vpop.permute.xlu0 %3109 }
 0x778   : > { %7096 = vmatprep.subr.mxu1 %v2425_v35 }
 0x779   : > { %7097 = vmatpush3.msra.mxu1 %v2425_v35 }
 0x77a   : > { %7098 = vmatprep.subr.mxu1 %v2420_v32 }
 0x77b   : > { %7099 = vmatpush3.msra.mxu1 %v2420_v32 }
 0x77c   : > { %7100 = vmatprep.subr.mxu1 %v2415_v2 }
 0x77d   : > { %7101 = vmatpush3.msra.mxu1 %v2415_v2 }
 0x77e   : > { %7102 = vmatprep.subr.mxu1 %v2410_v56 }
 0x77f   : > { %7103 = vmatpush3.msra.mxu1 %v2410_v56 }
 0x780   : > { %7104 = vmatprep.subr.mxu1 %v2405_v26 }
 0x781   : > { %7105 = vmatpush3.msra.mxu1 %v2405_v26  ;;  %v9078_v26 = vpop.permute.xlu0 %3107 }
 0x782   : > { %7107 = vmatmul.mubr.msk.f32.vlgmr.msra.gmra.mxu1 %vm613_vm0, %v2217_v39  ;;  %7136 = vmatprep.subr.mxu1 %v8780_v53 }
 0x783   : > { %v7129_v42 = vpop.f32.mrf.mxu0  ;;  %7109 = vmatprep.mubr.msk.f32.mxu1 %vm613_vm0, %v2218_v44  ;;  %7137 = vmatpush3.msra.mxu1 %v8780_v53 }
 0x784   : > { %7138 = vmatprep.subr.mxu1 %v8788_v54  ;;  %v2660_v13 = vmul.f32 %v7129_v42, %v9823_v46  ;;  %v9084_v42 = vpop.permute.xlu1 %3103 }
 0x785   : > { %v2630_v9 = vpop.f32.mrf.mxu0  ;;  %7139 = vmatpush3.msra.mxu1 %v8788_v54 }
 0x786   : > { %7110 = vmatmul.mubr.msk.f32.gmra.mxu1 %vm613_vm0, %v2219_v45  ;;  %7140 = vmatprep.subr.mxu1 %v8798_v5  ;;  %v2659_v61 = vmul.f32 %v8386_v4, %v2630_v9 }
 0x787   : > { %v7132_v36 = vpop.f32.mrf.mxu0  ;;  %7112 = vmatprep.mubr.msk.f32.mxu1 %vm613_vm0, %v2220_v14  ;;  %7141 = vmatpush3.msra.mxu1 %v8798_v5 }
 0x788   : > { %7142 = vmatprep.subr.mxu1 %v8809_v3  ;;  %v2662_v57 = vmul.f32 %v7132_v36, %v9825_v19 }
 0x789   : > { %v2640_v20 = vpop.f32.mrf.mxu0  ;;  %7143 = vmatpush3.msra.mxu1 %v8809_v3 }
 0x78a   : > { %7113 = vmatmul.mubr.msk.f32.gmra.mxu1 %vm613_vm0, %v2221_v59  ;;  %7144 = vmatprep.subr.mxu1 %v8818_v55  ;;  %v2661_v24 = vmul.f32 %v9824_v22, %v2640_v20 }
 0x78b   : > { %v7135_v40 = vpop.f32.mrf.mxu0  ;;  %7145 = vmatpush3.msra.mxu1 %v8818_v55  ;;  %7148 = vmatprep.mubr.msk.f32.mxu1 %vm613_vm0, %v2659_v61  ;;  %v9094_v61 = vpop.permute.xlu0 %3101 }
 0x78c   : > { %7146 = vmatprep.subr.mxu1 %v8827_v37  ;;  %v2664_v31 = vmul.f32 %v7135_v40, %v9827_v21 }
 0x78d   : > { %7147 = vmatpush3.msra.mxu1 %v8827_v37  ;;  %v2650_v51 = vpop.f32.mrf.mxu0 }
 0x78e   : > { %7149 = vmatmul.mubr.msk.f32.vlgmr.msra.gmra.mxu1 %vm613_vm0, %v2660_v13  ;;  %7157 = vmatprep.subr.mxu1 %v9822_v18  ;;  %v2663_v63 = vmul.f32 %v9826_v23, %v2650_v51 }
 0x78f   : > { %7151 = vmatprep.mubr.msk.f32.mxu1 %vm613_vm0, %v2661_v24  ;;  %7158 = vmatpush3.xpose.msra.mxu1 %v9822_v18  ;;  %v3100_v24 = vpop.permute.xlu1 %3099 }
 0x792   : > { %7152 = vmatmul.mubr.msk.f32.gmra.mxu1 %vm613_vm0, %v2662_v57 }
 0x793   : > { %7154 = vmatprep.mubr.msk.f32.mxu1 %vm613_vm0, %v2663_v63 }
 0x796   : > { %7155 = vmatmul.mubr.msk.f32.gmra.mxu1 %vm613_vm0, %v2664_v31 }
 0x797   : > { %7159 = vmatprep.mubr.msk.f32.mxu1 %vm799_vm7, %v8911_v7 }
 0x79a   : > { %7160 = vmatmul.mubr.msk.f32.vlgmr.msra.gmra.mxu1 %vm799_vm7, %v8941_v52 }
 0x79b   : > { %v7182_v16 = vpop.f32.mrf.mxu0  ;;  %7162 = vmatprep.mubr.msk.f32.mxu1 %vm799_vm7, %v8944_v11 }
 0x79c   : > { %v2969_v32 = vmul.f32 %v7182_v16, %v9823_v46 }
 0x79d   : > { %v2939_v25 = vpop.f32.mrf.mxu0 }
 0x79e   : > { %7163 = vmatmul.mubr.msk.f32.gmra.mxu1 %vm799_vm7, %v8961_v0  ;;  %v2968_v50 = vmul.f32 %v8386_v4, %v2939_v25 }
 0x79f   : > { %7165 = vmatprep.mubr.msk.f32.mxu1 %vm799_vm7, %v8964_v43  ;;  %v7185_v11 = vpop.f32.mrf.mxu0 }
 0x7a0   : > { %v2971_v45 = vmul.f32 %v7185_v11, %v9825_v19 }
 0x7a1   : > { %v2949_v43 = vpop.f32.mrf.mxu0 }
 0x7a2   : > { %7166 = vmatmul.mubr.msk.f32.gmra.mxu1 %vm799_vm7, %v8978_v6  ;;  %v2970_v2 = vmul.f32 %v9824_v22, %v2949_v43 }
 0x7a3   : > { %7201 = vmatprep.mubr.msk.f32.mxu1 %vm613_vm0, %v2968_v50  ;;  %v7188_v34 = vpop.f32.mrf.mxu0 }
 0x7a4   : > { %v2973_v20 = vmul.f32 %v7188_v34, %v9827_v21 }
 0x7a5   : > { %v2959_v39 = vpop.f32.mrf.mxu0 }
 0x7a6   : > { %v2972_v14 = vmul.f32 %v9826_v23, %v2959_v39 }
 0x842   : > { %v7108_v7 = vpop.f32.mrf.mxu1 }
 0x844   : > { %v2517_v52 = vpop.f32.mrf.mxu1 }
 0x846   : > { %v7111_v28 = vpop.f32.mrf.mxu1 }
 0x848   : > { %v2527_v29 = vpop.f32.mrf.mxu1 }
 0x84a   : > { %v7114_v1 = vpop.f32.mrf.mxu1 }
 0x84b   : > { %7189 = vmatprep.subr.mxu1 %v7114_v1 }
 0x84c   : > { %v2537_v33 = vpop.f32.mrf.mxu1  ;;  %7190 = vmatpush3.msra.mxu1 %v7114_v1 }
 0x84d   : > { %7191 = vmatprep.subr.mxu1 %v2537_v33 }
 0x84e   : > { %v7150_v0 = vpop.f32.mrf.mxu1  ;;  %7192 = vmatpush3.msra.mxu1 %v2537_v33 }
 0x84f   : > { %7193 = vmatprep.subr.mxu1 %v7111_v28 }
 0x850   : > { %v2749_v30 = vpop.f32.mrf.mxu1  ;;  %7194 = vmatpush3.msra.mxu1 %v7111_v28 }
 0x851   : > { %7195 = vmatprep.subr.mxu1 %v2527_v29 }
 0x852   : > { %v7153_v6 = vpop.f32.mrf.mxu1  ;;  %7196 = vmatpush3.msra.mxu1 %v2527_v29 }
 0x853   : > { %7197 = vmatprep.subr.mxu1 %v7108_v7 }
 0x854   : > { %v2759_v35 = vpop.f32.mrf.mxu1  ;;  %7198 = vmatpush3.msra.mxu1 %v7108_v7 }
 0x855   : > { %7199 = vmatprep.subr.mxu1 %v2517_v52 }
 0x856   : > { %v7156_v56 = vpop.f32.mrf.mxu1  ;;  %7200 = vmatpush3.msra.mxu1 %v2517_v52 }
 0x857   : > { %7202 = vmatmul.mubr.msk.f32.vlgmr.msra.gmra.mxu1 %vm613_vm0, %v2969_v32  ;;  %7210 = vmatprep.subr.mxu1 %v9072_v48 }
 0x858   : > { %v2769_v44 = vpop.f32.mrf.mxu1  ;;  %7204 = vmatprep.mubr.msk.f32.mxu1 %vm613_vm0, %v2970_v2  ;;  %7211 = vmatpush3.msra.mxu1 %v9072_v48 }
 0x859   : > { %7212 = vmatprep.subr.mxu1 %v9078_v26 }
 0x85a   : > { %v7161_v9 = vpop.f32.mrf.mxu1  ;;  %7213 = vmatpush3.msra.mxu1 %v9078_v26 }
 0x85b   : > { %v2850_v36 = vadd.f32 %v7161_v9, %v7150_v0  ;;  %7205 = vmatmul.mubr.msk.f32.gmra.mxu1 %vm613_vm0, %v2971_v45  ;;  %7214 = vmatprep.subr.mxu1 %v9074_v10 }
 0x85c   : > { %v2844_v59 = vpop.f32.mrf.mxu1  ;;  %7207 = vmatprep.mubr.msk.f32.mxu1 %vm613_vm0, %v2972_v14  ;;  %7215 = vmatpush3.msra.mxu1 %v9074_v10 }
 0x85d   : > { %v2845_v40 = vadd.f32 %v2844_v59, %v2749_v30  ;;  %7216 = vmatprep.subr.mxu1 %v9084_v42 }
 0x85e   : > { %v7164_v13 = vpop.f32.mrf.mxu1  ;;  %7217 = vmatpush3.msra.mxu1 %v9084_v42 }
 0x85f   : > { %v2860_v51 = vadd.f32 %v7164_v13, %v7153_v6  ;;  %7208 = vmatmul.mubr.msk.f32.gmra.mxu1 %vm613_vm0, %v2973_v20  ;;  %7218 = vmatprep.subr.mxu1 %v9094_v61 }
 0x860   : > { %v2854_v57 = vpop.f32.mrf.mxu1  ;;  %7219 = vmatpush3.msra.mxu1 %v9094_v61  ;;  %7222 = vmatprep.mubr.msk.f32.mxu1 %vm613_vm0, %v8386_v4 }
 0x861   : > { %v2855_v63 = vadd.f32 %v2854_v57, %v2759_v35  ;;  %7220 = vmatprep.subr.mxu1 %v3100_v24 }
 0x862   : > { %v7167_v31 = vpop.f32.mrf.mxu1  ;;  %7221 = vmatpush3.msra.mxu1 %v3100_v24 }
 0x863   : > { %v2870_v16 = vadd.f32 %v7167_v31, %v7156_v56  ;;  %7223 = vmatmul.mubr.msk.f32.vlgmr.msra.gmra.mxu1 %vm613_vm0, %v9823_v46 }
 0x864   : > { %7225 = vmatprep.mubr.msk.f32.mxu1 %vm613_vm0, %v9824_v22  ;;  %v2864_v25 = vpop.f32.mrf.mxu1 }
 0x865   : > { %v2865_v43 = vadd.f32 %v2864_v25, %v2769_v44 }
 0x867   : > { %7226 = vmatmul.mubr.msk.f32.gmra.mxu1 %vm613_vm0, %v9825_v19 }
 0x868   : > { %7228 = vmatprep.mubr.msk.f32.mxu1 %vm613_vm0, %v9826_v23 }
 0x86b   : > { %7229 = vmatmul.mubr.msk.f32.gmra.mxu1 %vm613_vm0, %v9827_v21 }
 0x917   : > { %v7203_v50 = vpop.f32.mrf.mxu1 }
 0x918   : > { %v9114_v7 = vadd.f32 %v7203_v50, %v2850_v36 }
 0x919   : > { %v3058_v52 = vpop.f32.mrf.mxu1 }
 0x91a   : > { %9828 = vst [vmem:[#allocation26_spill] sm:$0xff] %v9114_v7  ;;  %v9116_v28 = vadd.f32 %v3058_v52, %v2845_v40 }
 0x91b   : > { %v7206_v29 = vpop.f32.mrf.mxu1 }
 0x91c   : > { %9829 = vst [vmem:[#allocation27_spill] sm:$0xff] %v9116_v28  ;;  %v9118_v1 = vadd.f32 %v7206_v29, %v2860_v51 }
 0x91d   : > { %v3068_v11 = vpop.f32.mrf.mxu1 }
 0x91e   : > { %9830 = vst [vmem:[#allocation28_spill] sm:$0xff] %v9118_v1  ;;  %v9120_v33 = vadd.f32 %v3068_v11, %v2855_v63 }
 0x91f   : > { %v7209_v0 = vpop.f32.mrf.mxu1 }
 0x920   : > { %9831 = vst [vmem:[#allocation29_spill] sm:$0xff] %v9120_v33  ;;  %v9122_v30 = vadd.f32 %v7209_v0, %v2870_v16 }
 0x921   : > { %v3078_v6 = vpop.f32.mrf.mxu1 }
 0x922   : > { %9832 = vst [vmem:[#allocation30_spill] sm:$0xff] %v9122_v30  ;;  %v9124_v34 = vadd.f32 %v3078_v6, %v2865_v43 }
 0x923   : > { %v9126_v35 = vpop.f32.mrf.mxu1 }
 0x924   : > { %9833 = vst [vmem:[#allocation37_spill] sm:$0xff] %v9124_v34  ;;  %v3243_v40 = vsub.f32 0.0, %v9126_v35  ;;  %v3225_v16 = vsub.f32 %v9126_v35, %v9094_v61 }
 0x925   : > { %v9128_v32 = vpop.f32.mrf.mxu1 }
 0x926   : > { %v3242_v51 = vsub.f32 0.0, %v9128_v32  ;;  %v3250_v63 = vmul.f32 1.442695, %v3243_v40  ;;  %v3224_v31 = vsub.f32 %v9128_v32, %v3100_v24  ;;  %v3232_v29 = vmul.f32 1.442695, %v3225_v16 }
 0x927   : > { %v9130_v2 = vpop.f32.mrf.mxu1 }
 0x928   : > { %v3245_v9 = vsub.f32 0.0, %v9130_v2  ;;  %v3248_v25 = vmul.f32 1.442695, %v3242_v51  ;;  %v3230_v50 = vmul.f32 1.442695, %v3224_v31  ;;  %v3227_v11 = vsub.f32 %v9130_v2, %v9074_v10 }
 0x929   : > { %v9132_v56 = vpop.f32.mrf.mxu1 }
 0x92a   : > { %v3244_v59 = vsub.f32 0.0, %v9132_v56  ;;  %v3254_v13 = vmul.f32 1.442695, %v3245_v9  ;;  %v3226_v52 = vsub.f32 %v9132_v56, %v9084_v42  ;;  %v3236_v61 = vmul.f32 1.442695, %v3227_v11 }
 0x92b   : > { %v9134_v39 = vpop.f32.mrf.mxu1 }
 0x92c   : > { %v3247_v45 = vsub.f32 0.0, %v9134_v39  ;;  %v3252_v57 = vmul.f32 1.442695, %v3244_v59  ;;  %v3234_v0 = vmul.f32 1.442695, %v3226_v52  ;;  %v3229_v6 = vsub.f32 %v9134_v39, %v9072_v48 }
 0x92d   : > { %v9137_v14 = vpop.f32.mrf.mxu1 }
 0x92e   : > { %v3246_v44 = vsub.f32 0.0, %v9137_v14  ;;  %v3258_v36 = vmul.f32 1.442695, %v3247_v45  ;;  %v3228_v24 = vsub.f32 %v9137_v14, %v9078_v26  ;;  %v3240_v10 = vmul.f32 1.442695, %v3229_v6  ;;  %v7826_v6 = vld [vmem:[%s8373_s20 + $0x8] sm:$0xff] }
 0x930   : > { %v3256_v20 = vmul.f32 1.442695, %v3246_v44  ;;  %7786 = vpow2.f32 %v3258_v36  ;;  %v3238_v42 = vmul.f32 1.442695, %v3228_v24  ;;  %v7825_v24 = vld [vmem:[%s8373_s20 + $0x10] sm:$0xff] }
 0x932   : > { %7788 = vpow2.f32 %v3256_v20 }
 0x933   : > { %7790 = vpow2.f32 %v3254_v13 }
 0x934   : > { %7792 = vpow2.f32 %v3252_v57 }
 0x935   : > { %7794 = vpow2.f32 %v3250_v63  ;;  %v7822_v63 = vld [vmem:[%s8373_s20 + $0x28] sm:$0xff] }
 0x936   : > { %7796 = vpow2.f32 %v3248_v25  ;;  %v7823_v25 = vld [vmem:[%s8373_s20 + $0x20] sm:$0xff] }
 0x937   : > { %7798 = vpow2.f32 %v3230_v50 }
 0x938   : > { %7800 = vpow2.f32 %v3232_v29  ;;  %v7824_v29 = vld [vmem:[%s8373_s20 + $0x18] sm:$0xff] }
 0x939   : > { %7802 = vpow2.f32 %v3234_v0 }
 0x93a   : > { %7804 = vpow2.f32 %v3236_v61 }
 0x93b   : > { %7806 = vpow2.f32 %v3238_v42 }
 0x93c   : > { %7808 = vpow2.f32 %v3240_v10 }
 0x93d   : > { %v7787_v43 = vpop.eup %7786 }
 0x93e   : > { %3336 = vrot.lane.b32.xlu0 %v7787_v43, %s8111_s9 }
 0x93f   : > { %v7789_v45 = vpop.eup %7788 }
 0x940   : > { %v7791_v44 = vpop.eup %7790  ;;  %3334 = vrot.lane.b32.xlu1 %v7789_v45, %s8111_s9 }
 0x941   : > { %v7793_v9 = vpop.eup %7792 }
 0x942   : > { %3332 = vrot.lane.b32.xlu0 %v7791_v44, %s8111_s9  ;;  %v7795_v26 = vpop.eup %7794  ;;  %v7827_v44 = vld [vmem:[%s8373_s20] sm:$0xff] }
 0x943   : > { %v7797_v48 = vpop.eup %7796 }
 0x944   : > { %3330 = vrot.lane.b32.xlu1 %v7793_v9, %s8111_s9  ;;  %v7799_v36 = vpop.eup %7798 }
 0x945   : > { %v7801_v59 = vpop.eup %7800 }
 0x946   : > { %3328 = vrot.lane.b32.xlu0 %v7795_v26, %s8111_s9  ;;  %v7803_v20 = vpop.eup %7802  ;;  %v7828_v26 = vld [vmem:[%s8369_s27] sm:$0xff] }
 0x947   : > { %v7805_v40 = vpop.eup %7804 }
 0x948   : > { %3326 = vrot.lane.b32.xlu1 %v7797_v48, %s8111_s9  ;;  %v7807_v13 = vpop.eup %7806 }
 0x949   : > { %v7809_v51 = vpop.eup %7808 }
 0x94a   : > { %3296 = vrot.lane.b32.xlu0 %v7799_v36, %s8111_s9 }
 0x94c   : > { %3298 = vrot.lane.b32.xlu1 %v7801_v59, %s8111_s9  ;;  %v7829_v59 = vld [vmem:[%s8369_s27 + $0x8] sm:$0xff] }
 0x94e   : > { %3300 = vrot.lane.b32.xlu0 %v7803_v20, %s8111_s9 }
 0x950   : > { %3302 = vrot.lane.b32.xlu1 %v7805_v40, %s8111_s9 }
 0x952   : > { %3304 = vrot.lane.b32.xlu0 %v7807_v13, %s8111_s9  ;;  %v7830_v13 = vld [vmem:[%s8369_s27 + $0x10] sm:$0xff] }
 0x954   : > { %3306 = vrot.lane.b32.xlu1 %v7809_v51, %s8111_s9 }
 0x9b0   : > { %v3337_v57 = vpop.permute.xlu0 %3336 }
 0x9b1   : > { %v3355_v31 = vmul.f32 %v7822_v63, %v3337_v57 }
 0x9b2   : > { %v3335_v16 = vpop.permute.xlu1 %3334 }
 0x9b3   : > { %3390 = vrot.lane.b32.xlu0 %v3355_v31, %s8111_s9  ;;  %v3354_v50 = vmul.f32 %v7823_v25, %v3335_v16  ;;  %v7831_v31 = vld [vmem:[%s8369_s27 + $0x18] sm:$0xff] }
 0x9b4   : > { %v3333_v52 = vpop.permute.xlu0 %3332 }
 0x9b5   : > { %v3353_v11 = vmul.f32 %v7824_v29, %v3333_v52  ;;  %3388 = vrot.lane.b32.xlu1 %v3354_v50, %s8111_s9  ;;  %v7832_v29 = vld [vmem:[%s8369_s27 + $0x20] sm:$0xff] }
 0x9b6   : > { %v3331_v0 = vpop.permute.xlu1 %3330 }
 0x9b7   : > { %3386 = vrot.lane.b32.xlu0 %v3353_v11, %s8111_s9  ;;  %v3352_v43 = vmul.f32 %v7825_v24, %v3331_v0 }
 0x9b8   : > { %v3329_v61 = vpop.permute.xlu0 %3328 }
 0x9b9   : > { %v3351_v45 = vmul.f32 %v7826_v6, %v3329_v61  ;;  %3384 = vrot.lane.b32.xlu1 %v3352_v43, %s8111_s9  ;;  %v7833_v43 = vld [vmem:[%s8369_s27 + $0x28] sm:$0xff] }
 0x9ba   : > { %v3327_v42 = vpop.permute.xlu1 %3326 }
 0x9bb   : > { %3382 = vrot.lane.b32.xlu0 %v3351_v45, %s8111_s9  ;;  %v3350_v10 = vmul.f32 %v7827_v44, %v3327_v42  ;;  %v7834_v45 = vld [vmem:[%s8359_s29 + $0x28] sm:$0xff] }
 0x9bc   : > { %v3297_v9 = vpop.permute.xlu0 %3296  ;;  %v3349_v44 = vmul.f32 %v7834_v45, %v3337_v57  ;;  %v3214_v57 = vmul.f32 1.442695, %v9126_v35  ;;  %v3222_v35 = vmul.f32 1.442695, %v9134_v39 }
 0x9bd   : > { %v3314_v48 = vmul.f32 %v7828_v26, %v3297_v9  ;;  %3380 = vrot.lane.b32.xlu1 %v3350_v10, %s8111_s9  ;;  %v7835_v10 = vld [vmem:[%s8359_s29 + $0x20] sm:$0xff]  ;;  %v7836_v26 = vld [vmem:[%s8359_s29 + $0x18] sm:$0xff] }
 0x9be   : > { %v3299_v36 = vpop.permute.xlu1 %3298  ;;  %v3348_v9 = vmul.f32 %v7835_v10, %v3335_v16 }
 0x9bf   : > { %3362 = vrot.lane.b32.xlu0 %v3314_v48, %s8111_s9  ;;  %v3315_v20 = vmul.f32 %v7829_v59, %v3299_v36  ;;  %v3347_v48 = vmul.f32 %v7836_v26, %v3333_v52  ;;  %v7837_v36 = vld [vmem:[%s8359_s29 + $0x10] sm:$0xff]  ;;  %v3216_v52 = vmul.f32 1.442695, %v9132_v56 }
 0x9c0   : > { %v3301_v40 = vpop.permute.xlu0 %3300  ;;  %v3346_v59 = vmul.f32 %v7837_v36, %v3331_v0  ;;  %v3220_v0 = vmul.f32 1.442695, %v9137_v14 }
 0x9c1   : > { %v3316_v51 = vmul.f32 %v7830_v13, %v3301_v40  ;;  %3364 = vrot.lane.b32.xlu1 %v3315_v20, %s8111_s9  ;;  %v3212_v20 = vmul.f32 1.442695, %v9128_v32  ;;  %v7838_v40 = vld [vmem:[%s8359_s29 + $0x8] sm:$0xff]  ;;  %v3218_v32 = vmul.f32 1.442695, %v9130_v2 }
 0x9c2   : > { %v3303_v63 = vpop.permute.xlu1 %3302  ;;  %v3345_v13 = vmul.f32 %v7838_v40, %v3329_v61 }
 0x9c3   : > { %3366 = vrot.lane.b32.xlu0 %v3316_v51, %s8111_s9  ;;  %v3317_v25 = vmul.f32 %v7831_v31, %v3303_v63  ;;  %v7839_v51 = vld [vmem:[%s8359_s29] sm:$0xff]  ;;  %7810 = vpow2.f32 %v3212_v20 }
 0x9c4   : > { %v3305_v50 = vpop.permute.xlu0 %3304  ;;  %v3344_v16 = vmul.f32 %v7839_v51, %v3327_v42  ;;  %7812 = vpow2.f32 %v3214_v57 }
 0x9c5   : > { %v3318_v11 = vmul.f32 %v7832_v29, %v3305_v50  ;;  %3368 = vrot.lane.b32.xlu1 %v3317_v25, %s8111_s9  ;;  %7814 = vpow2.f32 %v3216_v52 }
 0x9c6   : > { %v3307_v24 = vpop.permute.xlu1 %3306  ;;  %7816 = vpow2.f32 %v3218_v32 }
 0x9c7   : > { %3370 = vrot.lane.b32.xlu0 %v3318_v11, %s8111_s9  ;;  %v3319_v6 = vmul.f32 %v7833_v43, %v3307_v24  ;;  %7818 = vpow2.f32 %v3220_v0 }
 0x9c8   : > { %7820 = vpow2.f32 %v3222_v35 }
 0x9c9   : > { %3372 = vrot.lane.b32.xlu1 %v3319_v6, %s8111_s9 }
 0x9cb   : > { %3533 = vrot.lane.b32.xlu0 %v3349_v44, %s8111_s9 }
 0x9cd   : > { %3531 = vrot.lane.b32.xlu1 %v3348_v9, %s8111_s9 }
 0x9cf   : > { %3529 = vrot.lane.b32.xlu0 %v3347_v48, %s8111_s9 }
 0x9d1   : > { %3527 = vrot.lane.b32.xlu1 %v3346_v59, %s8111_s9 }
 0x9d3   : > { %3525 = vrot.lane.b32.xlu0 %v3345_v13, %s8111_s9 }
 0x9d5   : > { %3523 = vrot.lane.b32.xlu1 %v3344_v16, %s8111_s9 }
 0x9d7   : > { %4830 = vrot.lane.b32.xlu0 %v8780_v53, %s8111_s9  ;;  %v7811_v53 = vpop.eup %7810 }
 0x9d9   : > { %4828 = vrot.lane.b32.xlu1 %v8788_v54, %s8111_s9  ;;  %v7813_v54 = vpop.eup %7812 }
 0x9da   : > { %v7815_v2 = vpop.eup %7814 }
 0x9db   : > { %4826 = vrot.lane.b32.xlu0 %v8798_v5, %s8111_s9  ;;  %v7817_v5 = vpop.eup %7816 }
 0x9dc   : > { %v7819_v56 = vpop.eup %7818 }
 0x9dd   : > { %4824 = vrot.lane.b32.xlu1 %v8809_v3, %s8111_s9  ;;  %v7821_v3 = vpop.eup %7820 }
 0x9df   : > { %4822 = vrot.lane.b32.xlu0 %v8818_v55, %s8111_s9 }
 0x9e1   : > { %4820 = vrot.lane.b32.xlu1 %v8827_v37, %s8111_s9 }
 0x9e3   : > { %3266 = vrot.lane.b32.xlu0 %v7811_v53, %s8111_s9 }
 0x9e5   : > { %3268 = vrot.lane.b32.xlu1 %v7813_v54, %s8111_s9 }
 0x9e7   : > { %3270 = vrot.lane.b32.xlu0 %v7815_v2, %s8111_s9 }
 0x9e9   : > { %3272 = vrot.lane.b32.xlu1 %v7817_v5, %s8111_s9 }
 0x9eb   : > { %3274 = vrot.lane.b32.xlu0 %v7819_v56, %s8111_s9 }
 0x9ed   : > { %3276 = vrot.lane.b32.xlu1 %v7821_v3, %s8111_s9 }
 0xa25   : > { %v9227_v55 = vpop.permute.xlu0 %3390 }
 0xa26   : > { %7231 = vmatprep.subr.msk.mxu0 %vm799_vm7, %v9227_v55 }
 0xa27   : > { %7232 = vmatpush3.xpose.msk.msra.mxu0 %vm799_vm7, %v9227_v55  ;;  %v9233_v37 = vpop.permute.xlu1 %3388 }
 0xa28   : > { %7233 = vmatprep.subr.msk.mxu0 %vm799_vm7, %v9233_v37 }
 0xa29   : > { %v9237_v39 = vpop.permute.xlu0 %3386 }
 0xa2b   : > { %7234 = vmatpush3.xpose.msk.msra.mxu0 %vm799_vm7, %v9233_v37  ;;  %v9241_v14 = vpop.permute.xlu1 %3384 }
 0xa2c   : > { %7235 = vmatprep.subr.msk.mxu0 %vm799_vm7, %v9237_v39 }
 0xa2d   : > { %v9245_v61 = vpop.permute.xlu0 %3382 }
 0xa2f   : > { %7236 = vmatpush3.xpose.msk.msra.mxu0 %vm799_vm7, %v9237_v39  ;;  %v9249_v42 = vpop.permute.xlu1 %3380 }
 0xa30   : > { %7237 = vmatprep.subr.msk.mxu0 %vm799_vm7, %v9241_v14 }
 0xa31   : > { %v9253_v63 = vpop.permute.xlu0 %3362 }
 0xa32   : > { %7243 = vmatprep.mubr.msk.f32.mxu0 %vm799_vm7, %v9253_v63  ;;  %7264 = vmatprep.mubr.msk.f32.mxu1 %vm799_vm7, %v9253_v63 }
 0xa33   : > { %7238 = vmatpush3.xpose.msk.msra.mxu0 %vm799_vm7, %v9241_v14  ;;  %v9261_v31 = vpop.permute.xlu1 %3364 }
 0xa34   : > { %7239 = vmatprep.subr.msk.mxu0 %vm799_vm7, %v9245_v61 }
 0xa35   : > { %v9265_v25 = vpop.permute.xlu0 %3366 }
 0xa37   : > { %7240 = vmatpush3.xpose.msk.msra.mxu0 %vm799_vm7, %v9245_v61  ;;  %v9269_v50 = vpop.permute.xlu1 %3368 }
 0xa38   : > { %7241 = vmatprep.subr.msk.mxu0 %vm799_vm7, %v9249_v42 }
 0xa39   : > { %v9273_v29 = vpop.permute.xlu0 %3370 }
 0xa3b   : > { %7242 = vmatpush3.xpose.msk.msra.mxu0 %vm799_vm7, %v9249_v42  ;;  %v9277_v11 = vpop.permute.xlu1 %3372 }
 0xa3d   : > { %v9279_v24 = vpop.permute.xlu0 %3533 }
 0xa3e   : > { %7244 = vmatmul.mubr.msk.f32.vlgmr.msra.gmra.mxu0 %vm799_vm7, %v9261_v31  ;;  %7252 = vmatprep.subr.msk.mxu1 %vm799_vm7, %v9279_v24 }
 0xa3f   : > { %7246 = vmatprep.mubr.msk.f32.mxu0 %vm799_vm7, %v9265_v25  ;;  %7253 = vmatpush3.xpose.msk.msra.mxu1 %vm799_vm7, %v9279_v24  ;;  %v9289_v43 = vpop.permute.xlu1 %3531 }
 0xa40   : > { %7254 = vmatprep.subr.msk.mxu1 %vm799_vm7, %v9289_v43 }
 0xa41   : > { %v9293_v6 = vpop.permute.xlu0 %3529 }
 0xa42   : > { %7247 = vmatmul.mubr.msk.f32.gmra.mxu0 %vm799_vm7, %v9269_v50 }
 0xa43   : > { %7249 = vmatprep.mubr.msk.f32.mxu0 %vm799_vm7, %v9273_v29  ;;  %7255 = vmatpush3.xpose.msk.msra.mxu1 %vm799_vm7, %v9289_v43  ;;  %v9301_v45 = vpop.permute.xlu1 %3527 }
 0xa44   : > { %7256 = vmatprep.subr.msk.mxu1 %vm799_vm7, %v9293_v6 }
 0xa45   : > { %v9305_v44 = vpop.permute.xlu0 %3525 }
 0xa46   : > { %7250 = vmatmul.mubr.msk.f32.gmra.mxu0 %vm799_vm7, %v9277_v11 }
 0xa47   : > { %7257 = vmatpush3.xpose.msk.msra.mxu1 %vm799_vm7, %v9293_v6  ;;  %v9311_v10 = vpop.permute.xlu1 %3523 }
 0xa48   : > { %7258 = vmatprep.subr.msk.mxu1 %vm799_vm7, %v9301_v45 }
 0xa49   : > { %v9315_v9 = vpop.permute.xlu0 %4830 }
 0xa4b   : > { %7259 = vmatpush3.xpose.msk.msra.mxu1 %vm799_vm7, %v9301_v45  ;;  %v9319_v26 = vpop.permute.xlu1 %4828 }
 0xa4c   : > { %7260 = vmatprep.subr.msk.mxu1 %vm799_vm7, %v9305_v44 }
 0xa4d   : > { %v9323_v48 = vpop.permute.xlu0 %4826 }
 0xa4f   : > { %7261 = vmatpush3.xpose.msk.msra.mxu1 %vm799_vm7, %v9305_v44  ;;  %v9327_v36 = vpop.permute.xlu1 %4824 }
 0xa50   : > { %7262 = vmatprep.subr.msk.mxu1 %vm799_vm7, %v9311_v10 }
 0xa51   : > { %v9331_v59 = vpop.permute.xlu0 %4822 }
 0xa53   : > { %7263 = vmatpush3.xpose.msk.msra.mxu1 %vm799_vm7, %v9311_v10  ;;  %v9335_v20 = vpop.permute.xlu1 %4820 }
 0xa55   : > { %v3267_v40 = vpop.permute.xlu0 %3266 }
 0xa56   : > { %v3284_v13 = vmul.f32 %v3267_v40, %v8900_v58  ;;  %7265 = vmatmul.mubr.msk.f32.vlgmr.msra.gmra.mxu1 %vm799_vm7, %v9261_v31 }
 0xa57   : > { %7267 = vmatprep.mubr.msk.f32.mxu1 %vm799_vm7, %v9265_v25  ;;  %v3269_v57 = vpop.permute.xlu1 %3268 }
 0xa58   : > { %5165 = vrot.lane.b32.xlu0 %v3284_v13, %s8111_s9  ;;  %v3285_v51 = vmul.f32 %v3269_v57, %v8931_v47 }
 0xa59   : > { %v3271_v16 = vpop.permute.xlu0 %3270 }
 0xa5a   : > { %v3286_v52 = vmul.f32 %v3271_v16, %v8934_v27  ;;  %7268 = vmatmul.mubr.msk.f32.gmra.mxu1 %vm799_vm7, %v9269_v50  ;;  %5167 = vrot.lane.b32.xlu1 %v3285_v51, %s8111_s9 }
 0xa5b   : > { %7270 = vmatprep.mubr.msk.f32.mxu1 %vm799_vm7, %v9273_v29  ;;  %v3273_v58 = vpop.permute.xlu1 %3272 }
 0xa5c   : > { %5169 = vrot.lane.b32.xlu0 %v3286_v52, %s8111_s9  ;;  %v3287_v32 = vmul.f32 %v3273_v58, %v8947_v15 }
 0xa5d   : > { %v3275_v0 = vpop.permute.xlu0 %3274 }
 0xa5e   : > { %v3288_v35 = vmul.f32 %v3275_v0, %v8952_v41  ;;  %7271 = vmatmul.mubr.msk.f32.gmra.mxu1 %vm799_vm7, %v9277_v11  ;;  %5171 = vrot.lane.b32.xlu1 %v3287_v32, %s8111_s9  ;;  %v9834_v41 = vld [vmem:[#allocation31_spill] sm:$0xff] }
 0xa5f   : > { %v3277_v47 = vpop.permute.xlu1 %3276 }
 0xa60   : > { %5173 = vrot.lane.b32.xlu0 %v3288_v35, %s8111_s9  ;;  %v3289_v27 = vmul.f32 %v3277_v47, %v8967_v38 }
 0xa62   : > { %5175 = vrot.lane.b32.xlu1 %v3289_v27, %s8111_s9  ;;  %v9835_v27 = vld [vmem:[#allocation32_spill] sm:$0xff] }
 0xafe   : > { %v7245_v53 = vpop.f32.mrf.mxu0 }
 0xaff   : > { %v3512_v16 = vmul.f32 %v7245_v53, %v8672_v17 }
 0xb00   : > { %v3482_v54 = vpop.f32.mrf.mxu0 }
 0xb01   : > { %v3511_v2 = vmul.f32 %v8625_v49, %v3482_v54  ;;  %v3649_v53 = vadd.f32 %v9835_v27, %v3512_v16  ;;  %v9836_v54 = vld [vmem:[#allocation33_spill] sm:$0xff] }
 0xb02   : > { %v7248_v15 = vpop.f32.mrf.mxu0 }
 0xb03   : > { %7285 = vmatprep.mubr.msk.f32.mxu0 %vm613_vm0, %v3511_v2  ;;  %v9362_v5 = vadd.f32 %v9834_v41, %v3511_v2  ;;  %v3514_v57 = vmul.f32 %v7248_v15, %v8655_v8  ;;  %v9837_v15 = vld [vmem:[#allocation34_spill] sm:$0xff] }
 0xb04   : > { %v3492_v56 = vpop.f32.mrf.mxu0 }
 0xb05   : > { %7306 = vmatprep.mubr.msk.f32.mxu1 %vm613_vm0, %v9362_v5  ;;  %v3513_v51 = vmul.f32 %v8664_v12, %v3492_v56  ;;  %v3651_v41 = vadd.f32 %v9837_v15, %v3514_v57  ;;  %v9838_v56 = vld [vmem:[#allocation35_spill] sm:$0xff] }
 0xb06   : > { %v7251_v3 = vpop.f32.mrf.mxu0 }
 0xb07   : > { %v9367_v40 = vmul.f32 %v7251_v3, %v8640_v60 }
 0xb08   : > { %v3502_v38 = vpop.f32.mrf.mxu0 }
 0xb09   : > { %v3515_v13 = vmul.f32 %v8647_v62, %v3502_v38  ;;  %7273 = vmatprep.subr.mxu0 %v9367_v40  ;;  %v9839_v38 = vld [vmem:[#allocation36_spill] sm:$0xff] }
 0xb0a   : > { %7274 = vmatpush3.msra.mxu0 %v9367_v40 }
 0xb0b   : > { %7275 = vmatprep.subr.mxu0 %v3515_v13  ;;  %v3652_v3 = vadd.f32 %v9838_v56, %v3515_v13 }
 0xb0c   : > { %7276 = vmatpush3.msra.mxu0 %v3515_v13 }
 0xb0d   : > { %7277 = vmatprep.subr.mxu0 %v3514_v57 }
 0xb0e   : > { %7278 = vmatpush3.msra.mxu0 %v3514_v57 }
 0xb0f   : > { %7279 = vmatprep.subr.mxu0 %v3513_v51 }
 0xb10   : > { %7280 = vmatpush3.msra.mxu0 %v3513_v51 }
 0xb11   : > { %7281 = vmatprep.subr.mxu0 %v3512_v16 }
 0xb12   : > { %7282 = vmatpush3.msra.mxu0 %v3512_v16 }
 0xb13   : > { %7283 = vmatprep.subr.mxu0 %v3511_v2 }
 0xb14   : > { %7284 = vmatpush3.msra.mxu0 %v3511_v2  ;;  %v3650_v2 = vadd.f32 %v9836_v54, %v3513_v51 }
 0xb15   : > { %7286 = vmatmul.mubr.msk.f32.vlgmr.msra.gmra.mxu0 %vm613_vm0, %v3512_v16 }
 0xb16   : > { %7288 = vmatprep.mubr.msk.f32.mxu0 %vm613_vm0, %v3513_v51  ;;  %v3653_v51 = vadd.f32 %v9839_v38, %v9367_v40  ;;  %v9398_v16 = vpop.f32.mrf.mxu1 }
 0xb19   : > { %7289 = vmatmul.mubr.msk.f32.gmra.mxu0 %vm613_vm0, %v3514_v57  ;;  %v9400_v57 = vpop.f32.mrf.mxu1 }
 0xb1a   : > { %7291 = vmatprep.mubr.msk.f32.mxu0 %vm613_vm0, %v3515_v13 }
 0xb1b   : > { %v9402_v13 = vpop.f32.mrf.mxu1 }
 0xb1d   : > { %7292 = vmatmul.mubr.msk.f32.gmra.mxu0 %vm613_vm0, %v9367_v40 }
 0xbd5   : > { %v7287_v52 = vpop.f32.mrf.mxu0 }
 0xbd7   : > { %v3738_v58 = vpop.f32.mrf.mxu0 }
 0xbd8   : > { %7327 = vmatprep.mubr.msk.f32.mxu0 %vm613_vm0, %v3738_v58 }
 0xbd9   : > { %v7290_v32 = vpop.f32.mrf.mxu0 }
 0xbdb   : > { %v3748_v0 = vpop.f32.mrf.mxu0 }
 0xbdd   : > { %v7293_v35 = vpop.f32.mrf.mxu0 }
 0xbde   : > { %7294 = vmatprep.subr.mxu1 %v7293_v35  ;;  %7315 = vmatprep.subr.mxu0 %v7293_v35 }
 0xbdf   : > { %v3758_v47 = vpop.f32.mrf.mxu0  ;;  %7295 = vmatpush3.msra.mxu1 %v7293_v35  ;;  %7316 = vmatpush3.msra.mxu0 %v7293_v35 }
 0xbe0   : > { %7296 = vmatprep.subr.mxu1 %v3758_v47  ;;  %7317 = vmatprep.subr.mxu0 %v3758_v47 }
 0xbe1   : > { %7297 = vmatpush3.msra.mxu1 %v3758_v47  ;;  %7318 = vmatpush3.msra.mxu0 %v3758_v47 }
 0xbe2   : > { %7298 = vmatprep.subr.mxu1 %v7290_v32  ;;  %7319 = vmatprep.subr.mxu0 %v7290_v32 }
 0xbe3   : > { %7299 = vmatpush3.msra.mxu1 %v7290_v32  ;;  %7320 = vmatpush3.msra.mxu0 %v7290_v32 }
 0xbe4   : > { %7300 = vmatprep.subr.mxu1 %v3748_v0  ;;  %7321 = vmatprep.subr.mxu0 %v3748_v0 }
 0xbe5   : > { %7301 = vmatpush3.msra.mxu1 %v3748_v0  ;;  %7322 = vmatpush3.msra.mxu0 %v3748_v0 }
 0xbe6   : > { %7302 = vmatprep.subr.mxu1 %v7287_v52  ;;  %7323 = vmatprep.subr.mxu0 %v7287_v52 }
 0xbe7   : > { %7303 = vmatpush3.msra.mxu1 %v7287_v52  ;;  %7324 = vmatpush3.msra.mxu0 %v7287_v52 }
 0xbe8   : > { %7304 = vmatprep.subr.mxu1 %v3738_v58  ;;  %7325 = vmatprep.subr.mxu0 %v3738_v58 }
 0xbe9   : > { %7305 = vmatpush3.msra.mxu1 %v3738_v58  ;;  %7326 = vmatpush3.msra.mxu0 %v3738_v58 }
 0xbea   : > { %7307 = vmatmul.mubr.msk.f32.vlgmr.msra.gmra.mxu1 %vm613_vm0, %v3649_v53  ;;  %7328 = vmatmul.mubr.msk.f32.vlgmr.msra.gmra.mxu0 %vm613_vm0, %v7287_v52  ;;  %v9404_v52 = vpop.f32.mrf.mxu1 }
 0xbeb   : > { %7309 = vmatprep.mubr.msk.f32.mxu1 %vm613_vm0, %v3650_v2  ;;  %7330 = vmatprep.mubr.msk.f32.mxu0 %vm613_vm0, %v3748_v0 }
 0xbec   : > { %v9406_v58 = vpop.f32.mrf.mxu1 }
 0xbee   : > { %7310 = vmatmul.mubr.msk.f32.gmra.mxu1 %vm613_vm0, %v3651_v41  ;;  %7331 = vmatmul.mubr.msk.f32.gmra.mxu0 %vm613_vm0, %v7290_v32  ;;  %v9408_v32 = vpop.f32.mrf.mxu1 }
 0xbef   : > { %7312 = vmatprep.mubr.msk.f32.mxu1 %vm613_vm0, %v3652_v3  ;;  %7333 = vmatprep.mubr.msk.f32.mxu0 %vm613_vm0, %v3758_v47 }
 0xbf2   : > { %7313 = vmatmul.mubr.msk.f32.gmra.mxu1 %vm613_vm0, %v3653_v51  ;;  %7334 = vmatmul.mubr.msk.f32.gmra.mxu0 %vm613_vm0, %v7293_v35 }
 0xcaa   : > { %v7308_v0 = vpop.f32.mrf.mxu1  ;;  %v7329_v47 = vpop.f32.mrf.mxu0 }
 0xcac   : > { %v3851_v27 = vpop.f32.mrf.mxu1  ;;  %v3970_v40 = vpop.f32.mrf.mxu0 }
 0xcad   : > { %v3880_v54 = vadd.f32 %v3851_v27, %v9362_v5  ;;  %7369 = vmatprep.mubr.msk.f32.mxu0 %vm613_vm0, %v3970_v40  ;;  %v3881_v27 = vadd.f32 %v7308_v0, %v3649_v53 }
 0xcae   : > { %v7332_v35 = vpop.f32.mrf.mxu0  ;;  %v7311_v38 = vpop.f32.mrf.mxu1 }
 0xcaf   : > { %7348 = vmatprep.mubr.msk.f32.mxu1 %vm613_vm0, %v3880_v54  ;;  %v3883_v28 = vadd.f32 %v7311_v38, %v3651_v41 }
 0xcb0   : > { %v3980_v15 = vpop.f32.mrf.mxu0  ;;  %v3861_v30 = vpop.f32.mrf.mxu1 }
 0xcb1   : > { %v3882_v33 = vadd.f32 %v3861_v30, %v3650_v2 }
 0xcb2   : > { %v7335_v56 = vpop.f32.mrf.mxu0  ;;  %v7314_v5 = vpop.f32.mrf.mxu1 }
 0xcb3   : > { %7336 = vmatprep.subr.mxu1 %v7335_v56  ;;  %7357 = vmatprep.subr.mxu0 %v7335_v56  ;;  %v3885_v30 = vadd.f32 %v7314_v5, %v3653_v51 }
 0xcb4   : > { %v3990_v34 = vpop.f32.mrf.mxu0  ;;  %7337 = vmatpush3.msra.mxu1 %v7335_v56  ;;  %7358 = vmatpush3.msra.mxu0 %v7335_v56  ;;  %v3871_v1 = vpop.f32.mrf.mxu1 }
 0xcb5   : > { %7338 = vmatprep.subr.mxu1 %v3990_v34  ;;  %7359 = vmatprep.subr.mxu0 %v3990_v34  ;;  %v3884_v7 = vadd.f32 %v3871_v1, %v3652_v3 }
 0xcb6   : > { %7339 = vmatpush3.msra.mxu1 %v3990_v34  ;;  %7360 = vmatpush3.msra.mxu0 %v3990_v34 }
 0xcb7   : > { %7340 = vmatprep.subr.mxu1 %v7332_v35  ;;  %7361 = vmatprep.subr.mxu0 %v7332_v35 }
 0xcb8   : > { %7341 = vmatpush3.msra.mxu1 %v7332_v35  ;;  %7362 = vmatpush3.msra.mxu0 %v7332_v35 }
 0xcb9   : > { %7342 = vmatprep.subr.mxu1 %v3980_v15  ;;  %7363 = vmatprep.subr.mxu0 %v3980_v15 }
 0xcba   : > { %7343 = vmatpush3.msra.mxu1 %v3980_v15  ;;  %7364 = vmatpush3.msra.mxu0 %v3980_v15 }
 0xcbb   : > { %7344 = vmatprep.subr.mxu1 %v7329_v47  ;;  %7365 = vmatprep.subr.mxu0 %v7329_v47 }
 0xcbc   : > { %7345 = vmatpush3.msra.mxu1 %v7329_v47  ;;  %7366 = vmatpush3.msra.mxu0 %v7329_v47 }
 0xcbd   : > { %7346 = vmatprep.subr.mxu1 %v3970_v40  ;;  %7367 = vmatprep.subr.mxu0 %v3970_v40 }
 0xcbe   : > { %7347 = vmatpush3.msra.mxu1 %v3970_v40  ;;  %7368 = vmatpush3.msra.mxu0 %v3970_v40 }
 0xcbf   : > { %7349 = vmatmul.mubr.msk.f32.vlgmr.msra.gmra.mxu1 %vm613_vm0, %v3881_v27  ;;  %7370 = vmatmul.mubr.msk.f32.vlgmr.msra.gmra.mxu0 %vm613_vm0, %v7329_v47 }
 0xcc0   : > { %7351 = vmatprep.mubr.msk.f32.mxu1 %vm613_vm0, %v3882_v33  ;;  %7372 = vmatprep.mubr.msk.f32.mxu0 %vm613_vm0, %v3980_v15 }
 0xcc3   : > { %7352 = vmatmul.mubr.msk.f32.gmra.mxu1 %vm613_vm0, %v3883_v28  ;;  %7373 = vmatmul.mubr.msk.f32.gmra.mxu0 %vm613_vm0, %v7332_v35 }
 0xcc4   : > { %7354 = vmatprep.mubr.msk.f32.mxu1 %vm613_vm0, %v3884_v7  ;;  %7375 = vmatprep.mubr.msk.f32.mxu0 %vm613_vm0, %v3990_v34 }
 0xcc7   : > { %7355 = vmatmul.mubr.msk.f32.gmra.mxu1 %vm613_vm0, %v3885_v30  ;;  %7376 = vmatmul.mubr.msk.f32.gmra.mxu0 %vm613_vm0, %v7335_v56 }
 0xd7f   : > { %v7350_v53 = vpop.f32.mrf.mxu1  ;;  %v7371_v2 = vpop.f32.mrf.mxu0 }
 0xd80   : > { %v4113_v15 = vadd.f32 %v7350_v53, %v3881_v27 }
 0xd81   : > { %v4083_v0 = vpop.f32.mrf.mxu1  ;;  %v4202_v47 = vpop.f32.mrf.mxu0 }
 0xd82   : > { %v4112_v40 = vadd.f32 %v4083_v0, %v3880_v54  ;;  %7411 = vmatprep.mubr.msk.f32.mxu0 %vm613_vm0, %v4202_v47 }
 0xd83   : > { %v7374_v1 = vpop.f32.mrf.mxu0  ;;  %v7353_v35 = vpop.f32.mrf.mxu1 }
 0xd84   : > { %7390 = vmatprep.mubr.msk.f32.mxu1 %vm613_vm0, %v4112_v40  ;;  %v4115_v5 = vadd.f32 %v7353_v35, %v3883_v28 }
 0xd85   : > { %v4212_v41 = vpop.f32.mrf.mxu0  ;;  %v4093_v51 = vpop.f32.mrf.mxu1 }
 0xd86   : > { %v4114_v56 = vadd.f32 %v4093_v51, %v3882_v33 }
 0xd87   : > { %v7377_v3 = vpop.f32.mrf.mxu0  ;;  %v7356_v54 = vpop.f32.mrf.mxu1 }
 0xd88   : > { %7378 = vmatprep.subr.mxu1 %v7377_v3  ;;  %7399 = vmatprep.subr.mxu0 %v7377_v3  ;;  %v4117_v33 = vadd.f32 %v7356_v54, %v3885_v30 }
 0xd89   : > { %v4222_v34 = vpop.f32.mrf.mxu0  ;;  %7379 = vmatpush3.msra.mxu1 %v7377_v3  ;;  %7400 = vmatpush3.msra.mxu0 %v7377_v3  ;;  %v4103_v38 = vpop.f32.mrf.mxu1 }
 0xd8a   : > { %7380 = vmatprep.subr.mxu1 %v4222_v34  ;;  %7401 = vmatprep.subr.mxu0 %v4222_v34  ;;  %v4116_v0 = vadd.f32 %v4103_v38, %v3884_v7 }
 0xd8b   : > { %7381 = vmatpush3.msra.mxu1 %v4222_v34  ;;  %7402 = vmatpush3.msra.mxu0 %v4222_v34 }
 0xd8c   : > { %7382 = vmatprep.subr.mxu1 %v7374_v1  ;;  %7403 = vmatprep.subr.mxu0 %v7374_v1 }
 0xd8d   : > { %7383 = vmatpush3.msra.mxu1 %v7374_v1  ;;  %7404 = vmatpush3.msra.mxu0 %v7374_v1 }
 0xd8e   : > { %7384 = vmatprep.subr.mxu1 %v4212_v41  ;;  %7405 = vmatprep.subr.mxu0 %v4212_v41 }
 0xd8f   : > { %7385 = vmatpush3.msra.mxu1 %v4212_v41  ;;  %7406 = vmatpush3.msra.mxu0 %v4212_v41 }
 0xd90   : > { %7386 = vmatprep.subr.mxu1 %v7371_v2  ;;  %7407 = vmatprep.subr.mxu0 %v7371_v2 }
 0xd91   : > { %7387 = vmatpush3.msra.mxu1 %v7371_v2  ;;  %7408 = vmatpush3.msra.mxu0 %v7371_v2 }
 0xd92   : > { %7388 = vmatprep.subr.mxu1 %v4202_v47  ;;  %7409 = vmatprep.subr.mxu0 %v4202_v47 }
 0xd93   : > { %7389 = vmatpush3.msra.mxu1 %v4202_v47  ;;  %7410 = vmatpush3.msra.mxu0 %v4202_v47 }
 0xd94   : > { %7391 = vmatmul.mubr.msk.f32.vlgmr.msra.gmra.mxu1 %vm613_vm0, %v4113_v15  ;;  %7412 = vmatmul.mubr.msk.f32.vlgmr.msra.gmra.mxu0 %vm613_vm0, %v7371_v2 }
 0xd95   : > { %7393 = vmatprep.mubr.msk.f32.mxu1 %vm613_vm0, %v4114_v56  ;;  %7414 = vmatprep.mubr.msk.f32.mxu0 %vm613_vm0, %v4212_v41 }
 0xd98   : > { %7394 = vmatmul.mubr.msk.f32.gmra.mxu1 %vm613_vm0, %v4115_v5  ;;  %7415 = vmatmul.mubr.msk.f32.gmra.mxu0 %vm613_vm0, %v7374_v1 }
 0xd99   : > { %7396 = vmatprep.mubr.msk.f32.mxu1 %vm613_vm0, %v4116_v0  ;;  %7417 = vmatprep.mubr.msk.f32.mxu0 %vm613_vm0, %v4222_v34 }
 0xd9c   : > { %7397 = vmatmul.mubr.msk.f32.gmra.mxu1 %vm613_vm0, %v4117_v33  ;;  %7418 = vmatmul.mubr.msk.f32.gmra.mxu0 %vm613_vm0, %v7377_v3 }
 0xe54   : > { %v7392_v27 = vpop.f32.mrf.mxu1  ;;  %v7413_v53 = vpop.f32.mrf.mxu0 }
 0xe55   : > { %v9440_v34 = vadd.f32 %v7392_v27, %v4113_v15 }
 0xe56   : > { %v4315_v2 = vpop.f32.mrf.mxu1  ;;  %v4434_v47 = vpop.f32.mrf.mxu0 }
 0xe57   : > { %v9435_v41 = vadd.f32 %v4315_v2, %v4112_v40  ;;  %7453 = vmatprep.mubr.msk.f32.mxu0 %vm613_vm0, %v4434_v47 }
 0xe58   : > { %v7416_v7 = vpop.f32.mrf.mxu0  ;;  %v7395_v30 = vpop.f32.mrf.mxu1 }
 0xe59   : > { %7432 = vmatprep.mubr.msk.f32.mxu1 %vm613_vm0, %v9435_v41  ;;  %v9450_v38 = vadd.f32 %v7395_v30, %v4115_v5  ;;  %v3642_v5 = vmul.f32 %v8625_v49, %v9400_v57  ;;  %v3645_v49 = vmul.f32 %v9402_v13, %v8655_v8  ;;  %v3646_v57 = vmul.f32 %v8647_v62, %v9408_v32 }
 0xe5a   : > { %v4444_v28 = vpop.f32.mrf.mxu0  ;;  %v4325_v40 = vpop.f32.mrf.mxu1 }
 0xe5b   : > { %v9442_v51 = vadd.f32 %v4325_v40, %v4114_v56 }
 0xe5c   : > { %v7419_v1 = vpop.f32.mrf.mxu0  ;;  %v7398_v3 = vpop.f32.mrf.mxu1 }
 0xe5d   : > { %7420 = vmatprep.subr.mxu1 %v7419_v1  ;;  %7441 = vmatprep.subr.mxu0 %v7419_v1  ;;  %v4349_v56 = vadd.f32 %v7398_v3, %v4117_v33  ;;  %v3644_v33 = vmul.f32 %v8664_v12, %v9404_v52 }
 0xe5e   : > { %v4454_v35 = vpop.f32.mrf.mxu0  ;;  %7421 = vmatpush3.msra.mxu1 %v7419_v1  ;;  %7442 = vmatpush3.msra.mxu0 %v7419_v1  ;;  %v4335_v54 = vpop.f32.mrf.mxu1 }
 0xe5f   : > { %7422 = vmatprep.subr.mxu1 %v4454_v35  ;;  %7443 = vmatprep.subr.mxu0 %v4454_v35  ;;  %v9455_v15 = vadd.f32 %v4335_v54, %v4116_v0  ;;  %v3643_v0 = vmul.f32 %v9398_v16, %v8672_v17  ;;  %v3647_v17 = vmul.f32 %v9406_v58, %v8640_v60 }
 0xe60   : > { %7423 = vmatpush3.msra.mxu1 %v4454_v35  ;;  %7444 = vmatpush3.msra.mxu0 %v4454_v35 }
 0xe61   : > { %7424 = vmatprep.subr.mxu1 %v7416_v7  ;;  %7445 = vmatprep.subr.mxu0 %v7416_v7 }
 0xe62   : > { %7425 = vmatpush3.msra.mxu1 %v7416_v7  ;;  %7446 = vmatpush3.msra.mxu0 %v7416_v7 }
 0xe63   : > { %7426 = vmatprep.subr.mxu1 %v4444_v28  ;;  %7447 = vmatprep.subr.mxu0 %v4444_v28 }
 0xe64   : > { %7427 = vmatpush3.msra.mxu1 %v4444_v28  ;;  %7448 = vmatpush3.msra.mxu0 %v4444_v28 }
 0xe65   : > { %7428 = vmatprep.subr.mxu1 %v7413_v53  ;;  %7449 = vmatprep.subr.mxu0 %v7413_v53 }
 0xe66   : > { %7429 = vmatpush3.msra.mxu1 %v7413_v53  ;;  %7450 = vmatpush3.msra.mxu0 %v7413_v53 }
 0xe67   : > { %7430 = vmatprep.subr.mxu1 %v4434_v47  ;;  %7451 = vmatprep.subr.mxu0 %v4434_v47 }
 0xe68   : > { %7431 = vmatpush3.msra.mxu1 %v4434_v47  ;;  %7452 = vmatpush3.msra.mxu0 %v4434_v47 }
 0xe69   : > { %7433 = vmatmul.mubr.msk.f32.vlgmr.msra.gmra.mxu1 %vm613_vm0, %v9440_v34  ;;  %7454 = vmatmul.mubr.msk.f32.vlgmr.msra.gmra.mxu0 %vm613_vm0, %v7413_v53 }
 0xe6a   : > { %7483 = vmatprep.subr.mxu0 %v9315_v9  ;;  %7435 = vmatprep.mubr.msk.f32.mxu1 %vm613_vm0, %v9442_v51 }
 0xe6b   : > { %7456 = vmatprep.mubr.msk.f32.mxu0 %vm613_vm0, %v4444_v28  ;;  %7484 = vmatpush3.msra.mxu0 %v9315_v9 }
 0xe6c   : > { %7485 = vmatprep.subr.mxu0 %v9319_v26 }
 0xe6d   : > { %7486 = vmatpush3.msra.mxu0 %v9319_v26  ;;  %7436 = vmatmul.mubr.msk.f32.gmra.mxu1 %vm613_vm0, %v9450_v38 }
 0xe6e   : > { %7457 = vmatmul.mubr.msk.f32.gmra.mxu0 %vm613_vm0, %v7416_v7  ;;  %7487 = vmatprep.subr.mxu0 %v9323_v48 }
 0xe6f   : > { %7438 = vmatprep.mubr.msk.f32.mxu1 %vm613_vm0, %v9455_v15  ;;  %7459 = vmatprep.mubr.msk.f32.mxu0 %vm613_vm0, %v4454_v35 }
 0xe70   : > { %7488 = vmatpush3.msra.mxu0 %v9323_v48 }
 0xe71   : > { %7489 = vmatprep.subr.mxu0 %v9327_v36  ;;  %7439 = vmatmul.mubr.msk.f32.gmra.mxu1 %vm613_vm0, %v4349_v56 }
 0xe72   : > { %7490 = vmatpush3.msra.mxu0 %v9327_v36 }
 0xe73   : > { %7460 = vmatmul.mubr.msk.f32.gmra.mxu0 %vm613_vm0, %v7419_v1  ;;  %7491 = vmatprep.subr.mxu0 %v9331_v59 }
 0xe74   : > { %7492 = vmatpush3.msra.mxu0 %v9331_v59  ;;  %7495 = vmatprep.mubr.msk.f32.mxu0 %vm613_vm0, %v3642_v5 }
 0xe75   : > { %7493 = vmatprep.subr.mxu0 %v9335_v20 }
 0xe76   : > { %7494 = vmatpush3.msra.mxu0 %v9335_v20 }
 0xe77   : > { %7496 = vmatmul.mubr.msk.f32.vlgmr.msra.gmra.mxu0 %vm613_vm0, %v3643_v0 }
 0xe78   : > { %7498 = vmatprep.mubr.msk.f32.mxu0 %vm613_vm0, %v3644_v33 }
 0xe7b   : > { %7499 = vmatmul.mubr.msk.f32.gmra.mxu0 %vm613_vm0, %v3645_v49 }
 0xe7c   : > { %7501 = vmatprep.mubr.msk.f32.mxu0 %vm613_vm0, %v3646_v57 }
 0xe7f   : > { %7502 = vmatmul.mubr.msk.f32.gmra.mxu0 %vm613_vm0, %v3647_v17 }
 0xf29   : > { %v7434_v12 = vpop.f32.mrf.mxu1  ;;  %v7455_v16 = vpop.f32.mrf.mxu0 }
 0xf2a   : > { %v9498_v47 = vadd.f32 %v7434_v12, %v9440_v34 }
 0xf2b   : > { %v4547_v52 = vpop.f32.mrf.mxu1  ;;  %v4666_v27 = vpop.f32.mrf.mxu0 }
 0xf2c   : > { %v9493_v53 = vadd.f32 %v4547_v52, %v9435_v41 }
 0xf2d   : > { %v7437_v32 = vpop.f32.mrf.mxu1 }
 0xf2e   : > { %v7458_v8 = vpop.f32.mrf.mxu0  ;;  %7474 = vmatprep.mubr.msk.f32.mxu1 %vm613_vm0, %v9493_v53  ;;  %v9510_v28 = vadd.f32 %v7437_v32, %v9450_v38 }
 0xf2f   : > { %v4557_v60 = vpop.f32.mrf.mxu1 }
 0xf30   : > { %v4676_v62 = vpop.f32.mrf.mxu0  ;;  %v9501_v41 = vadd.f32 %v4557_v60, %v9442_v51 }
 0xf31   : > { %v7440_v58 = vpop.f32.mrf.mxu1 }
 0xf32   : > { %v9521_v30 = vadd.f32 %v7440_v58, %v4349_v56 }
 0xf33   : > { %v7461_v13 = vpop.f32.mrf.mxu0  ;;  %v4567_v7 = vpop.f32.mrf.mxu1 }
 0xf34   : > { %7462 = vmatprep.subr.mxu1 %v7461_v13  ;;  %v9515_v1 = vadd.f32 %v4567_v7, %v9455_v15 }
 0xf35   : > { %v4686_v2 = vpop.f32.mrf.mxu0  ;;  %7463 = vmatpush3.msra.mxu1 %v7461_v13 }
 0xf36   : > { %7464 = vmatprep.subr.mxu1 %v4686_v2 }
 0xf37   : > { %7465 = vmatpush3.msra.mxu1 %v4686_v2 }
 0xf38   : > { %7466 = vmatprep.subr.mxu1 %v7458_v8 }
 0xf39   : > { %7467 = vmatpush3.msra.mxu1 %v7458_v8 }
 0xf3a   : > { %7468 = vmatprep.subr.mxu1 %v4676_v62 }
 0xf3b   : > { %7469 = vmatpush3.msra.mxu1 %v4676_v62 }
 0xf3c   : > { %7470 = vmatprep.subr.mxu1 %v7455_v16 }
 0xf3d   : > { %7471 = vmatpush3.msra.mxu1 %v7455_v16 }
 0xf3e   : > { %7472 = vmatprep.subr.mxu1 %v4666_v27 }
 0xf3f   : > { %7473 = vmatpush3.msra.mxu1 %v4666_v27 }
 0xf40   : > { %7475 = vmatmul.mubr.msk.f32.vlgmr.msra.gmra.mxu1 %vm613_vm0, %v9498_v47  ;;  %7504 = vmatprep.subr.mxu1 %v9822_v18 }
 0xf41   : > { %7477 = vmatprep.mubr.msk.f32.mxu1 %vm613_vm0, %v9501_v41  ;;  %7505 = vmatpush3.xpose.msra.mxu1 %v9822_v18 }
 0xf42   : > { %7536 = vmatprep.subr.msk.mxu1 %vm799_vm7, %v9279_v24 }
 0xf44   : > { %7478 = vmatmul.mubr.msk.f32.gmra.mxu1 %vm613_vm0, %v9510_v28 }
 0xf45   : > { %7480 = vmatprep.mubr.msk.f32.mxu1 %vm613_vm0, %v9515_v1 }
 0xf48   : > { %7481 = vmatmul.mubr.msk.f32.gmra.mxu1 %vm613_vm0, %v9521_v30 }
 0xf49   : > { %7506 = vmatprep.mubr.msk.f32.mxu1 %vm799_vm7, %v9253_v63  ;;  %v9543_v63 = vpop.permute.xlu0 %5165 }
 0xf4c   : > { %7507 = vmatmul.mubr.msk.f32.vlgmr.msra.gmra.mxu1 %vm799_vm7, %v9261_v31  ;;  %v9561_v31 = vpop.permute.xlu1 %5167 }
 0xf4d   : > { %7537 = vmatpush3.xpose.msk.msra.mxu1 %vm799_vm7, %v9279_v24  ;;  %7509 = vmatprep.mubr.msk.f32.mxu1 %vm799_vm7, %v9265_v25  ;;  %v9565_v25 = vpop.permute.xlu0 %5169 }
 0xf4e   : > { %7538 = vmatprep.subr.msk.mxu1 %vm799_vm7, %v9289_v43 }
 0xf50   : > { %7510 = vmatmul.mubr.msk.f32.gmra.mxu1 %vm799_vm7, %v9269_v50  ;;  %v9571_v50 = vpop.permute.xlu1 %5171 }
 0xf51   : > { %7539 = vmatpush3.xpose.msk.msra.mxu1 %vm799_vm7, %v9289_v43  ;;  %7512 = vmatprep.mubr.msk.f32.mxu1 %vm799_vm7, %v9273_v29  ;;  %v9579_v29 = vpop.permute.xlu0 %5173 }
 0xf52   : > { %7540 = vmatprep.subr.msk.mxu1 %vm799_vm7, %v9293_v6 }
 0xf54   : > { %7513 = vmatmul.mubr.msk.f32.gmra.mxu1 %vm799_vm7, %v9277_v11  ;;  %v9589_v11 = vpop.permute.xlu1 %5175 }
 0xf55   : > { %7541 = vmatpush3.xpose.msk.msra.mxu1 %vm799_vm7, %v9293_v6  ;;  %7548 = vmatprep.mubr.msk.f32.mxu1 %vm799_vm7, %v9543_v63 }
 0xf56   : > { %7542 = vmatprep.subr.msk.mxu1 %vm799_vm7, %v9301_v45 }
 0xf59   : > { %7543 = vmatpush3.xpose.msk.msra.mxu1 %vm799_vm7, %v9301_v45 }
 0xf5a   : > { %7544 = vmatprep.subr.msk.mxu1 %vm799_vm7, %v9305_v44 }
 0xf5d   : > { %7545 = vmatpush3.xpose.msk.msra.mxu1 %vm799_vm7, %v9305_v44 }
 0xf5e   : > { %7546 = vmatprep.subr.msk.mxu1 %vm799_vm7, %v9311_v10 }
 0xf61   : > { %7547 = vmatpush3.xpose.msk.msra.mxu1 %vm799_vm7, %v9311_v10 }
 0xf62   : > { %7589 = vmatprep.subr.msk.mxu1 %vm799_vm7, %v9227_v55 }
 0xf64   : > { %7549 = vmatmul.mubr.msk.f32.vlgmr.msra.gmra.mxu1 %vm799_vm7, %v9561_v31 }
 0xf65   : > { %7551 = vmatprep.mubr.msk.f32.mxu1 %vm799_vm7, %v9565_v25  ;;  %7590 = vmatpush3.xpose.msk.msra.mxu1 %vm799_vm7, %v9227_v55 }
 0xf66   : > { %7591 = vmatprep.subr.msk.mxu1 %vm799_vm7, %v9233_v37 }
 0xf68   : > { %7552 = vmatmul.mubr.msk.f32.gmra.mxu1 %vm799_vm7, %v9571_v50 }
 0xf69   : > { %7554 = vmatprep.mubr.msk.f32.mxu1 %vm799_vm7, %v9579_v29  ;;  %7592 = vmatpush3.xpose.msk.msra.mxu1 %vm799_vm7, %v9233_v37  ;;  %v7497_v37 = vpop.f32.mrf.mxu0 }
 0xf6a   : > { %7593 = vmatprep.subr.msk.mxu1 %vm799_vm7, %v9237_v39 }
 0xf6c   : > { %7555 = vmatmul.mubr.msk.f32.gmra.mxu1 %vm799_vm7, %v9589_v11 }
 0xf6d   : > { %7594 = vmatpush3.xpose.msk.msra.mxu1 %vm799_vm7, %v9237_v39  ;;  %7601 = vmatprep.mubr.msk.f32.mxu1 %vm799_vm7, %v9543_v63 }
 0xf6e   : > { %7595 = vmatprep.subr.msk.mxu1 %vm799_vm7, %v9241_v14 }
 0xf71   : > { %7596 = vmatpush3.xpose.msk.msra.mxu1 %vm799_vm7, %v9241_v14 }
 0xf72   : > { %7597 = vmatprep.subr.msk.mxu1 %vm799_vm7, %v9245_v61 }
 0xf75   : > { %7598 = vmatpush3.xpose.msk.msra.mxu1 %vm799_vm7, %v9245_v61 }
 0xf76   : > { %7599 = vmatprep.subr.msk.mxu1 %vm799_vm7, %v9249_v42 }
 0xf79   : > { %7600 = vmatpush3.xpose.msk.msra.mxu1 %vm799_vm7, %v9249_v42  ;;  %v4922_v42 = vpop.f32.mrf.mxu0 }
 0xf7b   : > { %v7500_v6 = vpop.f32.mrf.mxu0 }
 0xf7c   : > { %7602 = vmatmul.mubr.msk.f32.vlgmr.msra.gmra.mxu1 %vm799_vm7, %v9561_v31 }
 0xf7d   : > { %7604 = vmatprep.mubr.msk.f32.mxu1 %vm799_vm7, %v9565_v25  ;;  %v4932_v10 = vpop.f32.mrf.mxu0 }
 0xf7f   : > { %v7503_v3 = vpop.f32.mrf.mxu0 }
 0xf80   : > { %7605 = vmatmul.mubr.msk.f32.gmra.mxu1 %vm799_vm7, %v9571_v50 }
 0xf81   : > { %7607 = vmatprep.mubr.msk.f32.mxu1 %vm799_vm7, %v9579_v29  ;;  %v4942_v38 = vpop.f32.mrf.mxu0 }
 0xf84   : > { %7608 = vmatmul.mubr.msk.f32.gmra.mxu1 %vm799_vm7, %v9589_v11 }
0x1000   : > { %v7476_v55 = vpop.f32.mrf.mxu1 }
0x1001   : > { %v4809_v57 = vadd.f32 %v7476_v55, %v9498_v47 }
0x1002   : > { %v4779_v39 = vpop.f32.mrf.mxu1 }
0x1003   : > { %v4808_v14 = vadd.f32 %v4779_v39, %v9493_v53 }
0x1004   : > { %v7479_v61 = vpop.f32.mrf.mxu1 }
0x1005   : > { %7527 = vmatprep.mubr.msk.f32.mxu0 %vm613_vm0, %v4808_v14  ;;  %v4811_v16 = vadd.f32 %v7479_v61, %v9510_v28 }
0x1006   : > { %v4789_v24 = vpop.f32.mrf.mxu1 }
0x1007   : > { %v4810_v17 = vadd.f32 %v4789_v24, %v9501_v41 }
0x1008   : > { %v7482_v43 = vpop.f32.mrf.mxu1 }
0x100a   : > { %v4799_v45 = vpop.f32.mrf.mxu1 }
0x100b   : > { %v4812_v52 = vadd.f32 %v4799_v45, %v9515_v1 }
0x100c   : > { %v7508_v44 = vpop.f32.mrf.mxu1 }
0x100d   : > { %v5023_v33 = vadd.f32 %v7508_v44, %v7497_v37 }
0x100e   : > { %v5017_v35 = vpop.f32.mrf.mxu1 }
0x100f   : > { %v5018_v49 = vadd.f32 %v5017_v35, %v4922_v42 }
0x1010   : > { %v7511_v40 = vpop.f32.mrf.mxu1 }
0x1011   : > { %v5033_v5 = vadd.f32 %v7511_v40, %v7500_v6 }
0x1012   : > { %v5027_v34 = vpop.f32.mrf.mxu1 }
0x1013   : > { %v5028_v0 = vadd.f32 %v5027_v34, %v4932_v10 }
0x1014   : > { %v7514_v51 = vpop.f32.mrf.mxu1 }
0x1015   : > { %v5043_v54 = vadd.f32 %v7514_v51, %v7503_v3 }
0x1016   : > { %v5037_v15 = vpop.f32.mrf.mxu1 }
0x1017   : > { %v5038_v56 = vadd.f32 %v5037_v15, %v4942_v38  ;;  %7515 = vmatprep.subr.mxu0 %v5043_v54 }
0x1018   : > { %7516 = vmatpush3.msra.mxu0 %v5043_v54 }
0x1019   : > { %7517 = vmatprep.subr.mxu0 %v5038_v56 }
0x101a   : > { %7518 = vmatpush3.msra.mxu0 %v5038_v56 }
0x101b   : > { %7519 = vmatprep.subr.mxu0 %v5033_v5 }
0x101c   : > { %7520 = vmatpush3.msra.mxu0 %v5033_v5 }
0x101d   : > { %7521 = vmatprep.subr.mxu0 %v5028_v0 }
0x101e   : > { %7522 = vmatpush3.msra.mxu0 %v5028_v0 }
0x101f   : > { %7523 = vmatprep.subr.mxu0 %v5023_v33 }
0x1020   : > { %7524 = vmatpush3.msra.mxu0 %v5023_v33 }
0x1021   : > { %7525 = vmatprep.subr.mxu0 %v5018_v49 }
0x1022   : > { %7526 = vmatpush3.msra.mxu0 %v5018_v49 }
0x1023   : > { %7528 = vmatmul.mubr.msk.f32.vlgmr.msra.gmra.mxu0 %vm613_vm0, %v4809_v57  ;;  %7557 = vmatprep.subr.mxu0 %v9315_v9 }
0x1024   : > { %v7550_v12 = vpop.f32.mrf.mxu1  ;;  %7530 = vmatprep.mubr.msk.f32.mxu0 %vm613_vm0, %v4810_v17  ;;  %7558 = vmatpush3.msra.mxu0 %v9315_v9  ;;  %v4813_v9 = vadd.f32 %v7482_v43, %v9521_v30 }
0x1025   : > { %7559 = vmatprep.subr.mxu0 %v9319_v26 }
0x1026   : > { %v5255_v27 = vpop.f32.mrf.mxu1  ;;  %7560 = vmatpush3.msra.mxu0 %v9319_v26 }
0x1027   : > { %7531 = vmatmul.mubr.msk.f32.gmra.mxu0 %vm613_vm0, %v4811_v16  ;;  %7561 = vmatprep.subr.mxu0 %v9323_v48  ;;  %v5284_v8 = vmul.f32 %v8386_v4, %v5255_v27  ;;  %v9841_v27 = vld [vmem:[#allocation27_spill] sm:$0xff] }
0x1028   : > { %v7553_v53 = vpop.f32.mrf.mxu1  ;;  %7533 = vmatprep.mubr.msk.f32.mxu0 %vm613_vm0, %v4812_v52  ;;  %7562 = vmatpush3.msra.mxu0 %v9323_v48  ;;  %v5285_v48 = vmul.f32 %v7550_v12, %v9823_v46  ;;  %v9840_v12 = vld [vmem:[#allocation26_spill] sm:$0xff] }
0x1029   : > { %7563 = vmatprep.subr.mxu0 %v9327_v36 }
0x102a   : > { %v5265_v62 = vpop.f32.mrf.mxu1  ;;  %7564 = vmatpush3.msra.mxu0 %v9327_v36  ;;  %v5287_v36 = vmul.f32 %v7553_v53, %v9825_v19 }
0x102b   : > { %7534 = vmatmul.mubr.msk.f32.gmra.mxu0 %vm613_vm0, %v4813_v9  ;;  %7565 = vmatprep.subr.mxu0 %v9331_v59  ;;  %v5286_v13 = vmul.f32 %v9824_v22, %v5265_v62 }
0x102c   : > { %v7556_v26 = vpop.f32.mrf.mxu1  ;;  %7566 = vmatpush3.msra.mxu0 %v9331_v59  ;;  %7569 = vmatprep.mubr.msk.f32.mxu0 %vm613_vm0, %v5284_v8  ;;  %v9842_v8 = vld [vmem:[#allocation28_spill] sm:$0xff] }
0x102d   : > { %7567 = vmatprep.subr.mxu0 %v9335_v20  ;;  %v5289_v2 = vmul.f32 %v7556_v26, %v9827_v21 }
0x102e   : > { %7568 = vmatpush3.msra.mxu0 %v9335_v20  ;;  %v5275_v32 = vpop.f32.mrf.mxu1 }
0x102f   : > { %7570 = vmatmul.mubr.msk.f32.vlgmr.msra.gmra.mxu0 %vm613_vm0, %v5285_v48  ;;  %7578 = vmatprep.subr.mxu0 %v9822_v18  ;;  %v5288_v59 = vmul.f32 %v9826_v23, %v5275_v32  ;;  %v9843_v48 = vld [vmem:[#allocation29_spill] sm:$0xff] }
0x1030   : > { %7572 = vmatprep.mubr.msk.f32.mxu0 %vm613_vm0, %v5286_v13  ;;  %7579 = vmatpush3.xpose.msra.mxu0 %v9822_v18 }
0x1033   : > { %7573 = vmatmul.mubr.msk.f32.gmra.mxu0 %vm613_vm0, %v5287_v36  ;;  %v9844_v36 = vld [vmem:[#allocation30_spill] sm:$0xff] }
0x1034   : > { %7575 = vmatprep.mubr.msk.f32.mxu0 %vm613_vm0, %v5288_v59 }
0x1037   : > { %7576 = vmatmul.mubr.msk.f32.gmra.mxu0 %vm613_vm0, %v5289_v2 }
0x1038   : > { %7580 = vmatprep.mubr.msk.f32.mxu0 %vm799_vm7, %v9543_v63 }
0x103b   : > { %7581 = vmatmul.mubr.msk.f32.vlgmr.msra.gmra.mxu0 %vm799_vm7, %v9561_v31 }
0x103c   : > { %v7603_v20 = vpop.f32.mrf.mxu1  ;;  %7583 = vmatprep.mubr.msk.f32.mxu0 %vm799_vm7, %v9565_v25 }
0x103d   : > { %v5594_v31 = vmul.f32 %v7603_v20, %v9823_v46  ;;  %v9847_v20 = vld [vmem:[#allocation37_spill] sm:$0xff] }
0x103e   : > { %v5564_v18 = vpop.f32.mrf.mxu1 }
0x103f   : > { %7584 = vmatmul.mubr.msk.f32.gmra.mxu0 %vm799_vm7, %v9571_v50  ;;  %v5593_v60 = vmul.f32 %v8386_v4, %v5564_v18 }
0x1040   : > { %7586 = vmatprep.mubr.msk.f32.mxu0 %vm799_vm7, %v9579_v29  ;;  %v7606_v1 = vpop.f32.mrf.mxu1 }
0x1041   : > { %v5596_v29 = vmul.f32 %v7606_v1, %v9825_v19 }
0x1042   : > { %v5574_v63 = vpop.f32.mrf.mxu1 }
0x1043   : > { %7587 = vmatmul.mubr.msk.f32.gmra.mxu0 %vm799_vm7, %v9589_v11  ;;  %v5595_v25 = vmul.f32 %v9824_v22, %v5574_v63 }
0x1044   : > { %7622 = vmatprep.mubr.msk.f32.mxu0 %vm613_vm0, %v5593_v60  ;;  %v7609_v4 = vpop.f32.mrf.mxu1 }
0x1045   : > { %v5598_v55 = vmul.f32 %v7609_v4, %v9827_v21 }
0x1046   : > { %v5584_v50 = vpop.f32.mrf.mxu1 }
0x1047   : > { %v5597_v11 = vmul.f32 %v9826_v23, %v5584_v50 }
0x10e3   : > { %v7529_v58 = vpop.f32.mrf.mxu0 }
0x10e5   : > { %v5130_v47 = vpop.f32.mrf.mxu0 }
0x10e7   : > { %v7532_v41 = vpop.f32.mrf.mxu0 }
0x10e9   : > { %v5140_v7 = vpop.f32.mrf.mxu0 }
0x10eb   : > { %v7535_v28 = vpop.f32.mrf.mxu0 }
0x10ec   : > { %7610 = vmatprep.subr.mxu0 %v7535_v28 }
0x10ed   : > { %v5150_v30 = vpop.f32.mrf.mxu0  ;;  %7611 = vmatpush3.msra.mxu0 %v7535_v28 }
0x10ee   : > { %7612 = vmatprep.subr.mxu0 %v5150_v30 }
0x10ef   : > { %7613 = vmatpush3.msra.mxu0 %v5150_v30  ;;  %v7571_v46 = vpop.f32.mrf.mxu0 }
0x10f0   : > { %7614 = vmatprep.subr.mxu0 %v7532_v41 }
0x10f1   : > { %7615 = vmatpush3.msra.mxu0 %v7532_v41  ;;  %v5374_v22 = vpop.f32.mrf.mxu0 }
0x10f2   : > { %7616 = vmatprep.subr.mxu0 %v5140_v7 }
0x10f3   : > { %7617 = vmatpush3.msra.mxu0 %v5140_v7  ;;  %v7574_v37 = vpop.f32.mrf.mxu0 }
0x10f4   : > { %7618 = vmatprep.subr.mxu0 %v7529_v58 }
0x10f5   : > { %7619 = vmatpush3.msra.mxu0 %v7529_v58  ;;  %v5384_v39 = vpop.f32.mrf.mxu0 }
0x10f6   : > { %7620 = vmatprep.subr.mxu0 %v5130_v47 }
0x10f7   : > { %7621 = vmatpush3.msra.mxu0 %v5130_v47  ;;  %v7577_v14 = vpop.f32.mrf.mxu0 }
0x10f8   : > { %7623 = vmatmul.mubr.msk.f32.vlgmr.msra.gmra.mxu0 %vm613_vm0, %v5594_v31 }
0x10f9   : > { %7625 = vmatprep.mubr.msk.f32.mxu0 %vm613_vm0, %v5595_v25  ;;  %v5394_v61 = vpop.f32.mrf.mxu0 }
0x10fb   : > { %v7582_v42 = vpop.f32.mrf.mxu0 }
0x10fc   : > { %7626 = vmatmul.mubr.msk.f32.gmra.mxu0 %vm613_vm0, %v5596_v29  ;;  %v5475_v45 = vadd.f32 %v7582_v42, %v7571_v46 }
0x10fd   : > { %7628 = vmatprep.mubr.msk.f32.mxu0 %vm613_vm0, %v5597_v11  ;;  %v5469_v24 = vpop.f32.mrf.mxu0 }
0x10fe   : > { %v5470_v10 = vadd.f32 %v5469_v24, %v5374_v22 }
0x10ff   : > { %v7585_v43 = vpop.f32.mrf.mxu0 }
0x1100   : > { %7629 = vmatmul.mubr.msk.f32.gmra.mxu0 %vm613_vm0, %v5598_v55  ;;  %v5485_v21 = vadd.f32 %v7585_v43, %v7574_v37 }
0x1101   : > { %v5479_v19 = vpop.f32.mrf.mxu0 }
0x1102   : > { %v5480_v51 = vadd.f32 %v5479_v19, %v5384_v39 }
0x1103   : > { %v7588_v6 = vpop.f32.mrf.mxu0 }
0x1104   : > { %v5495_v15 = vadd.f32 %v7588_v6, %v7577_v14 }
0x1105   : > { %v5489_v23 = vpop.f32.mrf.mxu0 }
0x1106   : > { %v5490_v0 = vadd.f32 %v5489_v23, %v5394_v61 }
0x11b8   : > { %v7624_v44 = vpop.f32.mrf.mxu0 }
0x11b9   : > { %v5713_v35 = vadd.f32 %v7624_v44, %v5475_v45 }
0x11ba   : > { %v5683_v40 = vpop.f32.mrf.mxu0 }
0x11bb   : > { %v5712_v3 = vadd.f32 %v5683_v40, %v5470_v10  ;;  %5726 = vrot.lane.b32.xlu1 %v5713_v35, %s8111_s9 }
0x11bc   : > { %v7627_v34 = vpop.f32.mrf.mxu0 }
0x11bd   : > { %v5715_v54 = vadd.f32 %v7627_v34, %v5485_v21  ;;  %5724 = vrot.lane.b32.xlu0 %v5712_v3, %s8111_s9 }
0x11be   : > { %v5693_v38 = vpop.f32.mrf.mxu0 }
0x11bf   : > { %v5714_v56 = vadd.f32 %v5693_v38, %v5480_v51  ;;  %5730 = vrot.lane.b32.xlu1 %v5715_v54, %s8111_s9 }
0x11c0   : > { %v7630_v5 = vpop.f32.mrf.mxu0 }
0x11c1   : > { %v5717_v33 = vadd.f32 %v7630_v5, %v5495_v15  ;;  %5728 = vrot.lane.b32.xlu0 %v5714_v56, %s8111_s9 }
0x11c2   : > { %v5703_v49 = vpop.f32.mrf.mxu0 }
0x11c3   : > { %v5716_v57 = vadd.f32 %v5703_v49, %v5490_v0  ;;  %5734 = vrot.lane.b32.xlu1 %v5717_v33, %s8111_s9 }
0x11c5   : > { %5732 = vrot.lane.b32.xlu0 %v5716_v57, %s8111_s9 }
0x122d   : > { %v5727_v17 = vpop.permute.xlu1 %5726 }
0x122e   : > { %v5743_v16 = vsel %vm799_vm7, %v9840_v12, %v5727_v17 }
0x122f   : > { %5749 = vst [vmem:[%s495_s8 + $0x8] sm:$0xff] %v5743_v16  ;;  %v5725_v52 = vpop.permute.xlu0 %5724 }
0x1230   : > { %v5742_v53 = vsel %vm799_vm7, %v9841_v27, %v5725_v52 }
0x1231   : > { %5748 = vst [vmem:[%s495_s8] sm:$0xff] %v5742_v53  ;;  %v5731_v9 = vpop.permute.xlu1 %5730 }
0x1232   : > { %v5745_v62 = vsel %vm799_vm7, %v9842_v8, %v5731_v9 }
0x1233   : > { %5751 = vst [vmem:[%s495_s8 + $0x18] sm:$0xff] %v5745_v62  ;;  %v5729_v26 = vpop.permute.xlu0 %5728 }
0x1234   : > { %v5744_v13 = vsel %vm799_vm7, %v9843_v48, %v5729_v26 }
0x1235   : > { %5750 = vst [vmem:[%s495_s8 + $0x10] sm:$0xff] %v5744_v13  ;;  %v5735_v32 = vpop.permute.xlu1 %5734 }
0x1236   : > { %v5747_v59 = vsel %vm799_vm7, %v9844_v36, %v5735_v32 }
0x1237   : > { %5753 = vst [vmem:[%s495_s8 + $0x28] sm:$0xff] %v5747_v59  ;;  %v5733_v2 = vpop.permute.xlu0 %5732 }
0x1238   : > { %v5746_v18 = vsel %vm799_vm7, %v9847_v20, %v5733_v2 }
0x1239   : > { %5752 = vst [vmem:[%s495_s8 + $0x20] sm:$0xff] %v5746_v18 }
0x123a   : > { %8021 = shalt.err (!%p8018_p7)
}
0x123b   : > { %s8022_s15 = scalar_lea.hbm %s9704_s23, 768  ;;  %s8026_s7 = scalar_lea.hbm %s9846_s11, 1536 }
0x123c   : > { %p8023_p10 = scmp.ne.s32.totalorder %s9704_s23, %s8022_s15  ;;  %p8027_p5 = scmp.lt.s32.totalorder %s9704_s23, %s9846_s11 }
0x123d   : > { %p8028_p6 = scmp.lt.s32.totalorder %s8026_s7, %s8022_s15 }
0x123e   : > { %p8024_p13 = pnand %p8023_p10, %p8205_p9 }
0x123f   : > { %p8029_p8 = por %p8028_p6, %p8027_p5 }
0x1240   : > { %p8025_p12 = pneg %p8024_p13 }
0x1242   : > { %p8030_p0 = pnand %p8029_p8, %p8025_p12 }
0x1244   : > { %8033 = shalt.err (!%p8030_p0)
}
0x1245   : > { %s8113_s17 = smov 128   ;;  %s8114_s27 = smov 8  }
0x1246   : > { %7657 = dma.vmem_to_hbm [thread:$0]  (%p8205_p9), %s9697_s3, 768, %s9704_s23, %s5755_s24, %s8113_s17, %s8113_s17, %s8114_s27  }
0x1247 PF: > { %s9848_s28 = sld [smem:[#allocation19_spill]] }
0x1248   : > { %s9850_s9 = sld [smem:[#allocation22_spill]] }
0x124d   : > { %s5784_s8 = sand.u32 1, %s9848_s28  }
0x124e   : > { %p9851_p3 = scmp.ge.s32.totalorder %s9850_s9, 2  ;;  %s5785_s18 = scalar_lea.sflag [#allocation4], %s5784_s8 }
0x1250   : > { %p7679_p4 = pnand %p9851_p3, %p8212_p11 }
0x1252   : > { %p7680_p1 = pneg %p7679_p4 }
0x1254   : > { %8075 = dma.done.wait (%p7680_p1), %s5785_s18, 768  }
0x1255   : > { %8077 = vsyncadd (%p7680_p1), %s5785_s18, 4294966528  ;;  %s31_s26 = sadd.s32 1, %s9850_s9   ;;  %s9852_s30 = sld [smem:[#allocation20_spill]] }
0x1256   : > { %p28_p2 = scmp.ge.s32.totalorder %s31_s26, 4   ;;  %s9853_s23 = sld [smem:[#allocation24_spill]] }
0x1257   : > { %s9854_s24 = sld [smem:[#allocation21_spill]]  ;;  %s9856_s21 = smov %s8084_s22 }
0x1258   : > { %s9855_s25 = sld [smem:[#allocation23_spill]]  ;;  %30 = sbr.rel (!%p28_p2) target bundleno = 16 (0x10), region = 150 }
0x125b   : > { %s9857_s22 = smov %s9852_s30 }
0x125d   :  { %5790 = vsyncpa [#allocation3], 1 }
0x125e   :  { %5792 = vsyncpa [#allocation3 + $0x1], 1 }
0x125f   :  { %5793 = vsyncpa [#allocation6], 1 }
0x1260   :  { %5795 = vsyncpa [#allocation6 + $0x1], 1 }
0x1261   :  { %5796 = vsyncpa [#allocation9], 1 }
0x1262   :  { %5798 = vsyncpa [#allocation9 + $0x1], 1 }
0x1263   :  { %5799 = vsyncpa [#allocation12], 1 }
0x1264   :  { %5801 = vsyncpa [#allocation12 + $0x1], 1 }
0x1265   :  { %5802 = vsyncpa [#allocation4], 1 }
0x1266   :  { %5804 = vsyncpa [#allocation4 + $0x1], 1 }

</bundles_post_ra>
